<compile_context>
chip_gen: v5e
topology: v5e:2x2
jax: 0.10.0
libtpu: 0.0.40
codegen_flags: <defaults>
</compile_context>

<pallas_src>
import jax
import jax.numpy as jnp
from jax import lax
from jax.experimental import pallas as pl
from jax.experimental.pallas import tpu as pltpu


# ----------------------------------------------------------------------------
# Fused GRU kernel: hoisted per-block input projection + unrolled recurrence
# ----------------------------------------------------------------------------
def _gru_fused_kernel(x_ref, len_ref, wih_ref, whh_ref, b_ref, bhn_ref,
                      out_ref, hn_ref, h_scr):
    """One grid step == TIME_BLOCK timesteps of the GRU for one batch block.

    x_ref   : (Tb, Bb, Hp)  bf16  padded inputs for this (time, batch) block
    len_ref : (Bb, 1)       int32 valid sequence lengths for this batch block
    wih_ref : (Hp, 3*Hp)    bf16  W_ih^T (gates r/z/n in lane-aligned slabs)
    whh_ref : (Hp, 3*Hp)    bf16  W_hh^T (same layout)
    b_ref   : (1, 3*Hp)     f32   fused biases [b_ih_r+b_hh_r, b_ih_z+b_hh_z, b_ih_n]
    bhn_ref : (1, Hp)       f32   hidden bias of the n gate (stays inside r*(...))
    out_ref : (Tb, Bb, Hp)  f32   padded outputs for this block
    hn_ref  : (1, Bb, Hp)   f32   final hidden (same block across the time axis)
    h_scr   : (Bb, Hp)      f32   hidden state carried across time blocks
    """
    t_blk = pl.program_id(1)
    tb, bb, hp = x_ref.shape

    @pl.when(t_blk == 0)
    def _():
        h_scr[...] = jnp.zeros_like(h_scr)      # hidden=None -> zero init

    # ---- Hoisted input projection for the whole block: one MXU matmul with
    #      M = Tb*Bb rows (fused here so gi never round-trips through HBM). ---
    x2 = x_ref[...].reshape(tb * bb, hp)                              # bf16
    gi_blk = jnp.dot(x2, wih_ref[...], preferred_element_type=jnp.float32)
    gi_blk = (gi_blk + b_ref[...]).reshape(tb, bb, 3 * hp)            # f32

    # Grid-invariant loads / broadcasts hoisted out of the unrolled loop.
    whh = whh_ref[...]                                                # (Hp, 3Hp) bf16
    bhn = jnp.broadcast_to(bhn_ref[...], (bb, hp))                    # (Bb, Hp)  f32
    lens = len_ref[...]                                               # (Bb, 1)   int32
    t0 = t_blk * tb

    # Fully unrolled recurrence (static slices / stores; only h@W_hh^T per step).
    h = h_scr[...]
    for j in range(tb):
        gi = gi_blk[j]                                                # (Bb, 3Hp) f32
        m = ((t0 + j) < lens).astype(jnp.float32)                     # (Bb, 1)   f32
        gh = jnp.dot(h.astype(jnp.bfloat16), whh,
                     preferred_element_type=jnp.float32)              # (Bb, 3Hp) f32
        # Lane-aligned gate slabs: [0:Hp]=r, [Hp:2Hp]=z, [2Hp:3Hp]=n.
        r = jax.nn.sigmoid(gi[:, :hp] + gh[:, :hp])
        z = jax.nn.sigmoid(gi[:, hp:2 * hp] + gh[:, hp:2 * hp])
        n = jnp.tanh(gi[:, 2 * hp:] + r * (gh[:, 2 * hp:] + bhn))
        h_new = n + z * (h - n)                                       # (1-z)*n + z*h
        # Packed-sequence semantics: zero padded outputs, carry h past length.
        out_ref[j] = m * h_new
        h = h + m * (h_new - h)
    h_scr[...] = h

    @pl.when(t_blk == pl.num_programs(1) - 1)
    def _():
        hn_ref[0] = h


# ----------------------------------------------------------------------------
# Host-side wrapper
# ----------------------------------------------------------------------------
def _round_up(x, m):
    return ((x + m - 1) // m) * m


def _pack_gate_weight_t(w, H, H_pad):
    """(3H, H) PyTorch gate-stacked weight -> (H_pad, 3*H_pad) transposed,
    with each gate (r, z, n) placed in its own lane-aligned H_pad-wide slab."""
    out = jnp.zeros((H_pad, 3 * H_pad), jnp.float32)
    for g in range(3):
        out = out.at[:H, g * H_pad:g * H_pad + H].set(w[g * H:(g + 1) * H, :].T)
    return out


def context_encoder_forward(input_seq, input_lengths, w_ih, w_hh, b_ih, b_hh,
                            *, time_block=16, batch_block=None,
                            vmem_limit_bytes=None):
    """input_seq: (T, B, H) f32 time-major; input_lengths: (B,) int.

    Returns (outputs (T, B, H), hidden (1, B, H)) matching
    ContextEncoderRNN.forward with hidden=None, n_layers=1.
    """
    T, B, H = input_seq.shape
    H_pad = _round_up(max(H, 128), 128)          # lane-aligned hidden size
    B_pad = _round_up(max(B, 8), 8)              # sublane-aligned batch
    if batch_block is None:
        # nb = 1: correct choice for single-TensorCore v5e / v6e (no grid
        # overhead, maximal M per matmul).  On v7x (2 TCs) pass
        # batch_block=_round_up(B_pad // 2, 8) so nb >= 2 and both cores work.
        Bb = B_pad
    else:
        Bb = _round_up(batch_block, 8)
    B_pad = _round_up(B_pad, Bb)
    Tb = int(time_block)
    T_pad = _round_up(T, Tb)
    nb, nt = B_pad // Bb, T_pad // Tb
    G3 = 3 * H_pad

    # ---- parameter repacking (once, outside the recurrence) ----------------
    w_ih = jnp.asarray(w_ih, jnp.float32)
    w_hh = jnp.asarray(w_hh, jnp.float32)
    b_ih = jnp.asarray(b_ih, jnp.float32)
    b_hh = jnp.asarray(b_hh, jnp.float32)
    wih_t = _pack_gate_weight_t(w_ih, H, H_pad).astype(jnp.bfloat16)  # (Hp, 3Hp)
    whh_t = _pack_gate_weight_t(w_hh, H, H_pad).astype(jnp.bfloat16)  # (Hp, 3Hp)
    # Fused biases: r/z hidden biases fold into the input side; the n-gate
    # hidden bias must stay inside r*(...) so it is passed alone.
    b_fused = jnp.zeros((1, G3), jnp.float32)
    b_fused = b_fused.at[0, 0:H].set(b_ih[0:H] + b_hh[0:H])                      # r
    b_fused = b_fused.at[0, H_pad:H_pad + H].set(b_ih[H:2 * H] + b_hh[H:2 * H])  # z
    b_fused = b_fused.at[0, 2 * H_pad:2 * H_pad + H].set(b_ih[2 * H:3 * H])      # n (input only)
    b_hn = jnp.zeros((1, H_pad), jnp.float32).at[0, :H].set(b_hh[2 * H:3 * H])

    # ---- padded inputs and lengths ------------------------------------------
    x_pad = jnp.zeros((T_pad, B_pad, H_pad), jnp.float32)
    x_pad = x_pad.at[:T, :B, :H].set(jnp.asarray(input_seq, jnp.float32))
    x_bf16 = x_pad.astype(jnp.bfloat16)
    lengths = jnp.zeros((B_pad, 1), jnp.int32)
    lengths = lengths.at[:B, 0].set(jnp.asarray(input_lengths, jnp.int32))

    # ---- explicit VMEM budget from the actual block sizes (+50% headroom) ---
    def _est_vmem_bytes():
        x_blk = Tb * Bb * H_pad * 2           # bf16 input block
        out_blk = Tb * Bb * H_pad * 4         # f32 output block
        hn_blk = Bb * H_pad * 4               # f32 final-hidden block
        len_blk = Bb * 128 * 4                # last-dim-1 pads to 128 lanes
        w_res = 2 * H_pad * G3 * 2            # both weights, bf16, single-buffered
        bias = 8 * G3 * 4 + 8 * H_pad * 4     # fused bias + b_hn (sublane-padded)
        gi_tmp = Tb * Bb * G3 * 4             # in-kernel gi intermediate (f32)
        h_scr_b = Bb * H_pad * 4
        dbl = 2 * (x_blk + out_blk + hn_blk + len_blk)   # double-buffered streams
        return dbl + w_res + bias + 2 * gi_tmp + h_scr_b

    if vmem_limit_bytes is None:
        vmem_limit_bytes = min(max(int(_est_vmem_bytes() * 1.5), 32 << 20),
                               100 << 20)

    resident = dict(pipeline_mode=pl.Buffered(1))   # constant index_map -> 1 buffer

    # NOTE: time axis must stay the innermost grid axis and "arbitrary";
    # the batch axis is "parallel" (safe: h_scr carry is per batch block).
    outputs_p, hidden_p = pl.pallas_call(
        _gru_fused_kernel,
        out_shape=(
            jax.ShapeDtypeStruct((T_pad, B_pad, H_pad), jnp.float32),
            jax.ShapeDtypeStruct((1, B_pad, H_pad), jnp.float32),
        ),
        grid_spec=pltpu.PrefetchScalarGridSpec(
            num_scalar_prefetch=0,
            grid=(nb, nt),                           # (batch blocks, time blocks)
            in_specs=[
                pl.BlockSpec((Tb, Bb, H_pad), lambda b, t: (t, b, 0)),   # x
                pl.BlockSpec((Bb, 1), lambda b, t: (b, 0)),              # lengths
                pl.BlockSpec((H_pad, G3), lambda b, t: (0, 0), **resident),  # W_ih^T
                pl.BlockSpec((H_pad, G3), lambda b, t: (0, 0), **resident),  # W_hh^T
                pl.BlockSpec((1, G3), lambda b, t: (0, 0), **resident),      # fused bias
                pl.BlockSpec((1, H_pad), lambda b, t: (0, 0), **resident),   # b_hh_n
            ],
            out_specs=[
                pl.BlockSpec((Tb, Bb, H_pad), lambda b, t: (t, b, 0)),   # outputs
                pl.BlockSpec((1, Bb, H_pad), lambda b, t: (0, b, 0)),    # final hidden
            ],
            scratch_shapes=[pltpu.VMEM((Bb, H_pad), jnp.float32)],       # carried h
        ),
        compiler_params=pltpu.CompilerParams(
            dimension_semantics=("parallel", "arbitrary"),
            vmem_limit_bytes=vmem_limit_bytes,
        ),
    )(x_bf16, lengths, wih_t, whh_t, b_fused, b_hn)

    outputs = outputs_p[:T, :B, :H]
    hidden = hidden_p[:, :B, :H]
    return outputs, hidden


# ----------------------------------------------------------------------------
# Pure-JAX reference (identical packed-sequence semantics, full f32)
# ----------------------------------------------------------------------------
def _reference_gru(input_seq, input_lengths, w_ih, w_hh, b_ih, b_hh):
    T, B, H = input_seq.shape
    h0 = jnp.zeros((B, H), jnp.float32)

    def step(h, inputs):
        x, t = inputs
        gi = x @ w_ih.T + b_ih
        gh = h @ w_hh.T + b_hh
        i_r, i_z, i_n = gi[:, :H], gi[:, H:2 * H], gi[:, 2 * H:]
        h_r, h_z, h_n = gh[:, :H], gh[:, H:2 * H], gh[:, 2 * H:]
        r = jax.nn.sigmoid(i_r + h_r)
        z = jax.nn.sigmoid(i_z + h_z)
        n = jnp.tanh(i_n + r * h_n)
        h_new = (1.0 - z) * n + z * h
        valid = (t < input_lengths)[:, None]
        h_out = jnp.where(valid, h_new, h)
        return h_out, jnp.where(valid, h_new, 0.0)

    h_last, outs = jax.lax.scan(step, h0, (input_seq, jnp.arange(T)))
    return outs, h_last[None]


if __name__ == "__main__":
    T, B, H = 24, 3, 32  # seq_len, batch, hidden_size (small test shapes)
    key = jax.random.PRNGKey(0)
    k1, k2, k3, k4, k5 = jax.random.split(key, 5)

    # Deterministic synthetic GRU parameters (PyTorch shapes: (3H, H) / (3H,)).
    scale = 1.0 / jnp.sqrt(H)
    w_ih = jax.random.uniform(k1, (3 * H, H), jnp.float32, -scale, scale)
    w_hh = jax.random.uniform(k2, (3 * H, H), jnp.float32, -scale, scale)
    b_ih = jax.random.uniform(k3, (3 * H,), jnp.float32, -scale, scale)
    b_hh = jax.random.uniform(k4, (3 * H,), jnp.float32, -scale, scale)

    input_seq = jax.random.normal(k5, (T, B, H), jnp.float32)
    # pack_padded_sequence requires lengths sorted descending.
    input_lengths = jnp.array([24, 17, 9], dtype=jnp.int32)

    # T=24 with time_block=16 -> two time blocks: exercises the hidden-state
    # carry across grid steps as well as the final-hidden write guard.
    outputs, hidden = context_encoder_forward(
        input_seq, input_lengths, w_ih, w_hh, b_ih, b_hh)
    jax.block_until_ready((outputs, hidden))

    ref_out, ref_hid = _reference_gru(
        input_seq, input_lengths, w_ih, w_hh, b_ih, b_hh)

    assert outputs.shape == (T, B, H) and hidden.shape == (1, B, H)
    # bf16 MXU operands (f32 accumulate) -> loosened tolerance vs f32 reference.
    assert jnp.allclose(outputs, ref_out, atol=2e-2, rtol=2e-2)
    assert jnp.allclose(hidden, ref_hid, atol=2e-2, rtol=2e-2)

    print("KERNEL_OK")
</pallas_src>

<mosaic_0001>
module attributes {stable_mosaic.version = 11 : i64} {
  func.func @_gru_fused_kernel(%arg0: i32, %arg1: i32, %arg2: memref<16x8x128xbf16, #tpu.memory_space<vmem>>, %arg3: memref<8x1xi32, #tpu.memory_space<vmem>>, %arg4: memref<128x384xbf16, #tpu.memory_space<vmem>>, %arg5: memref<128x384xbf16, #tpu.memory_space<vmem>>, %arg6: memref<1x384xf32, #tpu.memory_space<vmem>>, %arg7: memref<1x128xf32, #tpu.memory_space<vmem>>, %arg8: memref<16x8x128xf32, #tpu.memory_space<vmem>>, %arg9: memref<1x8x128xf32, #tpu.memory_space<vmem>>, %arg10: memref<8x128xf32, #tpu.memory_space<vmem>>) attributes {dimension_semantics = [#tpu.dimension_semantics<parallel>, #tpu.dimension_semantics<arbitrary>], iteration_bounds = array<i64: 1, 2>, scalar_prefetch = 0 : i64, scratch_operands = 1 : i64, tpu.core_type = #tpu.core_type<tc>, window_params = [{transform_indices = @transform_0, window_bounds = array<i64: 16, 8, 128>}, {transform_indices = @transform_1, window_bounds = array<i64: 8, 1>}, {pipeline_mode = #tpu.pipeline_mode<synchronous>, transform_indices = @transform_2, window_bounds = array<i64: 128, 384>}, {pipeline_mode = #tpu.pipeline_mode<synchronous>, transform_indices = @transform_3, window_bounds = array<i64: 128, 384>}, {pipeline_mode = #tpu.pipeline_mode<synchronous>, transform_indices = @transform_4, window_bounds = array<i64: 1, 384>}, {pipeline_mode = #tpu.pipeline_mode<synchronous>, transform_indices = @transform_5, window_bounds = array<i64: 1, 128>}, {transform_indices = @transform_6, window_bounds = array<i64: 16, 8, 128>}, {transform_indices = @transform_7, window_bounds = array<i64: 1, 8, 128>}]} {
    %c0_i32 = arith.constant 0 : i32
    %0 = arith.cmpi eq, %arg1, %c0_i32 : i32
    %1 = arith.extui %0 : i1 to i32
    %c0_i32_0 = arith.constant 0 : i32
    %2 = arith.cmpi ne, %1, %c0_i32_0 : i32
    scf.if %2 {
      %cst_101 = arith.constant 0.000000e+00 : f32
      %710 = vector.broadcast %cst_101 : f32 to vector<8x128xf32>
      %c0_102 = arith.constant 0 : index
      %c0_103 = arith.constant 0 : index
      %711 = vector.load %arg10[%c0_102, %c0_103] : memref<8x128xf32, #tpu.memory_space<vmem>>, vector<8x128xf32>
      tpu.vector_store %arg10[%c0_102, %c0_103], %710 {strides = array<i32>} : memref<8x128xf32, #tpu.memory_space<vmem>>, vector<8x128xf32>,
    } else {
    }
    %c0 = arith.constant 0 : index
    %c0_1 = arith.constant 0 : index
    %c0_2 = arith.constant 0 : index
    %3 = vector.load %arg2[%c0, %c0_1, %c0_2] : memref<16x8x128xbf16, #tpu.memory_space<vmem>>, vector<16x8x128xbf16>
    %4 = vector.shape_cast %3 : vector<16x8x128xbf16> to vector<128x128xbf16>
    %c0_3 = arith.constant 0 : index
    %c0_4 = arith.constant 0 : index
    %5 = vector.load %arg4[%c0_3, %c0_4] : memref<128x384xbf16, #tpu.memory_space<vmem>>, vector<128x384xbf16>
    %cst = arith.constant dense<0.000000e+00> : vector<128x384xf32>
    %6 = tpu.matmul %4, %5, %cst {dimension_numbers = #tpu.dot_dimension_numbers<[1], [0], [0], [1], [0, 0, 1, 1], [], []>} : vector<128x128xbf16>, vector<128x384xbf16>, vector<128x384xf32> -> vector<128x384xf32>
    %c0_5 = arith.constant 0 : index
    %c0_6 = arith.constant 0 : index
    %7 = vector.load %arg6[%c0_5, %c0_6] : memref<1x384xf32, #tpu.memory_space<vmem>>, vector<1x384xf32>
    %8 = vector.broadcast %7 : vector<1x384xf32> to vector<128x384xf32>
    %9 = arith.addf %6, %8 : vector<128x384xf32>
    %10 = vector.shape_cast %9 : vector<128x384xf32> to vector<16x8x384xf32>
    %c0_7 = arith.constant 0 : index
    %c0_8 = arith.constant 0 : index
    %11 = vector.load %arg5[%c0_7, %c0_8] : memref<128x384xbf16, #tpu.memory_space<vmem>>, vector<128x384xbf16>
    %c0_9 = arith.constant 0 : index
    %c0_10 = arith.constant 0 : index
    %12 = vector.load %arg7[%c0_9, %c0_10] : memref<1x128xf32, #tpu.memory_space<vmem>>, vector<1x128xf32>
    %13 = vector.shape_cast %12 : vector<1x128xf32> to vector<1x128xf32>
    %14 = vector.broadcast %13 : vector<1x128xf32> to vector<8x128xf32>
    %c0_11 = arith.constant 0 : index
    %c0_12 = arith.constant 0 : index
    %15 = vector.load %arg3[%c0_11, %c0_12] : memref<8x1xi32, #tpu.memory_space<vmem>>, vector<8x1xi32>
    %c16_i32 = arith.constant 16 : i32
    %16 = arith.muli %arg1, %c16_i32 : i32
    %c0_13 = arith.constant 0 : index
    %c0_14 = arith.constant 0 : index
    %17 = vector.load %arg10[%c0_13, %c0_14] : memref<8x128xf32, #tpu.memory_space<vmem>>, vector<8x128xf32>
    %18 = vector.extract_strided_slice %10 {offsets = [0, 0, 0], sizes = [1, 8, 384], strides = [1, 1, 1]} : vector<16x8x384xf32> to vector<1x8x384xf32>
    %19 = vector.shape_cast %18 : vector<1x8x384xf32> to vector<8x384xf32>
    %c0_i32_15 = arith.constant 0 : i32
    %20 = arith.addi %16, %c0_i32_15 : i32
    %21 = vector.broadcast %20 : i32 to vector<8x1xi32>
    %22 = arith.cmpi slt, %21, %15 : vector<8x1xi32>
    %23 = arith.extui %22 : vector<8x1xi1> to vector<8x1xi32>
    %24 = arith.sitofp %23 : vector<8x1xi32> to vector<8x1xf32>
    %25 = arith.truncf %17 : vector<8x128xf32> to vector<8x128xbf16>
    %cst_16 = arith.constant dense<0.000000e+00> : vector<8x384xf32>
    %26 = tpu.matmul %25, %11, %cst_16 {dimension_numbers = #tpu.dot_dimension_numbers<[1], [0], [0], [1], [0, 0, 1, 1], [], []>} : vector<8x128xbf16>, vector<128x384xbf16>, vector<8x384xf32> -> vector<8x384xf32>
    %27 = vector.extract_strided_slice %19 {offsets = [0, 0], sizes = [8, 128], strides = [1, 1]} : vector<8x384xf32> to vector<8x128xf32>
    %28 = vector.extract_strided_slice %26 {offsets = [0, 0], sizes = [8, 128], strides = [1, 1]} : vector<8x384xf32> to vector<8x128xf32>
    %29 = arith.addf %27, %28 : vector<8x128xf32>
    %30 = arith.negf %29 : vector<8x128xf32>
    %31 = math.exp %30 : vector<8x128xf32>
    %cst_17 = arith.constant 1.000000e+00 : f32
    %32 = vector.broadcast %cst_17 : f32 to vector<8x128xf32>
    %33 = arith.addf %32, %31 : vector<8x128xf32>
    %34 = arith.divf %32, %33 : vector<8x128xf32>
    %35 = vector.extract_strided_slice %19 {offsets = [0, 128], sizes = [8, 128], strides = [1, 1]} : vector<8x384xf32> to vector<8x128xf32>
    %36 = vector.extract_strided_slice %26 {offsets = [0, 128], sizes = [8, 128], strides = [1, 1]} : vector<8x384xf32> to vector<8x128xf32>
    %37 = arith.addf %35, %36 : vector<8x128xf32>
    %38 = arith.negf %37 : vector<8x128xf32>
    %39 = math.exp %38 : vector<8x128xf32>
    %cst_18 = arith.constant 1.000000e+00 : f32
    %40 = vector.broadcast %cst_18 : f32 to vector<8x128xf32>
    %41 = arith.addf %40, %39 : vector<8x128xf32>
    %42 = arith.divf %40, %41 : vector<8x128xf32>
    %43 = vector.extract_strided_slice %19 {offsets = [0, 256], sizes = [8, 128], strides = [1, 1]} : vector<8x384xf32> to vector<8x128xf32>
    %44 = vector.extract_strided_slice %26 {offsets = [0, 256], sizes = [8, 128], strides = [1, 1]} : vector<8x384xf32> to vector<8x128xf32>
    %45 = arith.addf %44, %14 : vector<8x128xf32>
    %46 = arith.mulf %34, %45 : vector<8x128xf32>
    %47 = arith.addf %43, %46 : vector<8x128xf32>
    %48 = math.tanh %47 : vector<8x128xf32>
    %49 = arith.subf %17, %48 : vector<8x128xf32>
    %50 = arith.mulf %42, %49 : vector<8x128xf32>
    %51 = arith.addf %48, %50 : vector<8x128xf32>
    %52 = vector.broadcast %24 : vector<8x1xf32> to vector<8x128xf32>
    %53 = arith.mulf %52, %51 : vector<8x128xf32>
    %c0_19 = arith.constant 0 : index
    %c0_20 = arith.constant 0 : index
    %c0_21 = arith.constant 0 : index
    %54 = vector.load %arg8[%c0_19, %c0_20, %c0_21] : memref<16x8x128xf32, #tpu.memory_space<vmem>>, vector<1x8x128xf32>
    %55 = vector.shape_cast %54 : vector<1x8x128xf32> to vector<8x128xf32>
    %56 = vector.shape_cast %53 : vector<8x128xf32> to vector<1x8x128xf32>
    tpu.vector_store %arg8[%c0_19, %c0_20, %c0_21], %56 {strides = array<i32>} : memref<16x8x128xf32, #tpu.memory_space<vmem>>, vector<1x8x128xf32>,
    %57 = arith.subf %51, %17 : vector<8x128xf32>
    %58 = vector.broadcast %24 : vector<8x1xf32> to vector<8x128xf32>
    %59 = arith.mulf %58, %57 : vector<8x128xf32>
    %60 = arith.addf %17, %59 : vector<8x128xf32>
    %61 = vector.extract_strided_slice %10 {offsets = [1, 0, 0], sizes = [1, 8, 384], strides = [1, 1, 1]} : vector<16x8x384xf32> to vector<1x8x384xf32>
    %62 = vector.shape_cast %61 : vector<1x8x384xf32> to vector<8x384xf32>
    %c1_i32 = arith.constant 1 : i32
    %63 = arith.addi %16, %c1_i32 : i32
    %64 = vector.broadcast %63 : i32 to vector<8x1xi32>
    %65 = arith.cmpi slt, %64, %15 : vector<8x1xi32>
    %66 = arith.extui %65 : vector<8x1xi1> to vector<8x1xi32>
    %67 = arith.sitofp %66 : vector<8x1xi32> to vector<8x1xf32>
    %68 = arith.truncf %60 : vector<8x128xf32> to vector<8x128xbf16>
    %cst_22 = arith.constant dense<0.000000e+00> : vector<8x384xf32>
    %69 = tpu.matmul %68, %11, %cst_22 {dimension_numbers = #tpu.dot_dimension_numbers<[1], [0], [0], [1], [0, 0, 1, 1], [], []>} : vector<8x128xbf16>, vector<128x384xbf16>, vector<8x384xf32> -> vector<8x384xf32>
    %70 = vector.extract_strided_slice %62 {offsets = [0, 0], sizes = [8, 128], strides = [1, 1]} : vector<8x384xf32> to vector<8x128xf32>
    %71 = vector.extract_strided_slice %69 {offsets = [0, 0], sizes = [8, 128], strides = [1, 1]} : vector<8x384xf32> to vector<8x128xf32>
    %72 = arith.addf %70, %71 : vector<8x128xf32>
    %73 = arith.negf %72 : vector<8x128xf32>
    %74 = math.exp %73 : vector<8x128xf32>
    %cst_23 = arith.constant 1.000000e+00 : f32
    %75 = vector.broadcast %cst_23 : f32 to vector<8x128xf32>
    %76 = arith.addf %75, %74 : vector<8x128xf32>
    %77 = arith.divf %75, %76 : vector<8x128xf32>
    %78 = vector.extract_strided_slice %62 {offsets = [0, 128], sizes = [8, 128], strides = [1, 1]} : vector<8x384xf32> to vector<8x128xf32>
    %79 = vector.extract_strided_slice %69 {offsets = [0, 128], sizes = [8, 128], strides = [1, 1]} : vector<8x384xf32> to vector<8x128xf32>
    %80 = arith.addf %78, %79 : vector<8x128xf32>
    %81 = arith.negf %80 : vector<8x128xf32>
    %82 = math.exp %81 : vector<8x128xf32>
    %cst_24 = arith.constant 1.000000e+00 : f32
    %83 = vector.broadcast %cst_24 : f32 to vector<8x128xf32>
    %84 = arith.addf %83, %82 : vector<8x128xf32>
    %85 = arith.divf %83, %84 : vector<8x128xf32>
    %86 = vector.extract_strided_slice %62 {offsets = [0, 256], sizes = [8, 128], strides = [1, 1]} : vector<8x384xf32> to vector<8x128xf32>
    %87 = vector.extract_strided_slice %69 {offsets = [0, 256], sizes = [8, 128], strides = [1, 1]} : vector<8x384xf32> to vector<8x128xf32>
    %88 = arith.addf %87, %14 : vector<8x128xf32>
    %89 = arith.mulf %77, %88 : vector<8x128xf32>
    %90 = arith.addf %86, %89 : vector<8x128xf32>
    %91 = math.tanh %90 : vector<8x128xf32>
    %92 = arith.subf %60, %91 : vector<8x128xf32>
    %93 = arith.mulf %85, %92 : vector<8x128xf32>
    %94 = arith.addf %91, %93 : vector<8x128xf32>
    %95 = vector.broadcast %67 : vector<8x1xf32> to vector<8x128xf32>
    %96 = arith.mulf %95, %94 : vector<8x128xf32>
    %c1 = arith.constant 1 : index
    %c0_25 = arith.constant 0 : index
    %c0_26 = arith.constant 0 : index
    %97 = vector.load %arg8[%c1, %c0_25, %c0_26] : memref<16x8x128xf32, #tpu.memory_space<vmem>>, vector<1x8x128xf32>
    %98 = vector.shape_cast %97 : vector<1x8x128xf32> to vector<8x128xf32>
    %99 = vector.shape_cast %96 : vector<8x128xf32> to vector<1x8x128xf32>
    tpu.vector_store %arg8[%c1, %c0_25, %c0_26], %99 {strides = array<i32>} : memref<16x8x128xf32, #tpu.memory_space<vmem>>, vector<1x8x128xf32>,
    %100 = arith.subf %94, %60 : vector<8x128xf32>
    %101 = vector.broadcast %67 : vector<8x1xf32> to vector<8x128xf32>
    %102 = arith.mulf %101, %100 : vector<8x128xf32>
    %103 = arith.addf %60, %102 : vector<8x128xf32>
    %104 = vector.extract_strided_slice %10 {offsets = [2, 0, 0], sizes = [1, 8, 384], strides = [1, 1, 1]} : vector<16x8x384xf32> to vector<1x8x384xf32>
    %105 = vector.shape_cast %104 : vector<1x8x384xf32> to vector<8x384xf32>
    %c2_i32 = arith.constant 2 : i32
    %106 = arith.addi %16, %c2_i32 : i32
    %107 = vector.broadcast %106 : i32 to vector<8x1xi32>
    %108 = arith.cmpi slt, %107, %15 : vector<8x1xi32>
    %109 = arith.extui %108 : vector<8x1xi1> to vector<8x1xi32>
    %110 = arith.sitofp %109 : vector<8x1xi32> to vector<8x1xf32>
    %111 = arith.truncf %103 : vector<8x128xf32> to vector<8x128xbf16>
    %cst_27 = arith.constant dense<0.000000e+00> : vector<8x384xf32>
    %112 = tpu.matmul %111, %11, %cst_27 {dimension_numbers = #tpu.dot_dimension_numbers<[1], [0], [0], [1], [0, 0, 1, 1], [], []>} : vector<8x128xbf16>, vector<128x384xbf16>, vector<8x384xf32> -> vector<8x384xf32>
    %113 = vector.extract_strided_slice %105 {offsets = [0, 0], sizes = [8, 128], strides = [1, 1]} : vector<8x384xf32> to vector<8x128xf32>
    %114 = vector.extract_strided_slice %112 {offsets = [0, 0], sizes = [8, 128], strides = [1, 1]} : vector<8x384xf32> to vector<8x128xf32>
    %115 = arith.addf %113, %114 : vector<8x128xf32>
    %116 = arith.negf %115 : vector<8x128xf32>
    %117 = math.exp %116 : vector<8x128xf32>
    %cst_28 = arith.constant 1.000000e+00 : f32
    %118 = vector.broadcast %cst_28 : f32 to vector<8x128xf32>
    %119 = arith.addf %118, %117 : vector<8x128xf32>
    %120 = arith.divf %118, %119 : vector<8x128xf32>
    %121 = vector.extract_strided_slice %105 {offsets = [0, 128], sizes = [8, 128], strides = [1, 1]} : vector<8x384xf32> to vector<8x128xf32>
    %122 = vector.extract_strided_slice %112 {offsets = [0, 128], sizes = [8, 128], strides = [1, 1]} : vector<8x384xf32> to vector<8x128xf32>
    %123 = arith.addf %121, %122 : vector<8x128xf32>
    %124 = arith.negf %123 : vector<8x128xf32>
    %125 = math.exp %124 : vector<8x128xf32>
    %cst_29 = arith.constant 1.000000e+00 : f32
    %126 = vector.broadcast %cst_29 : f32 to vector<8x128xf32>
    %127 = arith.addf %126, %125 : vector<8x128xf32>
    %128 = arith.divf %126, %127 : vector<8x128xf32>
    %129 = vector.extract_strided_slice %105 {offsets = [0, 256], sizes = [8, 128], strides = [1, 1]} : vector<8x384xf32> to vector<8x128xf32>
    %130 = vector.extract_strided_slice %112 {offsets = [0, 256], sizes = [8, 128], strides = [1, 1]} : vector<8x384xf32> to vector<8x128xf32>
    %131 = arith.addf %130, %14 : vector<8x128xf32>
    %132 = arith.mulf %120, %131 : vector<8x128xf32>
    %133 = arith.addf %129, %132 : vector<8x128xf32>
    %134 = math.tanh %133 : vector<8x128xf32>
    %135 = arith.subf %103, %134 : vector<8x128xf32>
    %136 = arith.mulf %128, %135 : vector<8x128xf32>
    %137 = arith.addf %134, %136 : vector<8x128xf32>
    %138 = vector.broadcast %110 : vector<8x1xf32> to vector<8x128xf32>
    %139 = arith.mulf %138, %137 : vector<8x128xf32>
    %c2 = arith.constant 2 : index
    %c0_30 = arith.constant 0 : index
    %c0_31 = arith.constant 0 : index
    %140 = vector.load %arg8[%c2, %c0_30, %c0_31] : memref<16x8x128xf32, #tpu.memory_space<vmem>>, vector<1x8x128xf32>
    %141 = vector.shape_cast %140 : vector<1x8x128xf32> to vector<8x128xf32>
    %142 = vector.shape_cast %139 : vector<8x128xf32> to vector<1x8x128xf32>
    tpu.vector_store %arg8[%c2, %c0_30, %c0_31], %142 {strides = array<i32>} : memref<16x8x128xf32, #tpu.memory_space<vmem>>, vector<1x8x128xf32>,
    %143 = arith.subf %137, %103 : vector<8x128xf32>
    %144 = vector.broadcast %110 : vector<8x1xf32> to vector<8x128xf32>
    %145 = arith.mulf %144, %143 : vector<8x128xf32>
    %146 = arith.addf %103, %145 : vector<8x128xf32>
    %147 = vector.extract_strided_slice %10 {offsets = [3, 0, 0], sizes = [1, 8, 384], strides = [1, 1, 1]} : vector<16x8x384xf32> to vector<1x8x384xf32>
    %148 = vector.shape_cast %147 : vector<1x8x384xf32> to vector<8x384xf32>
    %c3_i32 = arith.constant 3 : i32
    %149 = arith.addi %16, %c3_i32 : i32
    %150 = vector.broadcast %149 : i32 to vector<8x1xi32>
    %151 = arith.cmpi slt, %150, %15 : vector<8x1xi32>
    %152 = arith.extui %151 : vector<8x1xi1> to vector<8x1xi32>
    %153 = arith.sitofp %152 : vector<8x1xi32> to vector<8x1xf32>
    %154 = arith.truncf %146 : vector<8x128xf32> to vector<8x128xbf16>
    %cst_32 = arith.constant dense<0.000000e+00> : vector<8x384xf32>
    %155 = tpu.matmul %154, %11, %cst_32 {dimension_numbers = #tpu.dot_dimension_numbers<[1], [0], [0], [1], [0, 0, 1, 1], [], []>} : vector<8x128xbf16>, vector<128x384xbf16>, vector<8x384xf32> -> vector<8x384xf32>
    %156 = vector.extract_strided_slice %148 {offsets = [0, 0], sizes = [8, 128], strides = [1, 1]} : vector<8x384xf32> to vector<8x128xf32>
    %157 = vector.extract_strided_slice %155 {offsets = [0, 0], sizes = [8, 128], strides = [1, 1]} : vector<8x384xf32> to vector<8x128xf32>
    %158 = arith.addf %156, %157 : vector<8x128xf32>
    %159 = arith.negf %158 : vector<8x128xf32>
    %160 = math.exp %159 : vector<8x128xf32>
    %cst_33 = arith.constant 1.000000e+00 : f32
    %161 = vector.broadcast %cst_33 : f32 to vector<8x128xf32>
    %162 = arith.addf %161, %160 : vector<8x128xf32>
    %163 = arith.divf %161, %162 : vector<8x128xf32>
    %164 = vector.extract_strided_slice %148 {offsets = [0, 128], sizes = [8, 128], strides = [1, 1]} : vector<8x384xf32> to vector<8x128xf32>
    %165 = vector.extract_strided_slice %155 {offsets = [0, 128], sizes = [8, 128], strides = [1, 1]} : vector<8x384xf32> to vector<8x128xf32>
    %166 = arith.addf %164, %165 : vector<8x128xf32>
    %167 = arith.negf %166 : vector<8x128xf32>
    %168 = math.exp %167 : vector<8x128xf32>
    %cst_34 = arith.constant 1.000000e+00 : f32
    %169 = vector.broadcast %cst_34 : f32 to vector<8x128xf32>
    %170 = arith.addf %169, %168 : vector<8x128xf32>
    %171 = arith.divf %169, %170 : vector<8x128xf32>
    %172 = vector.extract_strided_slice %148 {offsets = [0, 256], sizes = [8, 128], strides = [1, 1]} : vector<8x384xf32> to vector<8x128xf32>
    %173 = vector.extract_strided_slice %155 {offsets = [0, 256], sizes = [8, 128], strides = [1, 1]} : vector<8x384xf32> to vector<8x128xf32>
    %174 = arith.addf %173, %14 : vector<8x128xf32>
    %175 = arith.mulf %163, %174 : vector<8x128xf32>
    %176 = arith.addf %172, %175 : vector<8x128xf32>
    %177 = math.tanh %176 : vector<8x128xf32>
    %178 = arith.subf %146, %177 : vector<8x128xf32>
    %179 = arith.mulf %171, %178 : vector<8x128xf32>
    %180 = arith.addf %177, %179 : vector<8x128xf32>
    %181 = vector.broadcast %153 : vector<8x1xf32> to vector<8x128xf32>
    %182 = arith.mulf %181, %180 : vector<8x128xf32>
    %c3 = arith.constant 3 : index
    %c0_35 = arith.constant 0 : index
    %c0_36 = arith.constant 0 : index
    %183 = vector.load %arg8[%c3, %c0_35, %c0_36] : memref<16x8x128xf32, #tpu.memory_space<vmem>>, vector<1x8x128xf32>
    %184 = vector.shape_cast %183 : vector<1x8x128xf32> to vector<8x128xf32>
    %185 = vector.shape_cast %182 : vector<8x128xf32> to vector<1x8x128xf32>
    tpu.vector_store %arg8[%c3, %c0_35, %c0_36], %185 {strides = array<i32>} : memref<16x8x128xf32, #tpu.memory_space<vmem>>, vector<1x8x128xf32>,
    %186 = arith.subf %180, %146 : vector<8x128xf32>
    %187 = vector.broadcast %153 : vector<8x1xf32> to vector<8x128xf32>
    %188 = arith.mulf %187, %186 : vector<8x128xf32>
    %189 = arith.addf %146, %188 : vector<8x128xf32>
    %190 = vector.extract_strided_slice %10 {offsets = [4, 0, 0], sizes = [1, 8, 384], strides = [1, 1, 1]} : vector<16x8x384xf32> to vector<1x8x384xf32>
    %191 = vector.shape_cast %190 : vector<1x8x384xf32> to vector<8x384xf32>
    %c4_i32 = arith.constant 4 : i32
    %192 = arith.addi %16, %c4_i32 : i32
    %193 = vector.broadcast %192 : i32 to vector<8x1xi32>
    %194 = arith.cmpi slt, %193, %15 : vector<8x1xi32>
    %195 = arith.extui %194 : vector<8x1xi1> to vector<8x1xi32>
    %196 = arith.sitofp %195 : vector<8x1xi32> to vector<8x1xf32>
    %197 = arith.truncf %189 : vector<8x128xf32> to vector<8x128xbf16>
    %cst_37 = arith.constant dense<0.000000e+00> : vector<8x384xf32>
    %198 = tpu.matmul %197, %11, %cst_37 {dimension_numbers = #tpu.dot_dimension_numbers<[1], [0], [0], [1], [0, 0, 1, 1], [], []>} : vector<8x128xbf16>, vector<128x384xbf16>, vector<8x384xf32> -> vector<8x384xf32>
    %199 = vector.extract_strided_slice %191 {offsets = [0, 0], sizes = [8, 128], strides = [1, 1]} : vector<8x384xf32> to vector<8x128xf32>
    %200 = vector.extract_strided_slice %198 {offsets = [0, 0], sizes = [8, 128], strides = [1, 1]} : vector<8x384xf32> to vector<8x128xf32>
    %201 = arith.addf %199, %200 : vector<8x128xf32>
    %202 = arith.negf %201 : vector<8x128xf32>
    %203 = math.exp %202 : vector<8x128xf32>
    %cst_38 = arith.constant 1.000000e+00 : f32
    %204 = vector.broadcast %cst_38 : f32 to vector<8x128xf32>
    %205 = arith.addf %204, %203 : vector<8x128xf32>
    %206 = arith.divf %204, %205 : vector<8x128xf32>
    %207 = vector.extract_strided_slice %191 {offsets = [0, 128], sizes = [8, 128], strides = [1, 1]} : vector<8x384xf32> to vector<8x128xf32>
    %208 = vector.extract_strided_slice %198 {offsets = [0, 128], sizes = [8, 128], strides = [1, 1]} : vector<8x384xf32> to vector<8x128xf32>
    %209 = arith.addf %207, %208 : vector<8x128xf32>
    %210 = arith.negf %209 : vector<8x128xf32>
    %211 = math.exp %210 : vector<8x128xf32>
    %cst_39 = arith.constant 1.000000e+00 : f32
    %212 = vector.broadcast %cst_39 : f32 to vector<8x128xf32>
    %213 = arith.addf %212, %211 : vector<8x128xf32>
    %214 = arith.divf %212, %213 : vector<8x128xf32>
    %215 = vector.extract_strided_slice %191 {offsets = [0, 256], sizes = [8, 128], strides = [1, 1]} : vector<8x384xf32> to vector<8x128xf32>
    %216 = vector.extract_strided_slice %198 {offsets = [0, 256], sizes = [8, 128], strides = [1, 1]} : vector<8x384xf32> to vector<8x128xf32>
    %217 = arith.addf %216, %14 : vector<8x128xf32>
    %218 = arith.mulf %206, %217 : vector<8x128xf32>
    %219 = arith.addf %215, %218 : vector<8x128xf32>
    %220 = math.tanh %219 : vector<8x128xf32>
    %221 = arith.subf %189, %220 : vector<8x128xf32>
    %222 = arith.mulf %214, %221 : vector<8x128xf32>
    %223 = arith.addf %220, %222 : vector<8x128xf32>
    %224 = vector.broadcast %196 : vector<8x1xf32> to vector<8x128xf32>
    %225 = arith.mulf %224, %223 : vector<8x128xf32>
    %c4 = arith.constant 4 : index
    %c0_40 = arith.constant 0 : index
    %c0_41 = arith.constant 0 : index
    %226 = vector.load %arg8[%c4, %c0_40, %c0_41] : memref<16x8x128xf32, #tpu.memory_space<vmem>>, vector<1x8x128xf32>
    %227 = vector.shape_cast %226 : vector<1x8x128xf32> to vector<8x128xf32>
    %228 = vector.shape_cast %225 : vector<8x128xf32> to vector<1x8x128xf32>
    tpu.vector_store %arg8[%c4, %c0_40, %c0_41], %228 {strides = array<i32>} : memref<16x8x128xf32, #tpu.memory_space<vmem>>, vector<1x8x128xf32>,
    %229 = arith.subf %223, %189 : vector<8x128xf32>
    %230 = vector.broadcast %196 : vector<8x1xf32> to vector<8x128xf32>
    %231 = arith.mulf %230, %229 : vector<8x128xf32>
    %232 = arith.addf %189, %231 : vector<8x128xf32>
    %233 = vector.extract_strided_slice %10 {offsets = [5, 0, 0], sizes = [1, 8, 384], strides = [1, 1, 1]} : vector<16x8x384xf32> to vector<1x8x384xf32>
    %234 = vector.shape_cast %233 : vector<1x8x384xf32> to vector<8x384xf32>
    %c5_i32 = arith.constant 5 : i32
    %235 = arith.addi %16, %c5_i32 : i32
    %236 = vector.broadcast %235 : i32 to vector<8x1xi32>
    %237 = arith.cmpi slt, %236, %15 : vector<8x1xi32>
    %238 = arith.extui %237 : vector<8x1xi1> to vector<8x1xi32>
    %239 = arith.sitofp %238 : vector<8x1xi32> to vector<8x1xf32>
    %240 = arith.truncf %232 : vector<8x128xf32> to vector<8x128xbf16>
    %cst_42 = arith.constant dense<0.000000e+00> : vector<8x384xf32>
    %241 = tpu.matmul %240, %11, %cst_42 {dimension_numbers = #tpu.dot_dimension_numbers<[1], [0], [0], [1], [0, 0, 1, 1], [], []>} : vector<8x128xbf16>, vector<128x384xbf16>, vector<8x384xf32> -> vector<8x384xf32>
    %242 = vector.extract_strided_slice %234 {offsets = [0, 0], sizes = [8, 128], strides = [1, 1]} : vector<8x384xf32> to vector<8x128xf32>
    %243 = vector.extract_strided_slice %241 {offsets = [0, 0], sizes = [8, 128], strides = [1, 1]} : vector<8x384xf32> to vector<8x128xf32>
    %244 = arith.addf %242, %243 : vector<8x128xf32>
    %245 = arith.negf %244 : vector<8x128xf32>
    %246 = math.exp %245 : vector<8x128xf32>
    %cst_43 = arith.constant 1.000000e+00 : f32
    %247 = vector.broadcast %cst_43 : f32 to vector<8x128xf32>
    %248 = arith.addf %247, %246 : vector<8x128xf32>
    %249 = arith.divf %247, %248 : vector<8x128xf32>
    %250 = vector.extract_strided_slice %234 {offsets = [0, 128], sizes = [8, 128], strides = [1, 1]} : vector<8x384xf32> to vector<8x128xf32>
    %251 = vector.extract_strided_slice %241 {offsets = [0, 128], sizes = [8, 128], strides = [1, 1]} : vector<8x384xf32> to vector<8x128xf32>
    %252 = arith.addf %250, %251 : vector<8x128xf32>
    %253 = arith.negf %252 : vector<8x128xf32>
    %254 = math.exp %253 : vector<8x128xf32>
    %cst_44 = arith.constant 1.000000e+00 : f32
    %255 = vector.broadcast %cst_44 : f32 to vector<8x128xf32>
    %256 = arith.addf %255, %254 : vector<8x128xf32>
    %257 = arith.divf %255, %256 : vector<8x128xf32>
    %258 = vector.extract_strided_slice %234 {offsets = [0, 256], sizes = [8, 128], strides = [1, 1]} : vector<8x384xf32> to vector<8x128xf32>
    %259 = vector.extract_strided_slice %241 {offsets = [0, 256], sizes = [8, 128], strides = [1, 1]} : vector<8x384xf32> to vector<8x128xf32>
    %260 = arith.addf %259, %14 : vector<8x128xf32>
    %261 = arith.mulf %249, %260 : vector<8x128xf32>
    %262 = arith.addf %258, %261 : vector<8x128xf32>
    %263 = math.tanh %262 : vector<8x128xf32>
    %264 = arith.subf %232, %263 : vector<8x128xf32>
    %265 = arith.mulf %257, %264 : vector<8x128xf32>
    %266 = arith.addf %263, %265 : vector<8x128xf32>
    %267 = vector.broadcast %239 : vector<8x1xf32> to vector<8x128xf32>
    %268 = arith.mulf %267, %266 : vector<8x128xf32>
    %c5 = arith.constant 5 : index
    %c0_45 = arith.constant 0 : index
    %c0_46 = arith.constant 0 : index
    %269 = vector.load %arg8[%c5, %c0_45, %c0_46] : memref<16x8x128xf32, #tpu.memory_space<vmem>>, vector<1x8x128xf32>
    %270 = vector.shape_cast %269 : vector<1x8x128xf32> to vector<8x128xf32>
    %271 = vector.shape_cast %268 : vector<8x128xf32> to vector<1x8x128xf32>
    tpu.vector_store %arg8[%c5, %c0_45, %c0_46], %271 {strides = array<i32>} : memref<16x8x128xf32, #tpu.memory_space<vmem>>, vector<1x8x128xf32>,
    %272 = arith.subf %266, %232 : vector<8x128xf32>
    %273 = vector.broadcast %239 : vector<8x1xf32> to vector<8x128xf32>
    %274 = arith.mulf %273, %272 : vector<8x128xf32>
    %275 = arith.addf %232, %274 : vector<8x128xf32>
    %276 = vector.extract_strided_slice %10 {offsets = [6, 0, 0], sizes = [1, 8, 384], strides = [1, 1, 1]} : vector<16x8x384xf32> to vector<1x8x384xf32>
    %277 = vector.shape_cast %276 : vector<1x8x384xf32> to vector<8x384xf32>
    %c6_i32 = arith.constant 6 : i32
    %278 = arith.addi %16, %c6_i32 : i32
    %279 = vector.broadcast %278 : i32 to vector<8x1xi32>
    %280 = arith.cmpi slt, %279, %15 : vector<8x1xi32>
    %281 = arith.extui %280 : vector<8x1xi1> to vector<8x1xi32>
    %282 = arith.sitofp %281 : vector<8x1xi32> to vector<8x1xf32>
    %283 = arith.truncf %275 : vector<8x128xf32> to vector<8x128xbf16>
    %cst_47 = arith.constant dense<0.000000e+00> : vector<8x384xf32>
    %284 = tpu.matmul %283, %11, %cst_47 {dimension_numbers = #tpu.dot_dimension_numbers<[1], [0], [0], [1], [0, 0, 1, 1], [], []>} : vector<8x128xbf16>, vector<128x384xbf16>, vector<8x384xf32> -> vector<8x384xf32>
    %285 = vector.extract_strided_slice %277 {offsets = [0, 0], sizes = [8, 128], strides = [1, 1]} : vector<8x384xf32> to vector<8x128xf32>
    %286 = vector.extract_strided_slice %284 {offsets = [0, 0], sizes = [8, 128], strides = [1, 1]} : vector<8x384xf32> to vector<8x128xf32>
    %287 = arith.addf %285, %286 : vector<8x128xf32>
    %288 = arith.negf %287 : vector<8x128xf32>
    %289 = math.exp %288 : vector<8x128xf32>
    %cst_48 = arith.constant 1.000000e+00 : f32
    %290 = vector.broadcast %cst_48 : f32 to vector<8x128xf32>
    %291 = arith.addf %290, %289 : vector<8x128xf32>
    %292 = arith.divf %290, %291 : vector<8x128xf32>
    %293 = vector.extract_strided_slice %277 {offsets = [0, 128], sizes = [8, 128], strides = [1, 1]} : vector<8x384xf32> to vector<8x128xf32>
    %294 = vector.extract_strided_slice %284 {offsets = [0, 128], sizes = [8, 128], strides = [1, 1]} : vector<8x384xf32> to vector<8x128xf32>
    %295 = arith.addf %293, %294 : vector<8x128xf32>
    %296 = arith.negf %295 : vector<8x128xf32>
    %297 = math.exp %296 : vector<8x128xf32>
    %cst_49 = arith.constant 1.000000e+00 : f32
    %298 = vector.broadcast %cst_49 : f32 to vector<8x128xf32>
    %299 = arith.addf %298, %297 : vector<8x128xf32>
    %300 = arith.divf %298, %299 : vector<8x128xf32>
    %301 = vector.extract_strided_slice %277 {offsets = [0, 256], sizes = [8, 128], strides = [1, 1]} : vector<8x384xf32> to vector<8x128xf32>
    %302 = vector.extract_strided_slice %284 {offsets = [0, 256], sizes = [8, 128], strides = [1, 1]} : vector<8x384xf32> to vector<8x128xf32>
    %303 = arith.addf %302, %14 : vector<8x128xf32>
    %304 = arith.mulf %292, %303 : vector<8x128xf32>
    %305 = arith.addf %301, %304 : vector<8x128xf32>
    %306 = math.tanh %305 : vector<8x128xf32>
    %307 = arith.subf %275, %306 : vector<8x128xf32>
    %308 = arith.mulf %300, %307 : vector<8x128xf32>
    %309 = arith.addf %306, %308 : vector<8x128xf32>
    %310 = vector.broadcast %282 : vector<8x1xf32> to vector<8x128xf32>
    %311 = arith.mulf %310, %309 : vector<8x128xf32>
    %c6 = arith.constant 6 : index
    %c0_50 = arith.constant 0 : index
    %c0_51 = arith.constant 0 : index
    %312 = vector.load %arg8[%c6, %c0_50, %c0_51] : memref<16x8x128xf32, #tpu.memory_space<vmem>>, vector<1x8x128xf32>
    %313 = vector.shape_cast %312 : vector<1x8x128xf32> to vector<8x128xf32>
    %314 = vector.shape_cast %311 : vector<8x128xf32> to vector<1x8x128xf32>
    tpu.vector_store %arg8[%c6, %c0_50, %c0_51], %314 {strides = array<i32>} : memref<16x8x128xf32, #tpu.memory_space<vmem>>, vector<1x8x128xf32>,
    %315 = arith.subf %309, %275 : vector<8x128xf32>
    %316 = vector.broadcast %282 : vector<8x1xf32> to vector<8x128xf32>
    %317 = arith.mulf %316, %315 : vector<8x128xf32>
    %318 = arith.addf %275, %317 : vector<8x128xf32>
    %319 = vector.extract_strided_slice %10 {offsets = [7, 0, 0], sizes = [1, 8, 384], strides = [1, 1, 1]} : vector<16x8x384xf32> to vector<1x8x384xf32>
    %320 = vector.shape_cast %319 : vector<1x8x384xf32> to vector<8x384xf32>
    %c7_i32 = arith.constant 7 : i32
    %321 = arith.addi %16, %c7_i32 : i32
    %322 = vector.broadcast %321 : i32 to vector<8x1xi32>
    %323 = arith.cmpi slt, %322, %15 : vector<8x1xi32>
    %324 = arith.extui %323 : vector<8x1xi1> to vector<8x1xi32>
    %325 = arith.sitofp %324 : vector<8x1xi32> to vector<8x1xf32>
    %326 = arith.truncf %318 : vector<8x128xf32> to vector<8x128xbf16>
    %cst_52 = arith.constant dense<0.000000e+00> : vector<8x384xf32>
    %327 = tpu.matmul %326, %11, %cst_52 {dimension_numbers = #tpu.dot_dimension_numbers<[1], [0], [0], [1], [0, 0, 1, 1], [], []>} : vector<8x128xbf16>, vector<128x384xbf16>, vector<8x384xf32> -> vector<8x384xf32>
    %328 = vector.extract_strided_slice %320 {offsets = [0, 0], sizes = [8, 128], strides = [1, 1]} : vector<8x384xf32> to vector<8x128xf32>
    %329 = vector.extract_strided_slice %327 {offsets = [0, 0], sizes = [8, 128], strides = [1, 1]} : vector<8x384xf32> to vector<8x128xf32>
    %330 = arith.addf %328, %329 : vector<8x128xf32>
    %331 = arith.negf %330 : vector<8x128xf32>
    %332 = math.exp %331 : vector<8x128xf32>
    %cst_53 = arith.constant 1.000000e+00 : f32
    %333 = vector.broadcast %cst_53 : f32 to vector<8x128xf32>
    %334 = arith.addf %333, %332 : vector<8x128xf32>
    %335 = arith.divf %333, %334 : vector<8x128xf32>
    %336 = vector.extract_strided_slice %320 {offsets = [0, 128], sizes = [8, 128], strides = [1, 1]} : vector<8x384xf32> to vector<8x128xf32>
    %337 = vector.extract_strided_slice %327 {offsets = [0, 128], sizes = [8, 128], strides = [1, 1]} : vector<8x384xf32> to vector<8x128xf32>
    %338 = arith.addf %336, %337 : vector<8x128xf32>
    %339 = arith.negf %338 : vector<8x128xf32>
    %340 = math.exp %339 : vector<8x128xf32>
    %cst_54 = arith.constant 1.000000e+00 : f32
    %341 = vector.broadcast %cst_54 : f32 to vector<8x128xf32>
    %342 = arith.addf %341, %340 : vector<8x128xf32>
    %343 = arith.divf %341, %342 : vector<8x128xf32>
    %344 = vector.extract_strided_slice %320 {offsets = [0, 256], sizes = [8, 128], strides = [1, 1]} : vector<8x384xf32> to vector<8x128xf32>
    %345 = vector.extract_strided_slice %327 {offsets = [0, 256], sizes = [8, 128], strides = [1, 1]} : vector<8x384xf32> to vector<8x128xf32>
    %346 = arith.addf %345, %14 : vector<8x128xf32>
    %347 = arith.mulf %335, %346 : vector<8x128xf32>
    %348 = arith.addf %344, %347 : vector<8x128xf32>
    %349 = math.tanh %348 : vector<8x128xf32>
    %350 = arith.subf %318, %349 : vector<8x128xf32>
    %351 = arith.mulf %343, %350 : vector<8x128xf32>
    %352 = arith.addf %349, %351 : vector<8x128xf32>
    %353 = vector.broadcast %325 : vector<8x1xf32> to vector<8x128xf32>
    %354 = arith.mulf %353, %352 : vector<8x128xf32>
    %c7 = arith.constant 7 : index
    %c0_55 = arith.constant 0 : index
    %c0_56 = arith.constant 0 : index
    %355 = vector.load %arg8[%c7, %c0_55, %c0_56] : memref<16x8x128xf32, #tpu.memory_space<vmem>>, vector<1x8x128xf32>
    %356 = vector.shape_cast %355 : vector<1x8x128xf32> to vector<8x128xf32>
    %357 = vector.shape_cast %354 : vector<8x128xf32> to vector<1x8x128xf32>
    tpu.vector_store %arg8[%c7, %c0_55, %c0_56], %357 {strides = array<i32>} : memref<16x8x128xf32, #tpu.memory_space<vmem>>, vector<1x8x128xf32>,
    %358 = arith.subf %352, %318 : vector<8x128xf32>
    %359 = vector.broadcast %325 : vector<8x1xf32> to vector<8x128xf32>
    %360 = arith.mulf %359, %358 : vector<8x128xf32>
    %361 = arith.addf %318, %360 : vector<8x128xf32>
    %362 = vector.extract_strided_slice %10 {offsets = [8, 0, 0], sizes = [1, 8, 384], strides = [1, 1, 1]} : vector<16x8x384xf32> to vector<1x8x384xf32>
    %363 = vector.shape_cast %362 : vector<1x8x384xf32> to vector<8x384xf32>
    %c8_i32 = arith.constant 8 : i32
    %364 = arith.addi %16, %c8_i32 : i32
    %365 = vector.broadcast %364 : i32 to vector<8x1xi32>
    %366 = arith.cmpi slt, %365, %15 : vector<8x1xi32>
    %367 = arith.extui %366 : vector<8x1xi1> to vector<8x1xi32>
    %368 = arith.sitofp %367 : vector<8x1xi32> to vector<8x1xf32>
    %369 = arith.truncf %361 : vector<8x128xf32> to vector<8x128xbf16>
    %cst_57 = arith.constant dense<0.000000e+00> : vector<8x384xf32>
    %370 = tpu.matmul %369, %11, %cst_57 {dimension_numbers = #tpu.dot_dimension_numbers<[1], [0], [0], [1], [0, 0, 1, 1], [], []>} : vector<8x128xbf16>, vector<128x384xbf16>, vector<8x384xf32> -> vector<8x384xf32>
    %371 = vector.extract_strided_slice %363 {offsets = [0, 0], sizes = [8, 128], strides = [1, 1]} : vector<8x384xf32> to vector<8x128xf32>
    %372 = vector.extract_strided_slice %370 {offsets = [0, 0], sizes = [8, 128], strides = [1, 1]} : vector<8x384xf32> to vector<8x128xf32>
    %373 = arith.addf %371, %372 : vector<8x128xf32>
    %374 = arith.negf %373 : vector<8x128xf32>
    %375 = math.exp %374 : vector<8x128xf32>
    %cst_58 = arith.constant 1.000000e+00 : f32
    %376 = vector.broadcast %cst_58 : f32 to vector<8x128xf32>
    %377 = arith.addf %376, %375 : vector<8x128xf32>
    %378 = arith.divf %376, %377 : vector<8x128xf32>
    %379 = vector.extract_strided_slice %363 {offsets = [0, 128], sizes = [8, 128], strides = [1, 1]} : vector<8x384xf32> to vector<8x128xf32>
    %380 = vector.extract_strided_slice %370 {offsets = [0, 128], sizes = [8, 128], strides = [1, 1]} : vector<8x384xf32> to vector<8x128xf32>
    %381 = arith.addf %379, %380 : vector<8x128xf32>
    %382 = arith.negf %381 : vector<8x128xf32>
    %383 = math.exp %382 : vector<8x128xf32>
    %cst_59 = arith.constant 1.000000e+00 : f32
    %384 = vector.broadcast %cst_59 : f32 to vector<8x128xf32>
    %385 = arith.addf %384, %383 : vector<8x128xf32>
    %386 = arith.divf %384, %385 : vector<8x128xf32>
    %387 = vector.extract_strided_slice %363 {offsets = [0, 256], sizes = [8, 128], strides = [1, 1]} : vector<8x384xf32> to vector<8x128xf32>
    %388 = vector.extract_strided_slice %370 {offsets = [0, 256], sizes = [8, 128], strides = [1, 1]} : vector<8x384xf32> to vector<8x128xf32>
    %389 = arith.addf %388, %14 : vector<8x128xf32>
    %390 = arith.mulf %378, %389 : vector<8x128xf32>
    %391 = arith.addf %387, %390 : vector<8x128xf32>
    %392 = math.tanh %391 : vector<8x128xf32>
    %393 = arith.subf %361, %392 : vector<8x128xf32>
    %394 = arith.mulf %386, %393 : vector<8x128xf32>
    %395 = arith.addf %392, %394 : vector<8x128xf32>
    %396 = vector.broadcast %368 : vector<8x1xf32> to vector<8x128xf32>
    %397 = arith.mulf %396, %395 : vector<8x128xf32>
    %c8 = arith.constant 8 : index
    %c0_60 = arith.constant 0 : index
    %c0_61 = arith.constant 0 : index
    %398 = vector.load %arg8[%c8, %c0_60, %c0_61] : memref<16x8x128xf32, #tpu.memory_space<vmem>>, vector<1x8x128xf32>
    %399 = vector.shape_cast %398 : vector<1x8x128xf32> to vector<8x128xf32>
    %400 = vector.shape_cast %397 : vector<8x128xf32> to vector<1x8x128xf32>
    tpu.vector_store %arg8[%c8, %c0_60, %c0_61], %400 {strides = array<i32>} : memref<16x8x128xf32, #tpu.memory_space<vmem>>, vector<1x8x128xf32>,
    %401 = arith.subf %395, %361 : vector<8x128xf32>
    %402 = vector.broadcast %368 : vector<8x1xf32> to vector<8x128xf32>
    %403 = arith.mulf %402, %401 : vector<8x128xf32>
    %404 = arith.addf %361, %403 : vector<8x128xf32>
    %405 = vector.extract_strided_slice %10 {offsets = [9, 0, 0], sizes = [1, 8, 384], strides = [1, 1, 1]} : vector<16x8x384xf32> to vector<1x8x384xf32>
    %406 = vector.shape_cast %405 : vector<1x8x384xf32> to vector<8x384xf32>
    %c9_i32 = arith.constant 9 : i32
    %407 = arith.addi %16, %c9_i32 : i32
    %408 = vector.broadcast %407 : i32 to vector<8x1xi32>
    %409 = arith.cmpi slt, %408, %15 : vector<8x1xi32>
    %410 = arith.extui %409 : vector<8x1xi1> to vector<8x1xi32>
    %411 = arith.sitofp %410 : vector<8x1xi32> to vector<8x1xf32>
    %412 = arith.truncf %404 : vector<8x128xf32> to vector<8x128xbf16>
    %cst_62 = arith.constant dense<0.000000e+00> : vector<8x384xf32>
    %413 = tpu.matmul %412, %11, %cst_62 {dimension_numbers = #tpu.dot_dimension_numbers<[1], [0], [0], [1], [0, 0, 1, 1], [], []>} : vector<8x128xbf16>, vector<128x384xbf16>, vector<8x384xf32> -> vector<8x384xf32>
    %414 = vector.extract_strided_slice %406 {offsets = [0, 0], sizes = [8, 128], strides = [1, 1]} : vector<8x384xf32> to vector<8x128xf32>
    %415 = vector.extract_strided_slice %413 {offsets = [0, 0], sizes = [8, 128], strides = [1, 1]} : vector<8x384xf32> to vector<8x128xf32>
    %416 = arith.addf %414, %415 : vector<8x128xf32>
    %417 = arith.negf %416 : vector<8x128xf32>
    %418 = math.exp %417 : vector<8x128xf32>
    %cst_63 = arith.constant 1.000000e+00 : f32
    %419 = vector.broadcast %cst_63 : f32 to vector<8x128xf32>
    %420 = arith.addf %419, %418 : vector<8x128xf32>
    %421 = arith.divf %419, %420 : vector<8x128xf32>
    %422 = vector.extract_strided_slice %406 {offsets = [0, 128], sizes = [8, 128], strides = [1, 1]} : vector<8x384xf32> to vector<8x128xf32>
    %423 = vector.extract_strided_slice %413 {offsets = [0, 128], sizes = [8, 128], strides = [1, 1]} : vector<8x384xf32> to vector<8x128xf32>
    %424 = arith.addf %422, %423 : vector<8x128xf32>
    %425 = arith.negf %424 : vector<8x128xf32>
    %426 = math.exp %425 : vector<8x128xf32>
    %cst_64 = arith.constant 1.000000e+00 : f32
    %427 = vector.broadcast %cst_64 : f32 to vector<8x128xf32>
    %428 = arith.addf %427, %426 : vector<8x128xf32>
    %429 = arith.divf %427, %428 : vector<8x128xf32>
    %430 = vector.extract_strided_slice %406 {offsets = [0, 256], sizes = [8, 128], strides = [1, 1]} : vector<8x384xf32> to vector<8x128xf32>
    %431 = vector.extract_strided_slice %413 {offsets = [0, 256], sizes = [8, 128], strides = [1, 1]} : vector<8x384xf32> to vector<8x128xf32>
    %432 = arith.addf %431, %14 : vector<8x128xf32>
    %433 = arith.mulf %421, %432 : vector<8x128xf32>
    %434 = arith.addf %430, %433 : vector<8x128xf32>
    %435 = math.tanh %434 : vector<8x128xf32>
    %436 = arith.subf %404, %435 : vector<8x128xf32>
    %437 = arith.mulf %429, %436 : vector<8x128xf32>
    %438 = arith.addf %435, %437 : vector<8x128xf32>
    %439 = vector.broadcast %411 : vector<8x1xf32> to vector<8x128xf32>
    %440 = arith.mulf %439, %438 : vector<8x128xf32>
    %c9 = arith.constant 9 : index
    %c0_65 = arith.constant 0 : index
    %c0_66 = arith.constant 0 : index
    %441 = vector.load %arg8[%c9, %c0_65, %c0_66] : memref<16x8x128xf32, #tpu.memory_space<vmem>>, vector<1x8x128xf32>
    %442 = vector.shape_cast %441 : vector<1x8x128xf32> to vector<8x128xf32>
    %443 = vector.shape_cast %440 : vector<8x128xf32> to vector<1x8x128xf32>
    tpu.vector_store %arg8[%c9, %c0_65, %c0_66], %443 {strides = array<i32>} : memref<16x8x128xf32, #tpu.memory_space<vmem>>, vector<1x8x128xf32>,
    %444 = arith.subf %438, %404 : vector<8x128xf32>
    %445 = vector.broadcast %411 : vector<8x1xf32> to vector<8x128xf32>
    %446 = arith.mulf %445, %444 : vector<8x128xf32>
    %447 = arith.addf %404, %446 : vector<8x128xf32>
    %448 = vector.extract_strided_slice %10 {offsets = [10, 0, 0], sizes = [1, 8, 384], strides = [1, 1, 1]} : vector<16x8x384xf32> to vector<1x8x384xf32>
    %449 = vector.shape_cast %448 : vector<1x8x384xf32> to vector<8x384xf32>
    %c10_i32 = arith.constant 10 : i32
    %450 = arith.addi %16, %c10_i32 : i32
    %451 = vector.broadcast %450 : i32 to vector<8x1xi32>
    %452 = arith.cmpi slt, %451, %15 : vector<8x1xi32>
    %453 = arith.extui %452 : vector<8x1xi1> to vector<8x1xi32>
    %454 = arith.sitofp %453 : vector<8x1xi32> to vector<8x1xf32>
    %455 = arith.truncf %447 : vector<8x128xf32> to vector<8x128xbf16>
    %cst_67 = arith.constant dense<0.000000e+00> : vector<8x384xf32>
    %456 = tpu.matmul %455, %11, %cst_67 {dimension_numbers = #tpu.dot_dimension_numbers<[1], [0], [0], [1], [0, 0, 1, 1], [], []>} : vector<8x128xbf16>, vector<128x384xbf16>, vector<8x384xf32> -> vector<8x384xf32>
    %457 = vector.extract_strided_slice %449 {offsets = [0, 0], sizes = [8, 128], strides = [1, 1]} : vector<8x384xf32> to vector<8x128xf32>
    %458 = vector.extract_strided_slice %456 {offsets = [0, 0], sizes = [8, 128], strides = [1, 1]} : vector<8x384xf32> to vector<8x128xf32>
    %459 = arith.addf %457, %458 : vector<8x128xf32>
    %460 = arith.negf %459 : vector<8x128xf32>
    %461 = math.exp %460 : vector<8x128xf32>
    %cst_68 = arith.constant 1.000000e+00 : f32
    %462 = vector.broadcast %cst_68 : f32 to vector<8x128xf32>
    %463 = arith.addf %462, %461 : vector<8x128xf32>
    %464 = arith.divf %462, %463 : vector<8x128xf32>
    %465 = vector.extract_strided_slice %449 {offsets = [0, 128], sizes = [8, 128], strides = [1, 1]} : vector<8x384xf32> to vector<8x128xf32>
    %466 = vector.extract_strided_slice %456 {offsets = [0, 128], sizes = [8, 128], strides = [1, 1]} : vector<8x384xf32> to vector<8x128xf32>
    %467 = arith.addf %465, %466 : vector<8x128xf32>
    %468 = arith.negf %467 : vector<8x128xf32>
    %469 = math.exp %468 : vector<8x128xf32>
    %cst_69 = arith.constant 1.000000e+00 : f32
    %470 = vector.broadcast %cst_69 : f32 to vector<8x128xf32>
    %471 = arith.addf %470, %469 : vector<8x128xf32>
    %472 = arith.divf %470, %471 : vector<8x128xf32>
    %473 = vector.extract_strided_slice %449 {offsets = [0, 256], sizes = [8, 128], strides = [1, 1]} : vector<8x384xf32> to vector<8x128xf32>
    %474 = vector.extract_strided_slice %456 {offsets = [0, 256], sizes = [8, 128], strides = [1, 1]} : vector<8x384xf32> to vector<8x128xf32>
    %475 = arith.addf %474, %14 : vector<8x128xf32>
    %476 = arith.mulf %464, %475 : vector<8x128xf32>
    %477 = arith.addf %473, %476 : vector<8x128xf32>
    %478 = math.tanh %477 : vector<8x128xf32>
    %479 = arith.subf %447, %478 : vector<8x128xf32>
    %480 = arith.mulf %472, %479 : vector<8x128xf32>
    %481 = arith.addf %478, %480 : vector<8x128xf32>
    %482 = vector.broadcast %454 : vector<8x1xf32> to vector<8x128xf32>
    %483 = arith.mulf %482, %481 : vector<8x128xf32>
    %c10 = arith.constant 10 : index
    %c0_70 = arith.constant 0 : index
    %c0_71 = arith.constant 0 : index
    %484 = vector.load %arg8[%c10, %c0_70, %c0_71] : memref<16x8x128xf32, #tpu.memory_space<vmem>>, vector<1x8x128xf32>
    %485 = vector.shape_cast %484 : vector<1x8x128xf32> to vector<8x128xf32>
    %486 = vector.shape_cast %483 : vector<8x128xf32> to vector<1x8x128xf32>
    tpu.vector_store %arg8[%c10, %c0_70, %c0_71], %486 {strides = array<i32>} : memref<16x8x128xf32, #tpu.memory_space<vmem>>, vector<1x8x128xf32>,
    %487 = arith.subf %481, %447 : vector<8x128xf32>
    %488 = vector.broadcast %454 : vector<8x1xf32> to vector<8x128xf32>
    %489 = arith.mulf %488, %487 : vector<8x128xf32>
    %490 = arith.addf %447, %489 : vector<8x128xf32>
    %491 = vector.extract_strided_slice %10 {offsets = [11, 0, 0], sizes = [1, 8, 384], strides = [1, 1, 1]} : vector<16x8x384xf32> to vector<1x8x384xf32>
    %492 = vector.shape_cast %491 : vector<1x8x384xf32> to vector<8x384xf32>
    %c11_i32 = arith.constant 11 : i32
    %493 = arith.addi %16, %c11_i32 : i32
    %494 = vector.broadcast %493 : i32 to vector<8x1xi32>
    %495 = arith.cmpi slt, %494, %15 : vector<8x1xi32>
    %496 = arith.extui %495 : vector<8x1xi1> to vector<8x1xi32>
    %497 = arith.sitofp %496 : vector<8x1xi32> to vector<8x1xf32>
    %498 = arith.truncf %490 : vector<8x128xf32> to vector<8x128xbf16>
    %cst_72 = arith.constant dense<0.000000e+00> : vector<8x384xf32>
    %499 = tpu.matmul %498, %11, %cst_72 {dimension_numbers = #tpu.dot_dimension_numbers<[1], [0], [0], [1], [0, 0, 1, 1], [], []>} : vector<8x128xbf16>, vector<128x384xbf16>, vector<8x384xf32> -> vector<8x384xf32>
    %500 = vector.extract_strided_slice %492 {offsets = [0, 0], sizes = [8, 128], strides = [1, 1]} : vector<8x384xf32> to vector<8x128xf32>
    %501 = vector.extract_strided_slice %499 {offsets = [0, 0], sizes = [8, 128], strides = [1, 1]} : vector<8x384xf32> to vector<8x128xf32>
    %502 = arith.addf %500, %501 : vector<8x128xf32>
    %503 = arith.negf %502 : vector<8x128xf32>
    %504 = math.exp %503 : vector<8x128xf32>
    %cst_73 = arith.constant 1.000000e+00 : f32
    %505 = vector.broadcast %cst_73 : f32 to vector<8x128xf32>
    %506 = arith.addf %505, %504 : vector<8x128xf32>
    %507 = arith.divf %505, %506 : vector<8x128xf32>
    %508 = vector.extract_strided_slice %492 {offsets = [0, 128], sizes = [8, 128], strides = [1, 1]} : vector<8x384xf32> to vector<8x128xf32>
    %509 = vector.extract_strided_slice %499 {offsets = [0, 128], sizes = [8, 128], strides = [1, 1]} : vector<8x384xf32> to vector<8x128xf32>
    %510 = arith.addf %508, %509 : vector<8x128xf32>
    %511 = arith.negf %510 : vector<8x128xf32>
    %512 = math.exp %511 : vector<8x128xf32>
    %cst_74 = arith.constant 1.000000e+00 : f32
    %513 = vector.broadcast %cst_74 : f32 to vector<8x128xf32>
    %514 = arith.addf %513, %512 : vector<8x128xf32>
    %515 = arith.divf %513, %514 : vector<8x128xf32>
    %516 = vector.extract_strided_slice %492 {offsets = [0, 256], sizes = [8, 128], strides = [1, 1]} : vector<8x384xf32> to vector<8x128xf32>
    %517 = vector.extract_strided_slice %499 {offsets = [0, 256], sizes = [8, 128], strides = [1, 1]} : vector<8x384xf32> to vector<8x128xf32>
    %518 = arith.addf %517, %14 : vector<8x128xf32>
    %519 = arith.mulf %507, %518 : vector<8x128xf32>
    %520 = arith.addf %516, %519 : vector<8x128xf32>
    %521 = math.tanh %520 : vector<8x128xf32>
    %522 = arith.subf %490, %521 : vector<8x128xf32>
    %523 = arith.mulf %515, %522 : vector<8x128xf32>
    %524 = arith.addf %521, %523 : vector<8x128xf32>
    %525 = vector.broadcast %497 : vector<8x1xf32> to vector<8x128xf32>
    %526 = arith.mulf %525, %524 : vector<8x128xf32>
    %c11 = arith.constant 11 : index
    %c0_75 = arith.constant 0 : index
    %c0_76 = arith.constant 0 : index
    %527 = vector.load %arg8[%c11, %c0_75, %c0_76] : memref<16x8x128xf32, #tpu.memory_space<vmem>>, vector<1x8x128xf32>
    %528 = vector.shape_cast %527 : vector<1x8x128xf32> to vector<8x128xf32>
    %529 = vector.shape_cast %526 : vector<8x128xf32> to vector<1x8x128xf32>
    tpu.vector_store %arg8[%c11, %c0_75, %c0_76], %529 {strides = array<i32>} : memref<16x8x128xf32, #tpu.memory_space<vmem>>, vector<1x8x128xf32>,
    %530 = arith.subf %524, %490 : vector<8x128xf32>
    %531 = vector.broadcast %497 : vector<8x1xf32> to vector<8x128xf32>
    %532 = arith.mulf %531, %530 : vector<8x128xf32>
    %533 = arith.addf %490, %532 : vector<8x128xf32>
    %534 = vector.extract_strided_slice %10 {offsets = [12, 0, 0], sizes = [1, 8, 384], strides = [1, 1, 1]} : vector<16x8x384xf32> to vector<1x8x384xf32>
    %535 = vector.shape_cast %534 : vector<1x8x384xf32> to vector<8x384xf32>
    %c12_i32 = arith.constant 12 : i32
    %536 = arith.addi %16, %c12_i32 : i32
    %537 = vector.broadcast %536 : i32 to vector<8x1xi32>
    %538 = arith.cmpi slt, %537, %15 : vector<8x1xi32>
    %539 = arith.extui %538 : vector<8x1xi1> to vector<8x1xi32>
    %540 = arith.sitofp %539 : vector<8x1xi32> to vector<8x1xf32>
    %541 = arith.truncf %533 : vector<8x128xf32> to vector<8x128xbf16>
    %cst_77 = arith.constant dense<0.000000e+00> : vector<8x384xf32>
    %542 = tpu.matmul %541, %11, %cst_77 {dimension_numbers = #tpu.dot_dimension_numbers<[1], [0], [0], [1], [0, 0, 1, 1], [], []>} : vector<8x128xbf16>, vector<128x384xbf16>, vector<8x384xf32> -> vector<8x384xf32>
    %543 = vector.extract_strided_slice %535 {offsets = [0, 0], sizes = [8, 128], strides = [1, 1]} : vector<8x384xf32> to vector<8x128xf32>
    %544 = vector.extract_strided_slice %542 {offsets = [0, 0], sizes = [8, 128], strides = [1, 1]} : vector<8x384xf32> to vector<8x128xf32>
    %545 = arith.addf %543, %544 : vector<8x128xf32>
    %546 = arith.negf %545 : vector<8x128xf32>
    %547 = math.exp %546 : vector<8x128xf32>
    %cst_78 = arith.constant 1.000000e+00 : f32
    %548 = vector.broadcast %cst_78 : f32 to vector<8x128xf32>
    %549 = arith.addf %548, %547 : vector<8x128xf32>
    %550 = arith.divf %548, %549 : vector<8x128xf32>
    %551 = vector.extract_strided_slice %535 {offsets = [0, 128], sizes = [8, 128], strides = [1, 1]} : vector<8x384xf32> to vector<8x128xf32>
    %552 = vector.extract_strided_slice %542 {offsets = [0, 128], sizes = [8, 128], strides = [1, 1]} : vector<8x384xf32> to vector<8x128xf32>
    %553 = arith.addf %551, %552 : vector<8x128xf32>
    %554 = arith.negf %553 : vector<8x128xf32>
    %555 = math.exp %554 : vector<8x128xf32>
    %cst_79 = arith.constant 1.000000e+00 : f32
    %556 = vector.broadcast %cst_79 : f32 to vector<8x128xf32>
    %557 = arith.addf %556, %555 : vector<8x128xf32>
    %558 = arith.divf %556, %557 : vector<8x128xf32>
    %559 = vector.extract_strided_slice %535 {offsets = [0, 256], sizes = [8, 128], strides = [1, 1]} : vector<8x384xf32> to vector<8x128xf32>
    %560 = vector.extract_strided_slice %542 {offsets = [0, 256], sizes = [8, 128], strides = [1, 1]} : vector<8x384xf32> to vector<8x128xf32>
    %561 = arith.addf %560, %14 : vector<8x128xf32>
    %562 = arith.mulf %550, %561 : vector<8x128xf32>
    %563 = arith.addf %559, %562 : vector<8x128xf32>
    %564 = math.tanh %563 : vector<8x128xf32>
    %565 = arith.subf %533, %564 : vector<8x128xf32>
    %566 = arith.mulf %558, %565 : vector<8x128xf32>
    %567 = arith.addf %564, %566 : vector<8x128xf32>
    %568 = vector.broadcast %540 : vector<8x1xf32> to vector<8x128xf32>
    %569 = arith.mulf %568, %567 : vector<8x128xf32>
    %c12 = arith.constant 12 : index
    %c0_80 = arith.constant 0 : index
    %c0_81 = arith.constant 0 : index
    %570 = vector.load %arg8[%c12, %c0_80, %c0_81] : memref<16x8x128xf32, #tpu.memory_space<vmem>>, vector<1x8x128xf32>
    %571 = vector.shape_cast %570 : vector<1x8x128xf32> to vector<8x128xf32>
    %572 = vector.shape_cast %569 : vector<8x128xf32> to vector<1x8x128xf32>
    tpu.vector_store %arg8[%c12, %c0_80, %c0_81], %572 {strides = array<i32>} : memref<16x8x128xf32, #tpu.memory_space<vmem>>, vector<1x8x128xf32>,
    %573 = arith.subf %567, %533 : vector<8x128xf32>
    %574 = vector.broadcast %540 : vector<8x1xf32> to vector<8x128xf32>
    %575 = arith.mulf %574, %573 : vector<8x128xf32>
    %576 = arith.addf %533, %575 : vector<8x128xf32>
    %577 = vector.extract_strided_slice %10 {offsets = [13, 0, 0], sizes = [1, 8, 384], strides = [1, 1, 1]} : vector<16x8x384xf32> to vector<1x8x384xf32>
    %578 = vector.shape_cast %577 : vector<1x8x384xf32> to vector<8x384xf32>
    %c13_i32 = arith.constant 13 : i32
    %579 = arith.addi %16, %c13_i32 : i32
    %580 = vector.broadcast %579 : i32 to vector<8x1xi32>
    %581 = arith.cmpi slt, %580, %15 : vector<8x1xi32>
    %582 = arith.extui %581 : vector<8x1xi1> to vector<8x1xi32>
    %583 = arith.sitofp %582 : vector<8x1xi32> to vector<8x1xf32>
    %584 = arith.truncf %576 : vector<8x128xf32> to vector<8x128xbf16>
    %cst_82 = arith.constant dense<0.000000e+00> : vector<8x384xf32>
    %585 = tpu.matmul %584, %11, %cst_82 {dimension_numbers = #tpu.dot_dimension_numbers<[1], [0], [0], [1], [0, 0, 1, 1], [], []>} : vector<8x128xbf16>, vector<128x384xbf16>, vector<8x384xf32> -> vector<8x384xf32>
    %586 = vector.extract_strided_slice %578 {offsets = [0, 0], sizes = [8, 128], strides = [1, 1]} : vector<8x384xf32> to vector<8x128xf32>
    %587 = vector.extract_strided_slice %585 {offsets = [0, 0], sizes = [8, 128], strides = [1, 1]} : vector<8x384xf32> to vector<8x128xf32>
    %588 = arith.addf %586, %587 : vector<8x128xf32>
    %589 = arith.negf %588 : vector<8x128xf32>
    %590 = math.exp %589 : vector<8x128xf32>
    %cst_83 = arith.constant 1.000000e+00 : f32
    %591 = vector.broadcast %cst_83 : f32 to vector<8x128xf32>
    %592 = arith.addf %591, %590 : vector<8x128xf32>
    %593 = arith.divf %591, %592 : vector<8x128xf32>
    %594 = vector.extract_strided_slice %578 {offsets = [0, 128], sizes = [8, 128], strides = [1, 1]} : vector<8x384xf32> to vector<8x128xf32>
    %595 = vector.extract_strided_slice %585 {offsets = [0, 128], sizes = [8, 128], strides = [1, 1]} : vector<8x384xf32> to vector<8x128xf32>
    %596 = arith.addf %594, %595 : vector<8x128xf32>
    %597 = arith.negf %596 : vector<8x128xf32>
    %598 = math.exp %597 : vector<8x128xf32>
    %cst_84 = arith.constant 1.000000e+00 : f32
    %599 = vector.broadcast %cst_84 : f32 to vector<8x128xf32>
    %600 = arith.addf %599, %598 : vector<8x128xf32>
    %601 = arith.divf %599, %600 : vector<8x128xf32>
    %602 = vector.extract_strided_slice %578 {offsets = [0, 256], sizes = [8, 128], strides = [1, 1]} : vector<8x384xf32> to vector<8x128xf32>
    %603 = vector.extract_strided_slice %585 {offsets = [0, 256], sizes = [8, 128], strides = [1, 1]} : vector<8x384xf32> to vector<8x128xf32>
    %604 = arith.addf %603, %14 : vector<8x128xf32>
    %605 = arith.mulf %593, %604 : vector<8x128xf32>
    %606 = arith.addf %602, %605 : vector<8x128xf32>
    %607 = math.tanh %606 : vector<8x128xf32>
    %608 = arith.subf %576, %607 : vector<8x128xf32>
    %609 = arith.mulf %601, %608 : vector<8x128xf32>
    %610 = arith.addf %607, %609 : vector<8x128xf32>
    %611 = vector.broadcast %583 : vector<8x1xf32> to vector<8x128xf32>
    %612 = arith.mulf %611, %610 : vector<8x128xf32>
    %c13 = arith.constant 13 : index
    %c0_85 = arith.constant 0 : index
    %c0_86 = arith.constant 0 : index
    %613 = vector.load %arg8[%c13, %c0_85, %c0_86] : memref<16x8x128xf32, #tpu.memory_space<vmem>>, vector<1x8x128xf32>
    %614 = vector.shape_cast %613 : vector<1x8x128xf32> to vector<8x128xf32>
    %615 = vector.shape_cast %612 : vector<8x128xf32> to vector<1x8x128xf32>
    tpu.vector_store %arg8[%c13, %c0_85, %c0_86], %615 {strides = array<i32>} : memref<16x8x128xf32, #tpu.memory_space<vmem>>, vector<1x8x128xf32>,
    %616 = arith.subf %610, %576 : vector<8x128xf32>
    %617 = vector.broadcast %583 : vector<8x1xf32> to vector<8x128xf32>
    %618 = arith.mulf %617, %616 : vector<8x128xf32>
    %619 = arith.addf %576, %618 : vector<8x128xf32>
    %620 = vector.extract_strided_slice %10 {offsets = [14, 0, 0], sizes = [1, 8, 384], strides = [1, 1, 1]} : vector<16x8x384xf32> to vector<1x8x384xf32>
    %621 = vector.shape_cast %620 : vector<1x8x384xf32> to vector<8x384xf32>
    %c14_i32 = arith.constant 14 : i32
    %622 = arith.addi %16, %c14_i32 : i32
    %623 = vector.broadcast %622 : i32 to vector<8x1xi32>
    %624 = arith.cmpi slt, %623, %15 : vector<8x1xi32>
    %625 = arith.extui %624 : vector<8x1xi1> to vector<8x1xi32>
    %626 = arith.sitofp %625 : vector<8x1xi32> to vector<8x1xf32>
    %627 = arith.truncf %619 : vector<8x128xf32> to vector<8x128xbf16>
    %cst_87 = arith.constant dense<0.000000e+00> : vector<8x384xf32>
    %628 = tpu.matmul %627, %11, %cst_87 {dimension_numbers = #tpu.dot_dimension_numbers<[1], [0], [0], [1], [0, 0, 1, 1], [], []>} : vector<8x128xbf16>, vector<128x384xbf16>, vector<8x384xf32> -> vector<8x384xf32>
    %629 = vector.extract_strided_slice %621 {offsets = [0, 0], sizes = [8, 128], strides = [1, 1]} : vector<8x384xf32> to vector<8x128xf32>
    %630 = vector.extract_strided_slice %628 {offsets = [0, 0], sizes = [8, 128], strides = [1, 1]} : vector<8x384xf32> to vector<8x128xf32>
    %631 = arith.addf %629, %630 : vector<8x128xf32>
    %632 = arith.negf %631 : vector<8x128xf32>
    %633 = math.exp %632 : vector<8x128xf32>
    %cst_88 = arith.constant 1.000000e+00 : f32
    %634 = vector.broadcast %cst_88 : f32 to vector<8x128xf32>
    %635 = arith.addf %634, %633 : vector<8x128xf32>
    %636 = arith.divf %634, %635 : vector<8x128xf32>
    %637 = vector.extract_strided_slice %621 {offsets = [0, 128], sizes = [8, 128], strides = [1, 1]} : vector<8x384xf32> to vector<8x128xf32>
    %638 = vector.extract_strided_slice %628 {offsets = [0, 128], sizes = [8, 128], strides = [1, 1]} : vector<8x384xf32> to vector<8x128xf32>
    %639 = arith.addf %637, %638 : vector<8x128xf32>
    %640 = arith.negf %639 : vector<8x128xf32>
    %641 = math.exp %640 : vector<8x128xf32>
    %cst_89 = arith.constant 1.000000e+00 : f32
    %642 = vector.broadcast %cst_89 : f32 to vector<8x128xf32>
    %643 = arith.addf %642, %641 : vector<8x128xf32>
    %644 = arith.divf %642, %643 : vector<8x128xf32>
    %645 = vector.extract_strided_slice %621 {offsets = [0, 256], sizes = [8, 128], strides = [1, 1]} : vector<8x384xf32> to vector<8x128xf32>
    %646 = vector.extract_strided_slice %628 {offsets = [0, 256], sizes = [8, 128], strides = [1, 1]} : vector<8x384xf32> to vector<8x128xf32>
    %647 = arith.addf %646, %14 : vector<8x128xf32>
    %648 = arith.mulf %636, %647 : vector<8x128xf32>
    %649 = arith.addf %645, %648 : vector<8x128xf32>
    %650 = math.tanh %649 : vector<8x128xf32>
    %651 = arith.subf %619, %650 : vector<8x128xf32>
    %652 = arith.mulf %644, %651 : vector<8x128xf32>
    %653 = arith.addf %650, %652 : vector<8x128xf32>
    %654 = vector.broadcast %626 : vector<8x1xf32> to vector<8x128xf32>
    %655 = arith.mulf %654, %653 : vector<8x128xf32>
    %c14 = arith.constant 14 : index
    %c0_90 = arith.constant 0 : index
    %c0_91 = arith.constant 0 : index
    %656 = vector.load %arg8[%c14, %c0_90, %c0_91] : memref<16x8x128xf32, #tpu.memory_space<vmem>>, vector<1x8x128xf32>
    %657 = vector.shape_cast %656 : vector<1x8x128xf32> to vector<8x128xf32>
    %658 = vector.shape_cast %655 : vector<8x128xf32> to vector<1x8x128xf32>
    tpu.vector_store %arg8[%c14, %c0_90, %c0_91], %658 {strides = array<i32>} : memref<16x8x128xf32, #tpu.memory_space<vmem>>, vector<1x8x128xf32>,
    %659 = arith.subf %653, %619 : vector<8x128xf32>
    %660 = vector.broadcast %626 : vector<8x1xf32> to vector<8x128xf32>
    %661 = arith.mulf %660, %659 : vector<8x128xf32>
    %662 = arith.addf %619, %661 : vector<8x128xf32>
    %663 = vector.extract_strided_slice %10 {offsets = [15, 0, 0], sizes = [1, 8, 384], strides = [1, 1, 1]} : vector<16x8x384xf32> to vector<1x8x384xf32>
    %664 = vector.shape_cast %663 : vector<1x8x384xf32> to vector<8x384xf32>
    %c15_i32 = arith.constant 15 : i32
    %665 = arith.addi %16, %c15_i32 : i32
    %666 = vector.broadcast %665 : i32 to vector<8x1xi32>
    %667 = arith.cmpi slt, %666, %15 : vector<8x1xi32>
    %668 = arith.extui %667 : vector<8x1xi1> to vector<8x1xi32>
    %669 = arith.sitofp %668 : vector<8x1xi32> to vector<8x1xf32>
    %670 = arith.truncf %662 : vector<8x128xf32> to vector<8x128xbf16>
    %cst_92 = arith.constant dense<0.000000e+00> : vector<8x384xf32>
    %671 = tpu.matmul %670, %11, %cst_92 {dimension_numbers = #tpu.dot_dimension_numbers<[1], [0], [0], [1], [0, 0, 1, 1], [], []>} : vector<8x128xbf16>, vector<128x384xbf16>, vector<8x384xf32> -> vector<8x384xf32>
    %672 = vector.extract_strided_slice %664 {offsets = [0, 0], sizes = [8, 128], strides = [1, 1]} : vector<8x384xf32> to vector<8x128xf32>
    %673 = vector.extract_strided_slice %671 {offsets = [0, 0], sizes = [8, 128], strides = [1, 1]} : vector<8x384xf32> to vector<8x128xf32>
    %674 = arith.addf %672, %673 : vector<8x128xf32>
    %675 = arith.negf %674 : vector<8x128xf32>
    %676 = math.exp %675 : vector<8x128xf32>
    %cst_93 = arith.constant 1.000000e+00 : f32
    %677 = vector.broadcast %cst_93 : f32 to vector<8x128xf32>
    %678 = arith.addf %677, %676 : vector<8x128xf32>
    %679 = arith.divf %677, %678 : vector<8x128xf32>
    %680 = vector.extract_strided_slice %664 {offsets = [0, 128], sizes = [8, 128], strides = [1, 1]} : vector<8x384xf32> to vector<8x128xf32>
    %681 = vector.extract_strided_slice %671 {offsets = [0, 128], sizes = [8, 128], strides = [1, 1]} : vector<8x384xf32> to vector<8x128xf32>
    %682 = arith.addf %680, %681 : vector<8x128xf32>
    %683 = arith.negf %682 : vector<8x128xf32>
    %684 = math.exp %683 : vector<8x128xf32>
    %cst_94 = arith.constant 1.000000e+00 : f32
    %685 = vector.broadcast %cst_94 : f32 to vector<8x128xf32>
    %686 = arith.addf %685, %684 : vector<8x128xf32>
    %687 = arith.divf %685, %686 : vector<8x128xf32>
    %688 = vector.extract_strided_slice %664 {offsets = [0, 256], sizes = [8, 128], strides = [1, 1]} : vector<8x384xf32> to vector<8x128xf32>
    %689 = vector.extract_strided_slice %671 {offsets = [0, 256], sizes = [8, 128], strides = [1, 1]} : vector<8x384xf32> to vector<8x128xf32>
    %690 = arith.addf %689, %14 : vector<8x128xf32>
    %691 = arith.mulf %679, %690 : vector<8x128xf32>
    %692 = arith.addf %688, %691 : vector<8x128xf32>
    %693 = math.tanh %692 : vector<8x128xf32>
    %694 = arith.subf %662, %693 : vector<8x128xf32>
    %695 = arith.mulf %687, %694 : vector<8x128xf32>
    %696 = arith.addf %693, %695 : vector<8x128xf32>
    %697 = vector.broadcast %669 : vector<8x1xf32> to vector<8x128xf32>
    %698 = arith.mulf %697, %696 : vector<8x128xf32>
    %c15 = arith.constant 15 : index
    %c0_95 = arith.constant 0 : index
    %c0_96 = arith.constant 0 : index
    %699 = vector.load %arg8[%c15, %c0_95, %c0_96] : memref<16x8x128xf32, #tpu.memory_space<vmem>>, vector<1x8x128xf32>
    %700 = vector.shape_cast %699 : vector<1x8x128xf32> to vector<8x128xf32>
    %701 = vector.shape_cast %698 : vector<8x128xf32> to vector<1x8x128xf32>
    tpu.vector_store %arg8[%c15, %c0_95, %c0_96], %701 {strides = array<i32>} : memref<16x8x128xf32, #tpu.memory_space<vmem>>, vector<1x8x128xf32>,
    %702 = arith.subf %696, %662 : vector<8x128xf32>
    %703 = vector.broadcast %669 : vector<8x1xf32> to vector<8x128xf32>
    %704 = arith.mulf %703, %702 : vector<8x128xf32>
    %705 = arith.addf %662, %704 : vector<8x128xf32>
    %c0_97 = arith.constant 0 : index
    %c0_98 = arith.constant 0 : index
    %706 = vector.load %arg10[%c0_97, %c0_98] : memref<8x128xf32, #tpu.memory_space<vmem>>, vector<8x128xf32>
    tpu.vector_store %arg10[%c0_97, %c0_98], %705 {strides = array<i32>} : memref<8x128xf32, #tpu.memory_space<vmem>>, vector<8x128xf32>,
    %c1_i32_99 = arith.constant 1 : i32
    %707 = arith.cmpi eq, %arg1, %c1_i32_99 : i32
    %708 = arith.extui %707 : i1 to i32
    %c0_i32_100 = arith.constant 0 : i32
    %709 = arith.cmpi ne, %708, %c0_i32_100 : i32
    scf.if %709 {
      %c0_101 = arith.constant 0 : index
      %c0_102 = arith.constant 0 : index
      %c0_103 = arith.constant 0 : index
      %710 = vector.load %arg9[%c0_101, %c0_102, %c0_103] : memref<1x8x128xf32, #tpu.memory_space<vmem>>, vector<1x8x128xf32>
      %711 = vector.shape_cast %710 : vector<1x8x128xf32> to vector<8x128xf32>
      %712 = vector.shape_cast %705 : vector<8x128xf32> to vector<1x8x128xf32>
      tpu.vector_store %arg9[%c0_101, %c0_102, %c0_103], %712 {strides = array<i32>} : memref<1x8x128xf32, #tpu.memory_space<vmem>>, vector<1x8x128xf32>,
    } else {
    }
    return
  }
  func.func @transform_0(%arg0: i32, %arg1: i32) -> (i32, i32, i32) {
    %c0_i32 = arith.constant 0 : i32
    %c0_i32_0 = arith.constant 0 : i32
    return %arg1, %arg0, %c0_i32 : i32, i32, i32
  }
  func.func @transform_1(%arg0: i32, %arg1: i32) -> (i32, i32) {
    %c0_i32 = arith.constant 0 : i32
    %c0_i32_0 = arith.constant 0 : i32
    return %arg0, %c0_i32 : i32, i32
  }
  func.func @transform_2(%arg0: i32, %arg1: i32) -> (i32, i32) {
    %c0_i32 = arith.constant 0 : i32
    %c0_i32_0 = arith.constant 0 : i32
    %c0_i32_1 = arith.constant 0 : i32
    return %c0_i32, %c0_i32_0 : i32, i32
  }
  func.func @transform_3(%arg0: i32, %arg1: i32) -> (i32, i32) {
    %c0_i32 = arith.constant 0 : i32
    %c0_i32_0 = arith.constant 0 : i32
    %c0_i32_1 = arith.constant 0 : i32
    return %c0_i32, %c0_i32_0 : i32, i32
  }
  func.func @transform_4(%arg0: i32, %arg1: i32) -> (i32, i32) {
    %c0_i32 = arith.constant 0 : i32
    %c0_i32_0 = arith.constant 0 : i32
    %c0_i32_1 = arith.constant 0 : i32
    return %c0_i32, %c0_i32_0 : i32, i32
  }
  func.func @transform_5(%arg0: i32, %arg1: i32) -> (i32, i32) {
    %c0_i32 = arith.constant 0 : i32
    %c0_i32_0 = arith.constant 0 : i32
    %c0_i32_1 = arith.constant 0 : i32
    return %c0_i32, %c0_i32_0 : i32, i32
  }
  func.func @transform_6(%arg0: i32, %arg1: i32) -> (i32, i32, i32) {
    %c0_i32 = arith.constant 0 : i32
    %c0_i32_0 = arith.constant 0 : i32
    return %arg1, %arg0, %c0_i32 : i32, i32, i32
  }
  func.func @transform_7(%arg0: i32, %arg1: i32) -> (i32, i32, i32) {
    %c0_i32 = arith.constant 0 : i32
    %c0_i32_0 = arith.constant 0 : i32
    %c0_i32_1 = arith.constant 0 : i32
    return %c0_i32, %arg0, %c0_i32_0 : i32, i32, i32
  }
}

</mosaic_0001>

<bundles_post_ra>
// kernel: tpu_custom_call.1
= control target key start
LH: loop header
LB: loop body
LE: loop exit
PB: predicated region body
PF: predicated region fallthrough
CT: control target
= control target key end

     0   :  { %s4660_s0 = inlined_call_operand.hbm [shape: bf16[32,8,128], index: 0, kind: input, shape index: {}]   ;;  %s4661_s1 = inlined_call_operand.vmem [shape: s32[8,1], index: 1, kind: input, shape index: {}]   ;;  %s4662_s2 = inlined_call_operand.hbm [shape: bf16[128,384], index: 2, kind: input, shape index: {}]   ;;  %s4663_s3 = inlined_call_operand.hbm [shape: bf16[128,384], index: 3, kind: input, shape index: {}]   ;;  %s4664_s4 = inlined_call_operand.vmem [shape: f32[1,384], index: 4, kind: input, shape index: {}]   ;;  %s4665_s5 = inlined_call_operand.vmem [shape: f32[1,128], index: 5, kind: input, shape index: {}]   ;;  %s4666_s6 = inlined_call_operand.hbm [shape: f32[32,8,128], index: 6, kind: output, shape index: {0}]   ;;  %s4667_s7 = inlined_call_operand.hbm [shape: f32[1,8,128], index: 7, kind: output, shape index: {1}]  }
   0x1   :  { %4673 = sst [smem:[#allocation46_spill]] %s4662_s2 }
   0x2   :  { %4674 = sst [smem:[#allocation47_spill]] %s4663_s3 }
   0x3   :  { %4675 = sst [smem:[#allocation48_spill]] %s4667_s7 }
   0x4   :  { %13 = vsyncpa [#allocation4], 0 }
   0x5   :  { %15 = vsyncpa [#allocation4 + $0x1], 0 }
   0x6   :  { %16 = vsyncpa [#allocation7], 0 }
   0x7   :  { %17 = vsyncpa [#allocation5], 0 }
   0x8   :  { %19 = vsyncpa [#allocation5 + $0x1], 0 }
   0x9   :  { %20 = vsyncpa [#allocation11], 0  ;;  %s3637_s24 = smov 0   ;;  %s3639_s25 = smov 0  }
   0xa   :  { %s3641_s26 = smov 0   ;;  %s3643_s27 = smov 0  }
   0xb   :  { %s3645_s28 = smov 0   ;;  %s3647_s29 = smov 0  }
   0xc LB: > { %4676 = sst [smem:[#allocation16_spill]] %s3563_s24  ;;  %s2739_s30 = sadd.s32 4294967295, %s3583_s29   ;;  %s3583_s29 = sphi %s3647_s29, %s26_s29   ;;  %s3579_s28 = sphi %s3645_s28, %s4751_s28   ;;  %s3575_s27 = sphi %s3643_s27, %s4750_s27   ;;  %s3571_s26 = sphi %s3641_s26, %s4749_s26   ;;  %s3567_s25 = sphi %s3639_s25, %s4748_s25   ;;  %s3563_s24 = sphi %s3637_s24, %s4747_s24  }
   0xd   : > { %s2740_s8 = sadd.s32 4294967294, %s3583_s29   ;;  %p60_p0 = scmp.ne.s32.totalorder %s3567_s25, %s3563_s24 }
   0xe   : > { %p3671_p1 = scmp.eq.s32.totalorder %s2739_s30, 0  ;;  %p3675_p2 = scmp.eq.s32.totalorder %s2739_s30, 1 }
   0xf   : > { %p202_p3 = scmp.eq.s32.totalorder %s2740_s8, 1  ;;  %p2741_p5 = scmp.ge.s32.totalorder %s3583_s29, 1 }
  0x10   : > { %p3681_p4 = por %p3671_p1, %p60_p0  ;;  %p235_p7 = scmp.lt.s32.totalorder %s3583_s29, 3 }
  0x11   : > { %p3686_p6 = por %p202_p3, %p60_p0  ;;  %s4682_s2 = sld [smem:[#allocation46_spill]] }
  0x12   : > { %p3694_p8 = pnand %p2741_p5, %p235_p7  ;;  %s3585_s17 = smov [#allocation6]  }
  0x13   : > { %s4680_s12 = scalar_select %p3686_p6, 1, 0 }
  0x14   : > { %p3125_p9 = pneg %p3694_p8  ;;  %s255_s18 = sshll.u32 %s3585_s17, 4  ;;  %s256_s18 = int_to_ptr.vmem [resolvable:$true] %s255_s18 }
  0x15   : > { %4681 = sst [smem:[#allocation17_spill]] %s4680_s12  ;;  %p2745_p11 = scmp.ge.s32.totalorder %s3583_s29, 2 }
  0x16   : > { %p3126_p10 = pnand %p3125_p9, %p3671_p1  ;;  %s4684_s3 = sld [smem:[#allocation47_spill]] }
  0x17   : > { %s253_s15 = sshll.u32 %s4682_s2, 4  ;;  %s3586_s22 = smov 192   ;;  %s254_s15 = int_to_ptr.hbm [resolvable:$true] %s253_s15 }
  0x18   : > { %s3587_s23 = smov 12   ;;  %s3588_s30 = smov [#allocation8]  }
  0x19   : > { %3128 = dma.hbm_to_vmem [thread:$0]  (!%p3126_p10), %s254_s15, 3072, %s256_s18, [#allocation7], %s3586_s22, %s3586_s22, %s3587_s23  }
  0x1a   : > { %s269_s8 = sshll.u32 %s3588_s30, 4  ;;  %s35_s13 = sadd.s32 1, %s3579_s28  ;;  %s270_s8 = int_to_ptr.vmem [resolvable:$true] %s269_s8 }
  0x1b   : > { %s47_s14 = sadd.s32 1, %s3571_s26  ;;  %p36_p12 = scmp.ge.s32.totalorder %s35_s13, 2 }
  0x1c   : > { %s267_s21 = sshll.u32 %s4684_s3, 4  ;;  %p54_p13 = scmp.ne.s32.totalorder %s3571_s26, %s3567_s25  ;;  %s268_s21 = int_to_ptr.hbm [resolvable:$true] %s267_s21 }
  0x1d   : > { %3131 = dma.hbm_to_vmem [thread:$0]  (!%p3126_p10), %s268_s21, 3072, %s270_s8, [#allocation7], %s3586_s22, %s3586_s22, %s3587_s23  }
  0x1e   : > { %p55_p0 = scmp.eq.s32.totalorder %s3583_s29, 0  ;;  %p3142_p3 = scmp.lt.s32.totalorder %s3583_s29, 2 }
  0x1f   : > { %s4753_s13 = smov (%p36_p12, %s35_s13), 0  ;;  %p3720_p7 = por %p3675_p2, %p54_p13 }
  0x20   : > { %4685 = sst [smem:[#allocation18_spill]] %s4753_s13  ;;  %p3714_p5 = por %p55_p0, %p54_p13 }
  0x21   : > { %s42_s18 = ssub.s32 %s3579_s28, %s4753_s13  ;;  %s289_s19 = sand.u32 1, %s3571_s26  }
  0x22   : > { %p45_p9 = scmp.eq.s32.totalorder %s42_s18, 0  ;;  %s2746_s20 = sshll.u32 %s289_s19, 6 }
  0x23   : > { %s3051_s21 = sshll.u32 %s3579_s28, 6  ;;  %s293_s3 = scalar_lea.vmem [#allocation3], %s2746_s20 }
  0x24   : > { %s3729_s22 = scalar_select %p45_p9, %s3571_s26, %s47_s14  }
  0x25   : > { %s299_s8 = scalar_lea.hbm %s4660_s0, %s3051_s21  ;;  %s302_s12 = sshll.u32 %s293_s3, 4  ;;  %s303_s12 = int_to_ptr.vmem [resolvable:$true] %s302_s12 }
  0x26   : > { %s300_s2 = sshll.u32 %s299_s8, 4  ;;  %p3133_p10 = pnand %p3142_p3, %p3714_p5  ;;  %s301_s2 = int_to_ptr.hbm [resolvable:$true] %s300_s2 }
  0x27   : > { %s290_s24 = scalar_lea.sflag [#allocation4], %s289_s19  ;;  %s3589_s13 = smov 64  }
  0x28   : > { %s3590_s7 = smov 4   ;;  %314 = sbr.rel (%p3694_p8) target bundleno = 3106 (0xc22), region = 44 }
  0x29   : > { %3135 = dma.hbm_to_vmem [thread:$0]  (!%p3133_p10), %s301_s2, 1024, %s303_s12, %s290_s24, %s3589_s13, %s3589_s13, %s3590_s7  }
  0x2d   : > { %s3741_s14 = sand.u32 1, %s3567_s25  }
  0x2e   : > { %s2750_s18 = sshll.u32 %s3741_s14, 6  ;;  %s317_s3 = scalar_lea.sflag [#allocation4], %s3741_s14 }
  0x2f   : > { %s3745_s20 = scalar_lea.vmem [#allocation3], %s2750_s18 }
  0x30   : > { %3546 = dma.done.wait (%p3681_p4), %s317_s3, 1024  }
  0x31   : > { %3548 = vsyncadd (%p3681_p4), %s317_s3, 4294966272 }
  0x32   : > { %3550 = dma.done.wait (%p3671_p1), [#allocation7], 6144  }
  0x33   : > { %3552 = vsyncadd (%p3671_p1), [#allocation7], 4294961152  ;;  %s2753_s2 = sshll.u32 %s3741_s14, 7  ;;  %p2754_p8 = scmp.ne.s32.totalorder %s3575_s27, 0 }
  0x34   : > { %s3756_s7 = scalar_lea.vmem [#allocation9], %s2753_s2 }
  0x35   : > { %375 = sbr.rel (%p2754_p8) target bundleno = 60 (0x3c), region = 60 }
  0x3a   : > { %v3591_v0 = vmov 0.0  }
  0x3b   : > { %376 = vst [vmem:[#allocation2] sm:$0xff] %v3591_v0 }
  0x3c PF: > { %v2971_v1 = vld [vmem:[#allocation8 + $0xa8] sm:$0xf]  ;;  %v3106_v2 = vld [vmem:[#allocation8 + $0xb0] sm:$0xf0]  ;;  %v2959_v3 = vld [vmem:[#allocation8 + $0x90] sm:$0xf] }
  0x3d   : > { %v3759_v4 = vor.u32 %v3106_v2, %v2971_v1  ;;  %v3103_v5 = vld [vmem:[#allocation8 + $0x98] sm:$0xf0]  ;;  %v2873_v7 = vld [vmem:[#allocation6 + $0xa8] sm:$0xf]  ;;  %v3082_v8 = vld [vmem:[#allocation6 + $0xb0] sm:$0xf0] }
  0x3e   : > { %v3762_v6 = vor.u32 %v3103_v5, %v2959_v3  ;;  %v2947_v9 = vld [vmem:[#allocation8 + $0x78] sm:$0xf]  ;;  %v3100_v10 = vld [vmem:[#allocation8 + $0x80] sm:$0xf0]  ;;  %v2874_v11 = vor.u32 %v3082_v8, %v2873_v7  ;;  %v2861_v12 = vld [vmem:[#allocation6 + $0x90] sm:$0xf] }
  0x3f   : > { %928 = vmatpush.bf16.msra.mxu3 %v3759_v4  ;;  %v3079_v13 = vld [vmem:[#allocation6 + $0x98] sm:$0xf0]  ;;  %v3765_v15 = vor.u32 %v3100_v10, %v2947_v9  ;;  %v2849_v16 = vld [vmem:[#allocation6 + $0x78] sm:$0xf]  ;;  %v3076_v17 = vld [vmem:[#allocation6 + $0x80] sm:$0xf0] }
  0x40   : > { %609 = vmatpush.bf16.msra.mxu0 %v2874_v11  ;;  %v2862_v14 = vor.u32 %v3079_v13, %v2861_v12  ;;  %v2935_v18 = vld [vmem:[#allocation8 + $0x60] sm:$0xf]  ;;  %v3097_v19 = vld [vmem:[#allocation8 + $0x68] sm:$0xf0]  ;;  %v2875_v21 = vld [vmem:[#allocation6 + $0xb4] sm:$0xf0]  ;;  %v2850_v22 = vor.u32 %v3076_v17, %v2849_v16 }
  0x41   : > { %v3081_v20 = vld [vmem:[#allocation6 + $0xac] sm:$0xf]  ;;  %v2837_v23 = vld [vmem:[#allocation6 + $0x60] sm:$0xf]  ;;  %v3768_v25 = vor.u32 %v3097_v19, %v2935_v18  ;;  %v3078_v27 = vld [vmem:[#allocation6 + $0x94] sm:$0xf] }
  0x42   : > { %v2878_v24 = vor.u32 %v3081_v20, %v2875_v21  ;;  %v3073_v26 = vld [vmem:[#allocation6 + $0x68] sm:$0xf0]  ;;  %v2863_v28 = vld [vmem:[#allocation6 + $0x9c] sm:$0xf0]  ;;  %v2923_v29 = vld [vmem:[#allocation8 + $0x48] sm:$0xf] }
  0x43   : > { %929 = vmatpush.bf16.msra.mxu3 %v3762_v6  ;;  %v3094_v30 = vld [vmem:[#allocation8 + $0x50] sm:$0xf0]  ;;  %v2866_v31 = vor.u32 %v3078_v27, %v2863_v28  ;;  %v3075_v32 = vld [vmem:[#allocation6 + $0x7c] sm:$0xf]  ;;  %v2851_v33 = vld [vmem:[#allocation6 + $0x84] sm:$0xf0]  ;;  %v2838_v34 = vor.u32 %v3073_v26, %v2837_v23 }
  0x44   : > { %610 = vmatpush.bf16.msra.mxu0 %v2862_v14  ;;  %658 = vmatpush.bf16.msra.mxu1 %v2878_v24  ;;  %v3771_v35 = vor.u32 %v3094_v30, %v2923_v29  ;;  %v2825_v36 = vld [vmem:[#allocation6 + $0x48] sm:$0xf]  ;;  %v3070_v37 = vld [vmem:[#allocation6 + $0x50] sm:$0xf0]  ;;  %v2911_v38 = vld [vmem:[#allocation8 + $0x30] sm:$0xf]  ;;  %v2854_v40 = vor.u32 %v3075_v32, %v2851_v33 }
  0x45   : > { %v3091_v39 = vld [vmem:[#allocation8 + $0x38] sm:$0xf0]  ;;  %v3072_v41 = vld [vmem:[#allocation6 + $0x64] sm:$0xf]  ;;  %v2839_v42 = vld [vmem:[#allocation6 + $0x6c] sm:$0xf0]  ;;  %v2826_v44 = vor.u32 %v3070_v37, %v2825_v36 }
  0x46   : > { %v2899_v43 = vld [vmem:[#allocation8 + $0x18] sm:$0xf]  ;;  %v3774_v45 = vor.u32 %v3091_v39, %v2911_v38  ;;  %v2813_v46 = vld [vmem:[#allocation6 + $0x30] sm:$0xf]  ;;  %v3067_v47 = vld [vmem:[#allocation6 + $0x38] sm:$0xf0]  ;;  %v2842_v49 = vor.u32 %v3072_v41, %v2839_v42 }
  0x47   : > { %930 = vmatpush.bf16.msra.mxu3 %v3765_v15  ;;  %v3088_v48 = vld [vmem:[#allocation8 + $0x20] sm:$0xf0]  ;;  %v2881_v50 = vld [vmem:[#allocation6 + $0xb0] sm:$0xf]  ;;  %v3083_v51 = vld [vmem:[#allocation6 + $0xb8] sm:$0xf0]  ;;  %v2814_v56 = vor.u32 %v3067_v47, %v2813_v46 }
  0x48   : > { %611 = vmatpush.bf16.msra.mxu0 %v2850_v22  ;;  %659 = vmatpush.bf16.msra.mxu1 %v2866_v31  ;;  %v3069_v52 = vld [vmem:[#allocation6 + $0x4c] sm:$0xf]  ;;  %v2827_v53 = vld [vmem:[#allocation6 + $0x54] sm:$0xf0]  ;;  %v2882_v54 = vor.u32 %v3083_v51, %v2881_v50  ;;  %v2887_v55 = vld [vmem:[#allocation8] sm:$0xf]  ;;  %v3777_v57 = vor.u32 %v3088_v48, %v2899_v43 }
  0x49   : > { %v3085_v58 = vld [vmem:[#allocation8 + $0x8] sm:$0xf0]  ;;  %v2801_v59 = vld [vmem:[#allocation6 + $0x18] sm:$0xf]  ;;  %v3064_v60 = vld [vmem:[#allocation6 + $0x20] sm:$0xf0]  ;;  %v2830_v62 = vor.u32 %v3069_v52, %v2827_v53 }
  0x4a   : > { %707 = vmatpush.bf16.msra.mxu2 %v2882_v54  ;;  %v3105_v61 = vld [vmem:[#allocation8 + $0xac] sm:$0xf]  ;;  %v2869_v63 = vld [vmem:[#allocation6 + $0x98] sm:$0xf]  ;;  %v3080_v0 = vld [vmem:[#allocation6 + $0xa0] sm:$0xf0]  ;;  %v2802_v7 = vor.u32 %v3064_v60, %v2801_v59  ;;  %v3780_v8 = vor.u32 %v3085_v58, %v2887_v55 }
  0x4b   : > { %931 = vmatpush.bf16.msra.mxu3 %v3768_v25  ;;  %v2973_v1 = vld [vmem:[#allocation8 + $0xb4] sm:$0xf0]  ;;  %v3066_v2 = vld [vmem:[#allocation6 + $0x34] sm:$0xf]  ;;  %v2815_v3 = vld [vmem:[#allocation6 + $0x3c] sm:$0xf0]  ;;  %v2870_v5 = vor.u32 %v3080_v0, %v2869_v63 }
  0x4c   : > { %612 = vmatpush.bf16.msra.mxu0 %v2838_v34  ;;  %660 = vmatpush.bf16.msra.mxu1 %v2854_v40  ;;  %v3782_v9 = vld [vmem:[#allocation2] sm:$0xff]  ;;  %v2789_v10 = vld [vmem:[#allocation6] sm:$0xf]  ;;  %v3061_v11 = vld [vmem:[#allocation6 + $0x8] sm:$0xf0]  ;;  %v3784_v12 = vor.u32 %v3105_v61, %v2973_v1  ;;  %v2818_v14 = vor.u32 %v3066_v2, %v2815_v3  ;;  %s3831_s24 = sshll.u32 %s3575_s27, 4 }
  0x4d   : > { %v3102_v13 = vld [vmem:[#allocation8 + $0x94] sm:$0xf]  ;;  %v2857_v16 = vld [vmem:[#allocation6 + $0x80] sm:$0xf]  ;;  %v3077_v17 = vld [vmem:[#allocation6 + $0x88] sm:$0xf0]  ;;  %v3788_v22 = vpack.c.bf16 %v3782_v9, %v3782_v9  ;;  %v2790_v23 = vor.u32 %v3061_v11, %v2789_v10 }
  0x4e   : > { %708 = vmatpush.bf16.msra.mxu2 %v2870_v5  ;;  %v2961_v18 = vld [vmem:[#allocation8 + $0x9c] sm:$0xf0]  ;;  %v3063_v19 = vld [vmem:[#allocation6 + $0x1c] sm:$0xf]  ;;  %v2803_v20 = vld [vmem:[#allocation6 + $0x24] sm:$0xf0]  ;;  %v2858_v21 = vor.u32 %v3077_v17, %v2857_v16 }
  0x4f   : > { %932 = vmatpush.bf16.msra.mxu3 %v3771_v35  ;;  %v3099_v24 = vld [vmem:[#allocation8 + $0x7c] sm:$0xf]  ;;  %v3792_v26 = vor.u32 %v3102_v13, %v2961_v18  ;;  %v2949_v27 = vld [vmem:[#allocation8 + $0x84] sm:$0xf0]  ;;  %v2806_v28 = vor.u32 %v3063_v19, %v2803_v20  ;;  %v3074_v30 = vld [vmem:[#allocation6 + $0x70] sm:$0xf0] }
  0x50   : > { %613 = vmatpush.bf16.msra.mxu0 %v2826_v44  ;;  %661 = vmatpush.bf16.msra.mxu1 %v2842_v49  ;;  %v2845_v29 = vld [vmem:[#allocation6 + $0x68] sm:$0xf]  ;;  %v3795_v31 = vld [vmem:[%s3745_s20] sm:$0xff]  ;;  %v2791_v33 = vld [vmem:[#allocation6 + $0xc] sm:$0xf0]  ;;  %v3800_v37 = vor.u32 %v3099_v24, %v2949_v27  ;;  %s1024_s12 = sadd.s32 1, %s3831_s24 }
  0x51   : > { %v3060_v32 = vld [vmem:[#allocation6 + $0x4] sm:$0xf]  ;;  %v2846_v34 = vor.u32 %v3074_v30, %v2845_v29  ;;  %v2979_v36 = vld [vmem:[#allocation8 + $0xb0] sm:$0xf]  ;;  %v3107_v38 = vld [vmem:[#allocation8 + $0xb8] sm:$0xf0] }
  0x52   : > { %709 = vmatpush.bf16.msra.mxu2 %v2858_v21  ;;  %v2794_v39 = vor.u32 %v3060_v32, %v2791_v33  ;;  %v2833_v40 = vld [vmem:[#allocation6 + $0x50] sm:$0xf]  ;;  %v3071_v41 = vld [vmem:[#allocation6 + $0x58] sm:$0xf0]  ;;  %v3096_v42 = vld [vmem:[#allocation8 + $0x64] sm:$0xf]  ;;  %v3803_v46 = vor.u32 %v3107_v38, %v2979_v36  ;;  %v1025_v36 = vstv %s1024_s12 }
  0x53   : > { %933 = vmatpush.bf16.msra.mxu3 %v3774_v45  ;;  %v2937_v43 = vld [vmem:[#allocation8 + $0x6c] sm:$0xf0]  ;;  %v2834_v44 = vor.u32 %v3071_v41, %v2833_v40  ;;  %v2967_v47 = vld [vmem:[#allocation8 + $0x98] sm:$0xf]  ;;  %v3104_v49 = vld [vmem:[#allocation8 + $0xa0] sm:$0xf0] }
  0x54   : > { %614 = vmatpush.bf16.msra.mxu0 %v2814_v56  ;;  %662 = vmatpush.bf16.msra.mxu1 %v2830_v62  ;;  %v3807_v48 = vor.u32 %v3096_v42, %v2937_v43  ;;  %v2821_v50 = vld [vmem:[#allocation6 + $0x38] sm:$0xf]  ;;  %v3068_v51 = vld [vmem:[#allocation6 + $0x40] sm:$0xf0]  ;;  %v3093_v52 = vld [vmem:[#allocation8 + $0x4c] sm:$0xf]  ;;  %v3810_v55 = vor.u32 %v3104_v49, %v2967_v47 }
  0x55   : > { %v2925_v53 = vld [vmem:[#allocation8 + $0x54] sm:$0xf0]  ;;  %v2822_v54 = vor.u32 %v3068_v51, %v2821_v50  ;;  %v2955_v56 = vld [vmem:[#allocation8 + $0x80] sm:$0xf]  ;;  %v3101_v59 = vld [vmem:[#allocation8 + $0x88] sm:$0xf0] }
  0x56   : > { %710 = vmatpush.bf16.msra.mxu2 %v2846_v34  ;;  %v3814_v58 = vor.u32 %v3093_v52, %v2925_v53  ;;  %v2809_v60 = vld [vmem:[#allocation6 + $0x20] sm:$0xf]  ;;  %v3065_v61 = vld [vmem:[#allocation6 + $0x28] sm:$0xf0]  ;;  %v3090_v62 = vld [vmem:[#allocation8 + $0x34] sm:$0xf]  ;;  %v3818_v1 = vor.u32 %v3101_v59, %v2955_v56 }
  0x57   : > { %934 = vmatpush.bf16.msra.mxu3 %v3777_v57  ;;  %v2913_v63 = vld [vmem:[#allocation8 + $0x3c] sm:$0xf0]  ;;  %v2810_v0 = vor.u32 %v3065_v61, %v2809_v60  ;;  %v2943_v2 = vld [vmem:[#allocation8 + $0x68] sm:$0xf]  ;;  %v3098_v5 = vld [vmem:[#allocation8 + $0x70] sm:$0xf0] }
  0x58   : > { %615 = vmatpush.bf16.msra.mxu0 %v2802_v7  ;;  %663 = vmatpush.bf16.msra.mxu1 %v2818_v14  ;;  %v3821_v3 = vor.u32 %v3090_v62, %v2913_v63  ;;  %v2797_v7 = vld [vmem:[#allocation6 + $0x8] sm:$0xf]  ;;  %v3062_v10 = vld [vmem:[#allocation6 + $0x10] sm:$0xf0]  ;;  %v3087_v11 = vld [vmem:[#allocation8 + $0x1c] sm:$0xf]  ;;  %v3825_v16 = vor.u32 %v3098_v5, %v2943_v2 }
  0x59   : > { %v2901_v13 = vld [vmem:[#allocation8 + $0x24] sm:$0xf0]  ;;  %v2798_v14 = vor.u32 %v3062_v10, %v2797_v7  ;;  %v2931_v18 = vld [vmem:[#allocation8 + $0x50] sm:$0xf]  ;;  %v3095_v19 = vld [vmem:[#allocation8 + $0x58] sm:$0xf0] }
  0x5a   : > { %711 = vmatpush.bf16.msra.mxu2 %v2834_v44  ;;  %v3828_v17 = vor.u32 %v3087_v11, %v2901_v13  ;;  %v3084_v20 = vld [vmem:[#allocation8 + $0x4] sm:$0xf]  ;;  %v2889_v21 = vld [vmem:[#allocation8 + $0xc] sm:$0xf0]  ;;  %v3837_v24 = vor.u32 %v3095_v19, %v2931_v18  ;;  %v3842_v27 = vld [vmem:[%s4661_s1] sm:$0xff]  ;;  %v4671_v32 = vmov 0.0  }
  0x5b   : > { %935 = vmatpush.bf16.msra.mxu3 %v3780_v8  ;;  %v3846_v29 = vor.u32 %v3084_v20, %v2889_v21  ;;  %v2919_v30 = vld [vmem:[#allocation8 + $0x38] sm:$0xf]  ;;  %v2907_v38 = vld [vmem:[#allocation8 + $0x20] sm:$0xf]  ;;  %vm1026_vm1 = vcmp.lt.s32.totalorder %v1025_v36, %v3842_v27  ;;  %s1539_s16 = sadd.s32 6, %s3831_s24  ;;  %v3053_v47 = vld [vmem:[%s3745_s20 + $0x8] sm:$0xff] }
  0x5c   : > { %616 = vmatpush.bf16.msra.mxu0 %v2790_v23  ;;  %664 = vmatpush.bf16.msra.mxu1 %v2806_v28  ;;  %v3592_v23 = vmov 0   ;;  %v795_v28 = vstv %s3831_s24  ;;  %v2983_v40 = vsel %vm1026_vm1, 1.0, %v4671_v32  ;;  %v2895_v42 = vld [vmem:[#allocation8 + $0x8] sm:$0xf]  ;;  %v3086_v43 = vld [vmem:[#allocation8 + $0x10] sm:$0xf0]  ;;  %v1540_v44 = vstv %s1539_s16 }
  0x5d   : > { %3208 = vset.pattern.permute.xlu0 %v3592_v23  ;;  %3209 = vset.pattern.permute.xlu1 %v3592_v23  ;;  %vm796_vm0 = vcmp.lt.s32.totalorder %v795_v28, %v3842_v27  ;;  %v3873_v49 = vor.u32 %v3086_v43, %v2895_v42  ;;  %vm1541_vm2 = vcmp.lt.s32.totalorder %v1540_v44, %v3842_v27  ;;  %s1848_s13 = sadd.s32 9, %s3831_s24  ;;  %s2157_s17 = sadd.s32 12, %s3831_s24  ;;  %v3054_v53 = vld [vmem:[%s3745_s20 + $0x10] sm:$0xff]  ;;  %v3055_v61 = vld [vmem:[%s3745_s20 + $0x18] sm:$0xff]  ;;  %v3057_v5 = vld [vmem:[%s3745_s20 + $0x28] sm:$0xff] }
  0x5e   : > { %936 = vmatmul.bf16.vlgmr.msra.gmra.mxu3 %v3788_v22  ;;  %712 = vmatpush.bf16.msra.mxu2 %v2822_v54  ;;  %v2884_v33 = vsel %vm796_vm0, 1.0, %v4671_v32  ;;  %v3003_v50 = vsel %vm1541_vm2, 1.0, %v4671_v32  ;;  %v1849_v51 = vstv %s1848_s13  ;;  %v2158_v54 = vstv %s2157_s17  ;;  %s2466_s19 = sadd.s32 15, %s3831_s24  ;;  %v425_v62 = vld [vmem:[%s4664_s4] sm:$0x7]  ;;  %s1127_s18 = sadd.s32 2, %s3831_s24 }
  0x5f   : > { %941 = vmatpush.bf16.msrb.mxu3 %v3784_v12  ;;  %617 = vmatmul.bf16.vlgmr.msra.gmra.mxu0 %v3795_v31  ;;  %vm1850_vm3 = vcmp.lt.s32.totalorder %v1849_v51, %v3842_v27  ;;  %vm2159_vm4 = vcmp.lt.s32.totalorder %v2158_v54, %v3842_v27  ;;  %v2467_v59 = vstv %s2466_s19  ;;  %v3948_v18 = vperm.slane %v425_v62, 1  ;;  %s1230_s3 = sadd.s32 3, %s3831_s24  ;;  %s1951_s2 = sadd.s32 10, %s3831_s24 }
  0x60   : > { %1043 = vmatpush.bf16.msrb.mxu0 %v3784_v12  ;;  %665 = vmatpush.bf16.msra.mxu1 %v2794_v39  ;;  %v3089_v39 = vld [vmem:[#allocation8 + $0x28] sm:$0xf0]  ;;  %v3015_v52 = vsel %vm1850_vm3, 1.0, %v4671_v32  ;;  %v3027_v56 = vsel %vm2159_vm4, 1.0, %v4671_v32  ;;  %vm2468_vm5 = vcmp.lt.s32.totalorder %v2467_v59, %v3842_v27  ;;  %v3952_v54 = vperm.slane %v425_v62, 2  ;;  %s2260_s9 = sadd.s32 13, %s3831_s24 }
  0x61   : > { %3210 = vset.pattern.permute.xlu2 %v3592_v23  ;;  %1016 = vperm.xlu0 %3208, %v2884_v33   ;;  %v3865_v41 = vor.u32 %v3089_v39, %v2907_v38  ;;  %v3039_v60 = vsel %vm2468_vm5, 1.0, %v4671_v32  ;;  %v3059_v33 = vld [vmem:[%s3745_s20 + $0x38] sm:$0xff]  ;;  %s1333_s11 = sadd.s32 4, %s3831_s24  ;;  %s1436_s12 = sadd.s32 5, %s3831_s24 }
  0x62   : > { %713 = vmatpush.bf16.msra.mxu2 %v2810_v0  ;;  %v3943_v0 = vperm.slane %v425_v62, 0  ;;  %s1745_s17 = sadd.s32 8, %s3831_s24  ;;  %s2054_s19 = sadd.s32 11, %s3831_s24 }
  0x63   : > { %942 = vmatpush.bf16.msrb.mxu3 %v3792_v26  ;;  %666 = vmatmul.bf16.vlgmr.msra.gmra.mxu1 %v3795_v31  ;;  %s2363_s21 = sadd.s32 14, %s3831_s24  ;;  %p3043_p1 = scmp.ne.s32.totalorder %s3575_s27, 1 }
  0x64   : > { %1044 = vmatpush.bf16.msrb.mxu0 %v3792_v26  ;;  %1056 = vmatpush.bf16.msrb.mxu1 %v3803_v46 }
  0x66   : > { %714 = vmatpush.bf16.msra.mxu2 %v2798_v14  ;;  %v3058_v14 = vld [vmem:[%s3745_s20 + $0x30] sm:$0xff] }
  0x67   : > { %943 = vmatpush.bf16.msrb.mxu3 %v3800_v37 }
  0x68   : > { %1045 = vmatpush.bf16.msrb.mxu0 %v3800_v37  ;;  %1057 = vmatpush.bf16.msrb.mxu1 %v3810_v55 }
  0x69   : > { %715 = vmatmul.bf16.vlgmr.msra.gmra.mxu2 %v3795_v31  ;;  %v3092_v31 = vld [vmem:[#allocation8 + $0x40] sm:$0xf0]  ;;  %1118 = vperm.xlu0 %3208, %v2983_v40  }
  0x6a   : > { %1133 = vmatpush.bf16.msrb.mxu2 %v3759_v4  ;;  %v3855_v34 = vor.u32 %v3092_v31, %v2919_v30 }
  0x6b   : > { %944 = vmatpush.bf16.msrb.mxu3 %v3807_v48 }
  0x6c   : > { %1046 = vmatpush.bf16.msrb.mxu0 %v3807_v48  ;;  %1058 = vmatpush.bf16.msrb.mxu1 %v3818_v1 }
  0x6e   : > { %1134 = vmatpush.bf16.msrb.mxu2 %v3762_v6 }
  0x6f   : > { %945 = vmatpush.bf16.msrb.mxu3 %v3814_v58  ;;  %622 = vmatmul.bf16.gmra.mxu0 %v3053_v47 }
  0x70   : > { %1047 = vmatpush.bf16.msrb.mxu0 %v3814_v58  ;;  %1059 = vmatpush.bf16.msrb.mxu1 %v3825_v16 }
  0x71   : > { %1633 = vperm.xlu0 %3208, %v3003_v50  }
  0x72   : > { %1135 = vmatpush.bf16.msrb.mxu2 %v3765_v15 }
  0x73   : > { %946 = vmatpush.bf16.msrb.mxu3 %v3821_v3  ;;  %671 = vmatmul.bf16.gmra.mxu1 %v3053_v47 }
  0x74   : > { %1048 = vmatpush.bf16.msrb.mxu0 %v3821_v3  ;;  %1060 = vmatpush.bf16.msrb.mxu1 %v3837_v24 }
  0x76   : > { %1136 = vmatpush.bf16.msrb.mxu2 %v3768_v25 }
  0x77   : > { %947 = vmatpush.bf16.msrb.mxu3 %v3828_v17 }
  0x78   : > { %1049 = vmatpush.bf16.msrb.mxu0 %v3828_v17  ;;  %1061 = vmatpush.bf16.msrb.mxu1 %v3855_v34 }
  0x79   : > { %720 = vmatmul.bf16.gmra.mxu2 %v3053_v47  ;;  %1942 = vperm.xlu0 %3208, %v3015_v52  }
  0x7a   : > { %1137 = vmatpush.bf16.msrb.mxu2 %v3771_v35 }
  0x7b   : > { %948 = vmatpush.bf16.msrb.mxu3 %v3846_v29 }
  0x7c   : > { %1050 = vmatpush.bf16.msrb.mxu0 %v3846_v29  ;;  %1062 = vmatpush.bf16.msrb.mxu1 %v3865_v41 }
  0x7e   : > { %949 = vmatmul.bf16.vlgmr.msrb.gmra.mxu3 %v3788_v22  ;;  %1138 = vmatpush.bf16.msrb.mxu2 %v3774_v45 }
  0x7f   : > { %954 = vmatpush.bf16.msra.mxu3 %v3803_v46  ;;  %627 = vmatmul.bf16.gmra.mxu0 %v3054_v53 }
  0x80   : > { %1159 = vmatpush.bf16.msra.mxu0 %v3803_v46  ;;  %1063 = vmatpush.bf16.msrb.mxu1 %v3873_v49 }
  0x81   : > { %2251 = vperm.xlu0 %3208, %v3027_v56   ;;  %v3957_v56 = vld [vmem:[%s4665_s5] ss:$0 sm:$0xff] }
  0x82   : > { %1139 = vmatpush.bf16.msrb.mxu2 %v3777_v57 }
  0x83   : > { %955 = vmatpush.bf16.msra.mxu3 %v3810_v55  ;;  %676 = vmatmul.bf16.gmra.mxu1 %v3054_v53 }
  0x84   : > { %1160 = vmatpush.bf16.msra.mxu0 %v3810_v55  ;;  %1236 = vmatpush.bf16.msra.mxu1 %v3759_v4 }
  0x86   : > { %1140 = vmatpush.bf16.msrb.mxu2 %v3780_v8 }
  0x87   : > { %956 = vmatpush.bf16.msra.mxu3 %v3818_v1 }
  0x88   : > { %1161 = vmatpush.bf16.msra.mxu0 %v3818_v1  ;;  %1237 = vmatpush.bf16.msra.mxu1 %v3762_v6 }
  0x89   : > { %725 = vmatmul.bf16.gmra.mxu2 %v3054_v53  ;;  %2560 = vperm.xlu0 %3208, %v3039_v60  }
  0x8a   : > { %1249 = vmatpush.bf16.msra.mxu2 %v3784_v12 }
  0x8b   : > { %957 = vmatpush.bf16.msra.mxu3 %v3825_v16 }
  0x8c   : > { %1162 = vmatpush.bf16.msra.mxu0 %v3825_v16  ;;  %1238 = vmatpush.bf16.msra.mxu1 %v3765_v15 }
  0x8e   : > { %1250 = vmatpush.bf16.msra.mxu2 %v3792_v26 }
  0x8f   : > { %958 = vmatpush.bf16.msra.mxu3 %v3837_v24  ;;  %632 = vmatmul.bf16.gmra.mxu0 %v3055_v61 }
  0x90   : > { %1163 = vmatpush.bf16.msra.mxu0 %v3837_v24  ;;  %1239 = vmatpush.bf16.msra.mxu1 %v3768_v25 }
  0x92   : > { %1251 = vmatpush.bf16.msra.mxu2 %v3800_v37 }
  0x93   : > { %959 = vmatpush.bf16.msra.mxu3 %v3855_v34  ;;  %681 = vmatmul.bf16.gmra.mxu1 %v3055_v61 }
  0x94   : > { %1164 = vmatpush.bf16.msra.mxu0 %v3855_v34  ;;  %1240 = vmatpush.bf16.msra.mxu1 %v3771_v35 }
  0x96   : > { %1252 = vmatpush.bf16.msra.mxu2 %v3807_v48 }
  0x97   : > { %960 = vmatpush.bf16.msra.mxu3 %v3865_v41 }
  0x98   : > { %1165 = vmatpush.bf16.msra.mxu0 %v3865_v41  ;;  %1241 = vmatpush.bf16.msra.mxu1 %v3774_v45 }
  0x99   : > { %730 = vmatmul.bf16.gmra.mxu2 %v3055_v61 }
  0x9a   : > { %1253 = vmatpush.bf16.msra.mxu2 %v3814_v58 }
  0x9b   : > { %961 = vmatpush.bf16.msra.mxu3 %v3873_v49 }
  0x9c   : > { %1166 = vmatpush.bf16.msra.mxu0 %v3873_v49  ;;  %1242 = vmatpush.bf16.msra.mxu1 %v3777_v57 }
  0x9e   : > { %962 = vmatmul.bf16.vlgmr.msra.gmra.mxu3 %v3788_v22  ;;  %1254 = vmatpush.bf16.msra.mxu2 %v3821_v3  ;;  %v3056_v22 = vld [vmem:[%s3745_s20 + $0x20] sm:$0xff]  ;;  %s1642_s20 = sadd.s32 7, %s3831_s24 }
  0x9f   : > { %1030 = vmatpush.bf16.msrb.mxu3 %v3759_v4  ;;  %637 = vmatmul.bf16.gmra.mxu0 %v3056_v22 }
  0xa0   : > { %1243 = vmatpush.bf16.msra.mxu1 %v3780_v8 }
  0xa2   : > { %1255 = vmatpush.bf16.msra.mxu2 %v3828_v17 }
  0xa3   : > { %1031 = vmatpush.bf16.msrb.mxu3 %v3762_v6  ;;  %686 = vmatmul.bf16.gmra.mxu1 %v3056_v22 }
  0xa6   : > { %1256 = vmatpush.bf16.msra.mxu2 %v3846_v29 }
  0xa7   : > { %1032 = vmatpush.bf16.msrb.mxu3 %v3765_v15 }
  0xa9   : > { %735 = vmatmul.bf16.gmra.mxu2 %v3056_v22 }
  0xab   : > { %1033 = vmatpush.bf16.msrb.mxu3 %v3768_v25 }
  0xaf   : > { %1034 = vmatpush.bf16.msrb.mxu3 %v3771_v35  ;;  %642 = vmatmul.bf16.gmra.mxu0 %v3057_v5 }
  0xb3   : > { %1035 = vmatpush.bf16.msrb.mxu3 %v3774_v45  ;;  %691 = vmatmul.bf16.gmra.mxu1 %v3057_v5 }
  0xb7   : > { %1036 = vmatpush.bf16.msrb.mxu3 %v3777_v57 }
  0xb9   : > { %740 = vmatmul.bf16.gmra.mxu2 %v3057_v5 }
  0xbb   : > { %1037 = vmatpush.bf16.msrb.mxu3 %v3780_v8 }
  0xbf   : > { %1146 = vmatpush.bf16.msra.mxu3 %v3784_v12  ;;  %647 = vmatmul.bf16.gmra.mxu0 %v3058_v14 }
  0xc3   : > { %1147 = vmatpush.bf16.msra.mxu3 %v3792_v26  ;;  %696 = vmatmul.bf16.gmra.mxu1 %v3058_v14 }
  0xc7   : > { %1148 = vmatpush.bf16.msra.mxu3 %v3800_v37 }
  0xc9   : > { %745 = vmatmul.bf16.gmra.mxu2 %v3058_v14 }
  0xcb   : > { %1149 = vmatpush.bf16.msra.mxu3 %v3807_v48 }
  0xcf   : > { %1150 = vmatpush.bf16.msra.mxu3 %v3814_v58  ;;  %652 = vmatmul.bf16.gmra.mxu0 %v3059_v33 }
  0xd3   : > { %1151 = vmatpush.bf16.msra.mxu3 %v3821_v3  ;;  %701 = vmatmul.bf16.gmra.mxu1 %v3059_v33 }
  0xd7   : > { %1152 = vmatpush.bf16.msra.mxu3 %v3828_v17 }
  0xd9   : > { %750 = vmatmul.bf16.gmra.mxu2 %v3059_v33 }
  0xdb   : > { %1153 = vmatpush.bf16.msra.mxu3 %v3846_v29 }
  0xdc   : > { %v618_v2 = vpop.f32.mrf.mxu0 }
  0xdd   : > { %v619_v7 = vadd.f32 %v618_v2, %v3943_v0 }
  0xe0   : > { %v667_v19 = vpop.f32.mrf.mxu1 }
  0xe1   : > { %v937_v63 = vpop.f32.mrf.mxu3  ;;  %v668_v21 = vadd.f32 %v667_v19, %v3948_v18 }
  0xe2   : > { %v967_v11 = vadd.f32 %v937_v63, %v619_v7 }
  0xe4   : > { %v2981_v13 = vmul.f32 -1.442695, %v967_v11  ;;  %v3961_v62 = vpop.f32.mrf.mxu0 }
  0xe6   : > { %3212 = vpow2.f32 %v2981_v13 }
  0xe8   : > { %v3963_v14 = vpop.f32.mrf.mxu1 }
  0xe9   : > { %v939_v10 = vpop.f32.mrf.mxu3 }
  0xec   : > { %v3213_v20 = vpop.eup %3212  ;;  %v716_v22 = vpop.f32.mrf.mxu2 }
  0xed   : > { %v971_v23 = vadd.f32 1.0, %v3213_v20  ;;  %v717_v2 = vadd.f32 %v716_v22, %v3952_v54  ;;  %v3965_v33 = vpop.f32.mrf.mxu0 }
  0xef   : > { %3214 = vrcp.f32 %v971_v23  ;;  %vm977_vm6 = vweird.f32 %v971_v23  ;;  %v983_v50 = vand.u32 2147483648, %v971_v23  ;;  %v981_v52 = vand.u32 2147483647, %v971_v23 }
  0xf1   : > { %v984_v59 = vor.u32 1.1754944e-38, %v983_v50  ;;  %vm982_vm9 = vcmp.eq.f32.partialorder %v981_v52, 8.507059e+37 }
  0xf5   : > { %v3215_v38 = vpop.eup %3214  ;;  %v3972_v52 = vpop.f32.mrf.mxu0 }
  0xf6   : > { %v973_v42 = vmul.f32 %v3215_v38, %v971_v23  ;;  %vm978_vm7 = vweird.f32 %v3215_v38 }
  0xf7   : > { %vm979_vm8 = vmor %vm977_vm6, %vm978_vm7 }
  0xf8   : > { %v974_v43 = vsub.f32 1.0, %v973_v42 }
  0xfa   : > { %v975_v44 = vmul.f32 %v3215_v38, %v974_v43 }
  0xfc   : > { %v976_v51 = vadd.f32 %v3215_v38, %v975_v44  ;;  %v1017_v44 = vpop.permute.xlu0 %1016 }
  0xfe   : > { %v980_v60 = vsel %vm979_vm8, %v3215_v38, %v976_v51  ;;  %v3968_v38 = vpop.f32.mrf.mxu1 }
  0xff   : > { %v985_v7 = vsel %vm982_vm9, %v984_v59, %v980_v60  ;;  %v3984_v60 = vpop.f32.mrf.mxu0 }
 0x101   : > { %v950_v28 = vpop.f32.mrf.mxu3 }
 0x102   : > { %v987_v30 = vadd.f32 %v950_v28, %v668_v21 }
 0x104   : > { %v2982_v31 = vmul.f32 -1.442695, %v987_v30 }
 0x106   : > { %3216 = vpow2.f32 %v2982_v31 }
 0x109   : > { %v952_v36 = vpop.f32.mrf.mxu3 }
 0x10c   : > { %v3217_v39 = vpop.eup %3216 }
 0x10d   : > { %v991_v40 = vadd.f32 1.0, %v3217_v39 }
 0x10f   : > { %3218 = vrcp.f32 %v991_v40  ;;  %vm997_vm10 = vweird.f32 %v991_v40  ;;  %v1003_v19 = vand.u32 2147483648, %v991_v40  ;;  %v1001_v21 = vand.u32 2147483647, %v991_v40 }
 0x111   : > { %v1004_v28 = vor.u32 1.1754944e-38, %v1003_v19  ;;  %vm1002_vm13 = vcmp.eq.f32.partialorder %v1001_v21, 8.507059e+37 }
 0x115   : > { %v3219_v47 = vpop.eup %3218 }
 0x116   : > { %v993_v53 = vmul.f32 %v3219_v47, %v991_v40  ;;  %vm998_vm11 = vweird.f32 %v3219_v47 }
 0x117   : > { %vm999_vm12 = vmor %vm997_vm10, %vm998_vm11 }
 0x118   : > { %v994_v61 = vsub.f32 1.0, %v993_v53  ;;  %v3977_v53 = vpop.f32.mrf.mxu1 }
 0x11a   : > { %v995_v11 = vmul.f32 %v3219_v47, %v994_v61  ;;  %v3997_v61 = vpop.f32.mrf.mxu0 }
 0x11c   : > { %v996_v20 = vadd.f32 %v3219_v47, %v995_v11 }
 0x11e   : > { %v1000_v30 = vsel %vm999_vm12, %v3219_v47, %v996_v20 }
 0x11f   : > { %v1005_v39 = vsel %vm1002_vm13, %v1004_v28, %v1000_v30 }
 0x121   : > { %v963_v63 = vpop.f32.mrf.mxu3 }
 0x122   : > { %v1007_v5 = vadd.f32 %v3957_v56, %v963_v63  ;;  %v4007_v63 = vpop.f32.mrf.mxu0 }
 0x124   : > { %v1008_v10 = vmul.f32 %v1007_v5, %v985_v7 }
 0x126   : > { %v1009_v13 = vadd.f32 %v1008_v10, %v717_v2 }
 0x128   : > { %3220 = vtanh.f32 %v1009_v13 }
 0x129   : > { %v965_v23 = vpop.f32.mrf.mxu3 }
 0x12a   : > { %v4017_v5 = vpop.f32.mrf.mxu0 }
 0x12b   : > { %4688 = vst [vmem:[#allocation19_spill] sm:$0xff] %v4017_v5 }
 0x12e   : > { %v3221_v31 = vpop.eup %3220 }
 0x12f   : > { %v1011_v36 = vsub.f32 %v3782_v9, %v3221_v31 }
 0x131   : > { %v1012_v42 = vmul.f32 %v1011_v36, %v1005_v39 }
 0x132   : > { %v4021_v10 = vpop.f32.mrf.mxu0 }
 0x133   : > { %v1013_v43 = vadd.f32 %v3221_v31, %v1012_v42  ;;  %4690 = vst [vmem:[#allocation21_spill] sm:$0xff] %v4021_v10 }
 0x135   : > { %v1019_v50 = vmul.f32 %v1017_v44, %v1013_v43  ;;  %v1021_v40 = vsub.f32 %v1013_v43, %v3782_v9 }
 0x137   : > { %1020 = vst [vmem:[%s3756_s7] sm:$0xff] %v1019_v50  ;;  %v1022_v51 = vmul.f32 %v1021_v40, %v1017_v44  ;;  %v670_v40 = vadd.f32 %v3963_v14, %v3948_v18 }
 0x139   : > { %v3975_v47 = vadd.f32 %v1022_v51, %v3782_v9  ;;  %v3987_v9 = vpop.f32.mrf.mxu1 }
 0x13a   : > { %v4025_v13 = vpop.f32.mrf.mxu0 }
 0x13b   : > { %v1029_v59 = vpack.c.bf16 %v3975_v47, %v3975_v47  ;;  %4692 = vst [vmem:[#allocation23_spill] sm:$0xff] %v4025_v13 }
 0x13d   : > { %1038 = vmatmul.bf16.vlgmr.msrb.gmra.mxu3 %v1029_v59  ;;  %1051 = vmatmul.bf16.vlgmr.msrb.gmra.mxu0 %v1029_v59 }
 0x13e   : > { %1064 = vmatmul.bf16.vlgmr.msrb.gmra.mxu1 %v1029_v59  ;;  %1262 = vmatpush.bf16.msrb.mxu3 %v3803_v46 }
 0x13f   : > { %1339 = vmatpush.bf16.msrb.mxu0 %v3759_v4  ;;  %1352 = vmatpush.bf16.msrb.mxu1 %v3784_v12 }
 0x141   : > { %v3999_v22 = vpop.f32.mrf.mxu1 }
 0x142   : > { %1263 = vmatpush.bf16.msrb.mxu3 %v3810_v55  ;;  %v4029_v20 = vpop.f32.mrf.mxu0 }
 0x143   : > { %1340 = vmatpush.bf16.msrb.mxu0 %v3762_v6  ;;  %1353 = vmatpush.bf16.msrb.mxu1 %v3792_v26  ;;  %4694 = vst [vmem:[#allocation25_spill] sm:$0xff] %v4029_v20 }
 0x146   : > { %1264 = vmatpush.bf16.msrb.mxu3 %v3818_v1 }
 0x147   : > { %1341 = vmatpush.bf16.msrb.mxu0 %v3765_v15  ;;  %1354 = vmatpush.bf16.msrb.mxu1 %v3800_v37 }
 0x149   : > { %v4010_v2 = vpop.f32.mrf.mxu1 }
 0x14a   : > { %1265 = vmatpush.bf16.msrb.mxu3 %v3825_v16  ;;  %v4033_v23 = vpop.f32.mrf.mxu0 }
 0x14b   : > { %1342 = vmatpush.bf16.msrb.mxu0 %v3768_v25  ;;  %1355 = vmatpush.bf16.msrb.mxu1 %v3807_v48  ;;  %4696 = vst [vmem:[#allocation27_spill] sm:$0xff] %v4033_v23 }
 0x14e   : > { %1266 = vmatpush.bf16.msrb.mxu3 %v3837_v24 }
 0x14f   : > { %1343 = vmatpush.bf16.msrb.mxu0 %v3771_v35  ;;  %1356 = vmatpush.bf16.msrb.mxu1 %v3814_v58 }
 0x151   : > { %v4019_v7 = vpop.f32.mrf.mxu1 }
 0x152   : > { %1267 = vmatpush.bf16.msrb.mxu3 %v3855_v34  ;;  %4689 = vst [vmem:[#allocation20_spill] sm:$0xff] %v4019_v7  ;;  %v4037_v30 = vpop.f32.mrf.mxu0 }
 0x153   : > { %1344 = vmatpush.bf16.msrb.mxu0 %v3774_v45  ;;  %1357 = vmatpush.bf16.msrb.mxu1 %v3821_v3  ;;  %4698 = vst [vmem:[#allocation29_spill] sm:$0xff] %v4037_v30 }
 0x156   : > { %1268 = vmatpush.bf16.msrb.mxu3 %v3865_v41 }
 0x157   : > { %1345 = vmatpush.bf16.msrb.mxu0 %v3777_v57  ;;  %1358 = vmatpush.bf16.msrb.mxu1 %v3828_v17 }
 0x159   : > { %v4023_v11 = vpop.f32.mrf.mxu1 }
 0x15a   : > { %1269 = vmatpush.bf16.msrb.mxu3 %v3873_v49  ;;  %4691 = vst [vmem:[#allocation22_spill] sm:$0xff] %v4023_v11  ;;  %v4041_v36 = vpop.f32.mrf.mxu0 }
 0x15b   : > { %1346 = vmatpush.bf16.msrb.mxu0 %v3780_v8  ;;  %1359 = vmatpush.bf16.msrb.mxu1 %v3846_v29  ;;  %4700 = vst [vmem:[#allocation31_spill] sm:$0xff] %v4041_v36  ;;  %v621_v36 = vadd.f32 %v3961_v62, %v3943_v0 }
 0x161   : > { %v4027_v19 = vpop.f32.mrf.mxu1 }
 0x162   : > { %4693 = vst [vmem:[#allocation24_spill] sm:$0xff] %v4027_v19  ;;  %v4045_v42 = vpop.f32.mrf.mxu0 }
 0x163   : > { %4702 = vst [vmem:[#allocation33_spill] sm:$0xff] %v4045_v42 }
 0x169   : > { %v4031_v21 = vpop.f32.mrf.mxu1 }
 0x16a   : > { %4695 = vst [vmem:[#allocation26_spill] sm:$0xff] %v4031_v21  ;;  %v4049_v44 = vpop.f32.mrf.mxu0 }
 0x16b   : > { %4704 = vst [vmem:[#allocation35_spill] sm:$0xff] %v4049_v44 }
 0x171   : > { %v4035_v28 = vpop.f32.mrf.mxu1 }
 0x172   : > { %4697 = vst [vmem:[#allocation28_spill] sm:$0xff] %v4035_v28 }
 0x179   : > { %v4039_v31 = vpop.f32.mrf.mxu1 }
 0x17a   : > { %4699 = vst [vmem:[#allocation30_spill] sm:$0xff] %v4039_v31 }
 0x181   : > { %v4043_v39 = vpop.f32.mrf.mxu1 }
 0x182   : > { %4701 = vst [vmem:[#allocation32_spill] sm:$0xff] %v4043_v39 }
 0x189   : > { %v4047_v43 = vpop.f32.mrf.mxu1 }
 0x18a   : > { %4703 = vst [vmem:[#allocation34_spill] sm:$0xff] %v4047_v43 }
 0x191   : > { %v4051_v50 = vpop.f32.mrf.mxu1 }
 0x192   : > { %4705 = vst [vmem:[#allocation36_spill] sm:$0xff] %v4051_v50 }
 0x1ba   : > { %v1052_v51 = vpop.f32.mrf.mxu0 }
 0x1bb   : > { %v1089_v59 = vadd.f32 %v1052_v51, %v670_v40  ;;  %v1065_v32 = vpop.f32.mrf.mxu1 }
 0x1bd   : > { %v2985_v30 = vmul.f32 -1.442695, %v1089_v59 }
 0x1bf   : > { %3222 = vpow2.f32 %v2985_v30 }
 0x1c0   : > { %v1039_v31 = vpop.f32.mrf.mxu3 }
 0x1c1   : > { %v1069_v39 = vadd.f32 %v1039_v31, %v621_v36 }
 0x1c2   : > { %v1054_v42 = vpop.f32.mrf.mxu0 }
 0x1c3   : > { %v2984_v43 = vmul.f32 -1.442695, %v1069_v39  ;;  %v1067_v28 = vpop.f32.mrf.mxu1  ;;  %v1128_v39 = vstv %s1127_s18 }
 0x1c4   : > { %vm1129_vm15 = vcmp.lt.s32.totalorder %v1128_v39, %v3842_v27 }
 0x1c5   : > { %3224 = vpow2.f32 %v2984_v43  ;;  %v3223_v50 = vpop.eup %3222  ;;  %v4706_v43 = vmov 0.0  }
 0x1c6   : > { %v1093_v14 = vadd.f32 1.0, %v3223_v50  ;;  %v718_v50 = vpop.f32.mrf.mxu2 }
 0x1c7   : > { %v719_v39 = vadd.f32 %v718_v50, %v3952_v54 }
 0x1c8   : > { %v1041_v44 = vpop.f32.mrf.mxu3  ;;  %vm1099_vm5 = vweird.f32 %v1093_v14 }
 0x1c9   : > { %v1231_v44 = vstv %s1230_s3 }
 0x1ca   : > { %vm1232_vm3 = vcmp.lt.s32.totalorder %v1231_v44, %v3842_v27 }
 0x1cb   : > { %v3225_v23 = vpop.eup %3224  ;;  %v2991_v10 = vsel %vm1232_vm3, 1.0, %v4706_v43 }
 0x1cc   : > { %v1073_v21 = vadd.f32 1.0, %v3225_v23  ;;  %v2987_v23 = vsel %vm1129_vm15, 1.0, %v4706_v43 }
 0x1cd   : > { %1221 = vperm.xlu1 %3209, %v2987_v23   ;;  %v1952_v23 = vstv %s1951_s2 }
 0x1ce   : > { %3226 = vrcp.f32 %v1073_v21  ;;  %v1085_v36 = vand.u32 2147483648, %v1073_v21  ;;  %v1083_v28 = vand.u32 2147483647, %v1073_v21  ;;  %vm1079_vm0 = vweird.f32 %v1073_v21 }
 0x1cf   : > { %3228 = vrcp.f32 %v1093_v14  ;;  %vm1953_vm9 = vcmp.lt.s32.totalorder %v1952_v23, %v3842_v27 }
 0x1d0   : > { %v1086_v13 = vor.u32 1.1754944e-38, %v1085_v36  ;;  %vm1084_vm2 = vcmp.eq.f32.partialorder %v1083_v28, 8.507059e+37 }
 0x1d4   : > { %v3227_v40 = vpop.eup %3226 }
 0x1d5   : > { %v3229_v51 = vpop.eup %3228  ;;  %v1075_v59 = vmul.f32 %v3227_v40, %v1073_v21  ;;  %vm1080_vm14 = vweird.f32 %v3227_v40  ;;  %1324 = vperm.xlu1 %3209, %v2991_v10  }
 0x1d6   : > { %v1095_v31 = vmul.f32 %v3229_v51, %v1093_v14  ;;  %vm1081_vm1 = vmor %vm1079_vm0, %vm1080_vm14  ;;  %vm1100_vm4 = vweird.f32 %v3229_v51 }
 0x1d7   : > { %v1076_v62 = vsub.f32 1.0, %v1075_v59  ;;  %v1109_v59 = vadd.f32 %v3957_v56, %v1065_v32  ;;  %v1105_v32 = vand.u32 2147483648, %v1093_v14  ;;  %vm1101_vm7 = vmor %vm1099_vm5, %vm1100_vm4 }
 0x1d8   : > { %v1096_v20 = vsub.f32 1.0, %v1095_v31  ;;  %v1643_v31 = vstv %s1642_s20 }
 0x1d9   : > { %v1077_v30 = vmul.f32 %v3227_v40, %v1076_v62  ;;  %vm1644_vm6 = vcmp.lt.s32.totalorder %v1643_v31, %v3842_v27 }
 0x1da   : > { %v1097_v21 = vmul.f32 %v3229_v51, %v1096_v20  ;;  %v1106_v20 = vor.u32 1.1754944e-38, %v1105_v32  ;;  %v3007_v28 = vsel %vm1644_vm6, 1.0, %v4706_v43 }
 0x1db   : > { %v1078_v42 = vadd.f32 %v3227_v40, %v1077_v30 }
 0x1dc   : > { %v1098_v36 = vadd.f32 %v3229_v51, %v1097_v21 }
 0x1dd   : > { %v1082_v19 = vsel %vm1081_vm1, %v3227_v40, %v1078_v42  ;;  %v1103_v40 = vand.u32 2147483647, %v1093_v14  ;;  %1736 = vperm.xlu1 %3209, %v3007_v28   ;;  %v1119_v14 = vpop.permute.xlu0 %1118 }
 0x1de   : > { %v1087_v62 = vsel %vm1084_vm2, %v1086_v13, %v1082_v19  ;;  %v1102_v13 = vsel %vm1101_vm7, %v3229_v51, %v1098_v36 }
 0x1df   : > { %v1110_v30 = vmul.f32 %v1109_v59, %v1087_v62  ;;  %vm1104_vm8 = vcmp.eq.f32.partialorder %v1103_v40, 8.507059e+37  ;;  %v4073_v59 = vpop.f32.mrf.mxu2  ;;  %v3019_v62 = vsel %vm1953_vm9, 1.0, %v4706_v43 }
 0x1e0   : > { %v1107_v42 = vsel %vm1104_vm8, %v1106_v20, %v1102_v13 }
 0x1e1   : > { %v1111_v11 = vadd.f32 %v1110_v30, %v719_v39  ;;  %v2261_v30 = vstv %s2260_s9 }
 0x1e2   : > { %vm2262_vm10 = vcmp.lt.s32.totalorder %v2261_v30, %v3842_v27 }
 0x1e3   : > { %3230 = vtanh.f32 %v1111_v11  ;;  %v3031_v36 = vsel %vm2262_vm10, 1.0, %v4706_v43 }
 0x1e5   : > { %2045 = vperm.xlu1 %3209, %v3019_v62  }
 0x1e7   : > { %v4087_v32 = vpop.f32.mrf.mxu2 }
 0x1e9   : > { %v3231_v19 = vpop.eup %3230 }
 0x1ea   : > { %v1113_v11 = vsub.f32 %v3975_v47, %v3231_v19 }
 0x1ec   : > { %v1114_v10 = vmul.f32 %v1113_v11, %v1107_v42 }
 0x1ed   : > { %2354 = vperm.xlu1 %3209, %v3031_v36  }
 0x1ee   : > { %v1115_v44 = vadd.f32 %v3231_v19, %v1114_v10 }
 0x1ef   : > { %v4095_v27 = vpop.f32.mrf.mxu2 }
 0x1f0   : > { %v1121_v50 = vmul.f32 %v1119_v14, %v1115_v44  ;;  %v1124_v51 = vsub.f32 %v1115_v44, %v3975_v47 }
 0x1f2   : > { %2986 = vst [vmem:[%s3756_s7 + $0x8] sm:$0xff] %v1121_v50  ;;  %v1125_v39 = vmul.f32 %v1124_v51, %v1119_v14  ;;  %v624_v50 = vadd.f32 %v3965_v33, %v3943_v0  ;;  %v673_v51 = vadd.f32 %v3968_v38, %v3948_v18 }
 0x1f4   : > { %v4078_v21 = vadd.f32 %v1125_v39, %v3975_v47 }
 0x1f6   : > { %v1132_v31 = vpack.c.bf16 %v4078_v21, %v4078_v21 }
 0x1f7   : > { %v4106_v47 = vpop.f32.mrf.mxu2 }
 0x1f8   : > { %1141 = vmatmul.bf16.vlgmr.msrb.gmra.mxu2 %v1132_v31  ;;  %1154 = vmatmul.bf16.vlgmr.msra.gmra.mxu3 %v1132_v31 }
 0x1f9   : > { %1167 = vmatmul.bf16.vlgmr.msra.gmra.mxu0 %v1132_v31  ;;  %1365 = vmatpush.bf16.msrb.mxu2 %v3803_v46 }
 0x1fa   : > { %1442 = vmatpush.bf16.msra.mxu3 %v3759_v4  ;;  %1455 = vmatpush.bf16.msra.mxu0 %v3784_v12 }
 0x1fd   : > { %1366 = vmatpush.bf16.msrb.mxu2 %v3810_v55 }
 0x1fe   : > { %1443 = vmatpush.bf16.msra.mxu3 %v3762_v6  ;;  %1456 = vmatpush.bf16.msra.mxu0 %v3792_v26 }
 0x1ff   : > { %v4114_v40 = vpop.f32.mrf.mxu2 }
 0x201   : > { %1367 = vmatpush.bf16.msrb.mxu2 %v3818_v1 }
 0x202   : > { %1444 = vmatpush.bf16.msra.mxu3 %v3765_v15  ;;  %1457 = vmatpush.bf16.msra.mxu0 %v3800_v37 }
 0x205   : > { %1368 = vmatpush.bf16.msrb.mxu2 %v3825_v16 }
 0x206   : > { %1445 = vmatpush.bf16.msra.mxu3 %v3768_v25  ;;  %1458 = vmatpush.bf16.msra.mxu0 %v3807_v48 }
 0x207   : > { %v4116_v13 = vpop.f32.mrf.mxu2 }
 0x208   : > { %4707 = vst [vmem:[#allocation37_spill] sm:$0xff] %v4116_v13 }
 0x209   : > { %1369 = vmatpush.bf16.msrb.mxu2 %v3837_v24 }
 0x20a   : > { %1446 = vmatpush.bf16.msra.mxu3 %v3771_v35  ;;  %1459 = vmatpush.bf16.msra.mxu0 %v3814_v58 }
 0x20d   : > { %1370 = vmatpush.bf16.msrb.mxu2 %v3855_v34 }
 0x20e   : > { %1447 = vmatpush.bf16.msra.mxu3 %v3774_v45  ;;  %1460 = vmatpush.bf16.msra.mxu0 %v3821_v3 }
 0x20f   : > { %v4118_v19 = vpop.f32.mrf.mxu2 }
 0x210   : > { %4708 = vst [vmem:[#allocation38_spill] sm:$0xff] %v4118_v19 }
 0x211   : > { %1371 = vmatpush.bf16.msrb.mxu2 %v3865_v41 }
 0x212   : > { %1448 = vmatpush.bf16.msra.mxu3 %v3777_v57  ;;  %1461 = vmatpush.bf16.msra.mxu0 %v3828_v17 }
 0x215   : > { %1372 = vmatpush.bf16.msrb.mxu2 %v3873_v49 }
 0x216   : > { %1449 = vmatpush.bf16.msra.mxu3 %v3780_v8  ;;  %1462 = vmatpush.bf16.msra.mxu0 %v3846_v29 }
 0x217   : > { %v4120_v20 = vpop.f32.mrf.mxu2 }
 0x218   : > { %4709 = vst [vmem:[#allocation39_spill] sm:$0xff] %v4120_v20 }
 0x21f   : > { %v4122_v28 = vpop.f32.mrf.mxu2 }
 0x220   : > { %4710 = vst [vmem:[#allocation40_spill] sm:$0xff] %v4122_v28 }
 0x227   : > { %v4124_v11 = vpop.f32.mrf.mxu2 }
 0x228   : > { %4711 = vst [vmem:[#allocation41_spill] sm:$0xff] %v4124_v11 }
 0x22f   : > { %v4126_v42 = vpop.f32.mrf.mxu2 }
 0x230   : > { %4712 = vst [vmem:[#allocation42_spill] sm:$0xff] %v4126_v42 }
 0x237   : > { %v4128_v23 = vpop.f32.mrf.mxu2 }
 0x238   : > { %4713 = vst [vmem:[#allocation43_spill] sm:$0xff] %v4128_v23 }
 0x23f   : > { %v4130_v10 = vpop.f32.mrf.mxu2 }
 0x240   : > { %4714 = vst [vmem:[#allocation44_spill] sm:$0xff] %v4130_v10 }
 0x247   : > { %v4132_v44 = vpop.f32.mrf.mxu2 }
 0x248   : > { %4715 = vst [vmem:[#allocation45_spill] sm:$0xff] %v4132_v44 }
 0x276   : > { %v1168_v14 = vpop.f32.mrf.mxu0 }
 0x27b   : > { %v1142_v62 = vpop.f32.mrf.mxu2  ;;  %v1155_v39 = vpop.f32.mrf.mxu3 }
 0x27c   : > { %v1172_v30 = vadd.f32 %v1142_v62, %v624_v50  ;;  %v1192_v31 = vadd.f32 %v1155_v39, %v673_v51  ;;  %v722_v39 = vadd.f32 %v4073_v59, %v3952_v54 }
 0x27e   : > { %v2988_v36 = vmul.f32 -1.442695, %v1172_v30  ;;  %v2989_v11 = vmul.f32 -1.442695, %v1192_v31  ;;  %v1170_v42 = vpop.f32.mrf.mxu0 }
 0x280   : > { %3232 = vpow2.f32 %v2988_v36 }
 0x281   : > { %3234 = vpow2.f32 %v2989_v11 }
 0x283   : > { %v1144_v23 = vpop.f32.mrf.mxu2  ;;  %v1157_v10 = vpop.f32.mrf.mxu3 }
 0x284   : > { %v1212_v10 = vadd.f32 %v3957_v56, %v1168_v14 }
 0x286   : > { %v3233_v28 = vpop.eup %3232 }
 0x287   : > { %v3235_v44 = vpop.eup %3234  ;;  %v1176_v20 = vadd.f32 1.0, %v3233_v28 }
 0x288   : > { %v1196_v19 = vadd.f32 1.0, %v3235_v44 }
 0x289   : > { %3236 = vrcp.f32 %v1176_v20  ;;  %v1188_v5 = vand.u32 2147483648, %v1176_v20  ;;  %v1186_v62 = vand.u32 2147483647, %v1176_v20  ;;  %vm1182_vm12 = vweird.f32 %v1176_v20 }
 0x28a   : > { %3238 = vrcp.f32 %v1196_v19  ;;  %vm1202_vm0 = vweird.f32 %v1196_v19 }
 0x28b   : > { %v1189_v11 = vor.u32 1.1754944e-38, %v1188_v5  ;;  %vm1187_vm14 = vcmp.eq.f32.partialorder %v1186_v62, 8.507059e+37 }
 0x28f   : > { %v3237_v33 = vpop.eup %3236 }
 0x290   : > { %v3239_v13 = vpop.eup %3238  ;;  %v1178_v38 = vmul.f32 %v3237_v33, %v1176_v20  ;;  %vm1183_vm11 = vweird.f32 %v3237_v33  ;;  %v1206_v20 = vand.u32 2147483647, %v1196_v19 }
 0x291   : > { %v1198_v50 = vmul.f32 %v3239_v13, %v1196_v19  ;;  %vm1184_vm13 = vmor %vm1182_vm12, %vm1183_vm11  ;;  %vm1203_vm15 = vweird.f32 %v3239_v13 }
 0x292   : > { %v1179_v7 = vsub.f32 1.0, %v1178_v38  ;;  %v1208_v38 = vand.u32 2147483648, %v1196_v19  ;;  %vm1204_vm1 = vmor %vm1202_vm0, %vm1203_vm15  ;;  %vm1207_vm2 = vcmp.eq.f32.partialorder %v1206_v20, 8.507059e+37 }
 0x293   : > { %v1199_v23 = vsub.f32 1.0, %v1198_v50 }
 0x294   : > { %v1180_v51 = vmul.f32 %v3237_v33, %v1179_v7  ;;  %v1209_v14 = vor.u32 1.1754944e-38, %v1208_v38 }
 0x295   : > { %v1200_v31 = vmul.f32 %v3239_v13, %v1199_v23 }
 0x296   : > { %v1181_v42 = vadd.f32 %v3237_v33, %v1180_v51 }
 0x297   : > { %v1201_v7 = vadd.f32 %v3239_v13, %v1200_v31 }
 0x298   : > { %v1185_v28 = vsel %vm1184_vm13, %v3237_v33, %v1181_v42  ;;  %v1222_v42 = vpop.permute.xlu1 %1221 }
 0x299   : > { %v1190_v44 = vsel %vm1187_vm14, %v1189_v11, %v1185_v28  ;;  %v1205_v5 = vsel %vm1204_vm1, %v3239_v13, %v1201_v7 }
 0x29a   : > { %v1213_v30 = vmul.f32 %v1212_v10, %v1190_v44  ;;  %v1210_v51 = vsel %vm1207_vm2, %v1209_v14, %v1205_v5 }
 0x29c   : > { %v1214_v36 = vadd.f32 %v1213_v30, %v722_v39  ;;  %v675_v30 = vadd.f32 %v3977_v53, %v3948_v18 }
 0x29e   : > { %3240 = vtanh.f32 %v1214_v36 }
 0x2a4   : > { %v3241_v50 = vpop.eup %3240 }
 0x2a5   : > { %v1216_v33 = vsub.f32 %v4078_v21, %v3241_v50 }
 0x2a7   : > { %v1217_v62 = vmul.f32 %v1216_v33, %v1210_v51 }
 0x2a9   : > { %v1218_v59 = vadd.f32 %v3241_v50, %v1217_v62 }
 0x2ab   : > { %v1224_v11 = vmul.f32 %v1222_v42, %v1218_v59  ;;  %v1227_v23 = vsub.f32 %v1218_v59, %v4078_v21 }
 0x2ad   : > { %2990 = vst [vmem:[%s3756_s7 + $0x10] sm:$0xff] %v1224_v11  ;;  %v1228_v10 = vmul.f32 %v1227_v23, %v1222_v42 }
 0x2af   : > { %v4145_v28 = vadd.f32 %v1228_v10, %v4078_v21  ;;  %v626_v21 = vadd.f32 %v3972_v52, %v3943_v0  ;;  %v1334_v10 = vstv %s1333_s11 }
 0x2b1   : > { %v1235_v13 = vpack.c.bf16 %v4145_v28, %v4145_v28 }
 0x2b3   : > { %1244 = vmatmul.bf16.vlgmr.msra.gmra.mxu1 %v1235_v13  ;;  %1257 = vmatmul.bf16.vlgmr.msra.gmra.mxu2 %v1235_v13 }
 0x2b4   : > { %1270 = vmatmul.bf16.vlgmr.msrb.gmra.mxu3 %v1235_v13  ;;  %1468 = vmatpush.bf16.msra.mxu1 %v3803_v46 }
 0x2b5   : > { %1545 = vmatpush.bf16.msra.mxu2 %v3759_v4  ;;  %1558 = vmatpush.bf16.msrb.mxu3 %v3784_v12 }
 0x2b8   : > { %1469 = vmatpush.bf16.msra.mxu1 %v3810_v55 }
 0x2b9   : > { %1546 = vmatpush.bf16.msra.mxu2 %v3762_v6  ;;  %1559 = vmatpush.bf16.msrb.mxu3 %v3792_v26 }
 0x2bc   : > { %1470 = vmatpush.bf16.msra.mxu1 %v3818_v1 }
 0x2bd   : > { %1547 = vmatpush.bf16.msra.mxu2 %v3765_v15  ;;  %1560 = vmatpush.bf16.msrb.mxu3 %v3800_v37 }
 0x2c0   : > { %1471 = vmatpush.bf16.msra.mxu1 %v3825_v16 }
 0x2c1   : > { %1548 = vmatpush.bf16.msra.mxu2 %v3768_v25  ;;  %1561 = vmatpush.bf16.msrb.mxu3 %v3807_v48 }
 0x2c4   : > { %1472 = vmatpush.bf16.msra.mxu1 %v3837_v24 }
 0x2c5   : > { %1549 = vmatpush.bf16.msra.mxu2 %v3771_v35  ;;  %1562 = vmatpush.bf16.msrb.mxu3 %v3814_v58 }
 0x2c8   : > { %1473 = vmatpush.bf16.msra.mxu1 %v3855_v34 }
 0x2c9   : > { %1550 = vmatpush.bf16.msra.mxu2 %v3774_v45  ;;  %1563 = vmatpush.bf16.msrb.mxu3 %v3821_v3 }
 0x2cc   : > { %1474 = vmatpush.bf16.msra.mxu1 %v3865_v41 }
 0x2cd   : > { %1551 = vmatpush.bf16.msra.mxu2 %v3777_v57  ;;  %1564 = vmatpush.bf16.msrb.mxu3 %v3828_v17 }
 0x2d0   : > { %1475 = vmatpush.bf16.msra.mxu1 %v3873_v49 }
 0x2d1   : > { %1552 = vmatpush.bf16.msra.mxu2 %v3780_v8  ;;  %1565 = vmatpush.bf16.msrb.mxu3 %v3846_v29 }
 0x330   : > { %v1245_v19 = vpop.f32.mrf.mxu1 }
 0x331   : > { %v1275_v44 = vadd.f32 %v1245_v19, %v626_v21  ;;  %v3372_v21 = vld [vmem:[%s4661_s1] sm:$0xff] }
 0x332   : > { %vm1335_vm5 = vcmp.lt.s32.totalorder %v1334_v10, %v3372_v21 }
 0x333   : > { %v2992_v39 = vmul.f32 -1.442695, %v1275_v44 }
 0x335   : > { %3242 = vpow2.f32 %v2992_v39  ;;  %v2995_v39 = vsel %vm1335_vm5, 1.0, %v4706_v43 }
 0x336   : > { %v1258_v31 = vpop.f32.mrf.mxu2  ;;  %1427 = vperm.xlu2 %3210, %v2995_v39   ;;  %v2055_v39 = vstv %s2054_s19 }
 0x337   : > { %v1295_v36 = vadd.f32 %v1258_v31, %v675_v30  ;;  %v1271_v7 = vpop.f32.mrf.mxu3  ;;  %v1437_v30 = vstv %s1436_s12  ;;  %vm2056_vm14 = vcmp.lt.s32.totalorder %v2055_v39, %v3372_v21 }
 0x338   : > { %v1247_v38 = vpop.f32.mrf.mxu1  ;;  %vm1438_vm8 = vcmp.lt.s32.totalorder %v1437_v30, %v3372_v21 }
 0x339   : > { %v2993_v20 = vmul.f32 -1.442695, %v1295_v36 }
 0x33b   : > { %v3243_v5 = vpop.eup %3242  ;;  %3244 = vpow2.f32 %v2993_v20  ;;  %v1315_v20 = vadd.f32 %v3957_v56, %v1271_v7 }
 0x33c   : > { %v1279_v50 = vadd.f32 1.0, %v3243_v5 }
 0x33e   : > { %3246 = vrcp.f32 %v1279_v50  ;;  %v1260_v14 = vpop.f32.mrf.mxu2  ;;  %v1291_v42 = vand.u32 2147483648, %v1279_v50  ;;  %v1289_v23 = vand.u32 2147483647, %v1279_v50  ;;  %vm1285_vm4 = vweird.f32 %v1279_v50 }
 0x33f   : > { %v1273_v52 = vpop.f32.mrf.mxu3 }
 0x340   : > { %v1292_v31 = vor.u32 1.1754944e-38, %v1291_v42  ;;  %vm1290_vm7 = vcmp.eq.f32.partialorder %v1289_v23, 8.507059e+37 }
 0x341   : > { %v3245_v33 = vpop.eup %3244 }
 0x342   : > { %v1299_v51 = vadd.f32 1.0, %v3245_v33 }
 0x344   : > { %v3247_v62 = vpop.eup %3246  ;;  %3248 = vrcp.f32 %v1299_v51  ;;  %vm1305_vm10 = vweird.f32 %v1299_v51  ;;  %v1309_v7 = vand.u32 2147483647, %v1299_v51 }
 0x345   : > { %v1281_v59 = vmul.f32 %v3247_v62, %v1279_v50  ;;  %vm1286_vm3 = vweird.f32 %v3247_v62  ;;  %v724_v50 = vadd.f32 %v4087_v32, %v3952_v54 }
 0x346   : > { %vm1287_vm6 = vmor %vm1285_vm4, %vm1286_vm3  ;;  %vm1310_vm13 = vcmp.eq.f32.partialorder %v1309_v7, 8.507059e+37 }
 0x347   : > { %v1282_v53 = vsub.f32 1.0, %v1281_v59  ;;  %v2999_v59 = vsel %vm1438_vm8, 1.0, %v4706_v43 }
 0x348   : > { %1530 = vperm.xlu2 %3210, %v2999_v59  }
 0x349   : > { %v1283_v11 = vmul.f32 %v3247_v62, %v1282_v53  ;;  %v1746_v53 = vstv %s1745_s17 }
 0x34a   : > { %v3249_v13 = vpop.eup %3248  ;;  %vm1747_vm11 = vcmp.lt.s32.totalorder %v1746_v53, %v3372_v21 }
 0x34b   : > { %v1301_v19 = vmul.f32 %v3249_v13, %v1299_v51  ;;  %v1284_v44 = vadd.f32 %v3247_v62, %v1283_v11  ;;  %vm1306_vm9 = vweird.f32 %v3249_v13  ;;  %v3011_v10 = vsel %vm1747_vm11, 1.0, %v4706_v43 }
 0x34c   : > { %vm1307_vm12 = vmor %vm1305_vm10, %vm1306_vm9 }
 0x34d   : > { %v1302_v36 = vsub.f32 1.0, %v1301_v19  ;;  %v1288_v38 = vsel %vm1287_vm6, %v3247_v62, %v1284_v44  ;;  %v1311_v62 = vand.u32 2147483648, %v1299_v51  ;;  %v1325_v51 = vpop.permute.xlu1 %1324 }
 0x34e   : > { %v1293_v5 = vsel %vm1290_vm7, %v1292_v31, %v1288_v38  ;;  %v3023_v38 = vsel %vm2056_vm14, 1.0, %v4706_v43 }
 0x34f   : > { %v1316_v14 = vmul.f32 %v1315_v20, %v1293_v5  ;;  %v1303_v52 = vmul.f32 %v3249_v13, %v1302_v36  ;;  %v1312_v23 = vor.u32 1.1754944e-38, %v1311_v62  ;;  %v2364_v5 = vstv %s2363_s21 }
 0x350   : > { %1839 = vperm.xlu2 %3210, %v3011_v10   ;;  %vm2365_vm15 = vcmp.lt.s32.totalorder %v2364_v5, %v3372_v21 }
 0x351   : > { %v1317_v33 = vadd.f32 %v1316_v14, %v724_v50  ;;  %v1304_v42 = vadd.f32 %v3249_v13, %v1303_v52  ;;  %v3035_v52 = vsel %vm2365_vm15, 1.0, %v4706_v43  ;;  %v629_v43 = vadd.f32 %v3984_v60, %v3943_v0 }
 0x353   : > { %3250 = vtanh.f32 %v1317_v33  ;;  %v1308_v11 = vsel %vm1307_vm12, %v3249_v13, %v1304_v42 }
 0x354   : > { %v1313_v44 = vsel %vm1310_vm13, %v1312_v23, %v1308_v11 }
 0x358   : > { %2148 = vperm.xlu2 %3210, %v3023_v38  }
 0x359   : > { %v3251_v32 = vpop.eup %3250 }
 0x35a   : > { %v1319_v19 = vsub.f32 %v4145_v28, %v3251_v32 }
 0x35c   : > { %v1320_v30 = vmul.f32 %v1319_v19, %v1313_v44 }
 0x35e   : > { %v1321_v31 = vadd.f32 %v3251_v32, %v1320_v30 }
 0x360   : > { %v1327_v36 = vmul.f32 %v1325_v51, %v1321_v31  ;;  %v1330_v13 = vsub.f32 %v1321_v31, %v4145_v28  ;;  %2457 = vperm.xlu2 %3210, %v3035_v52  }
 0x362   : > { %2994 = vst [vmem:[%s3756_s7 + $0x18] sm:$0xff] %v1327_v36  ;;  %v1331_v20 = vmul.f32 %v1330_v13, %v1325_v51 }
 0x364   : > { %v4196_v50 = vadd.f32 %v1331_v20, %v4145_v28  ;;  %v678_v28 = vadd.f32 %v3987_v9, %v3948_v18 }
 0x366   : > { %v1338_v14 = vpack.c.bf16 %v4196_v50, %v4196_v50 }
 0x368   : > { %1347 = vmatmul.bf16.vlgmr.msrb.gmra.mxu0 %v1338_v14  ;;  %1360 = vmatmul.bf16.vlgmr.msrb.gmra.mxu1 %v1338_v14 }
 0x369   : > { %1373 = vmatmul.bf16.vlgmr.msrb.gmra.mxu2 %v1338_v14  ;;  %1571 = vmatpush.bf16.msrb.mxu0 %v3803_v46 }
 0x36a   : > { %1648 = vmatpush.bf16.msrb.mxu1 %v3759_v4  ;;  %1661 = vmatpush.bf16.msrb.mxu2 %v3784_v12 }
 0x36d   : > { %1572 = vmatpush.bf16.msrb.mxu0 %v3810_v55 }
 0x36e   : > { %1649 = vmatpush.bf16.msrb.mxu1 %v3762_v6  ;;  %1662 = vmatpush.bf16.msrb.mxu2 %v3792_v26 }
 0x371   : > { %1573 = vmatpush.bf16.msrb.mxu0 %v3818_v1 }
 0x372   : > { %1650 = vmatpush.bf16.msrb.mxu1 %v3765_v15  ;;  %1663 = vmatpush.bf16.msrb.mxu2 %v3800_v37 }
 0x375   : > { %1574 = vmatpush.bf16.msrb.mxu0 %v3825_v16 }
 0x376   : > { %1651 = vmatpush.bf16.msrb.mxu1 %v3768_v25  ;;  %1664 = vmatpush.bf16.msrb.mxu2 %v3807_v48 }
 0x379   : > { %1575 = vmatpush.bf16.msrb.mxu0 %v3837_v24 }
 0x37a   : > { %1652 = vmatpush.bf16.msrb.mxu1 %v3771_v35  ;;  %1665 = vmatpush.bf16.msrb.mxu2 %v3814_v58 }
 0x37d   : > { %1576 = vmatpush.bf16.msrb.mxu0 %v3855_v34 }
 0x37e   : > { %1653 = vmatpush.bf16.msrb.mxu1 %v3774_v45  ;;  %1666 = vmatpush.bf16.msrb.mxu2 %v3821_v3 }
 0x381   : > { %1577 = vmatpush.bf16.msrb.mxu0 %v3865_v41 }
 0x382   : > { %1654 = vmatpush.bf16.msrb.mxu1 %v3777_v57  ;;  %1667 = vmatpush.bf16.msrb.mxu2 %v3828_v17 }
 0x385   : > { %1578 = vmatpush.bf16.msrb.mxu0 %v3873_v49 }
 0x386   : > { %1655 = vmatpush.bf16.msrb.mxu1 %v3780_v8  ;;  %1668 = vmatpush.bf16.msrb.mxu2 %v3846_v29 }
 0x3e5   : > { %v1348_v21 = vpop.f32.mrf.mxu0  ;;  %v1361_v33 = vpop.f32.mrf.mxu1 }
 0x3e6   : > { %v1378_v59 = vadd.f32 %v1348_v21, %v629_v43  ;;  %v1398_v53 = vadd.f32 %v1361_v33, %v678_v28  ;;  %v727_v21 = vadd.f32 %v4095_v27, %v3952_v54 }
 0x3e8   : > { %v2996_v42 = vmul.f32 -1.442695, %v1378_v59  ;;  %v2997_v62 = vmul.f32 -1.442695, %v1398_v53 }
 0x3ea   : > { %3252 = vpow2.f32 %v2996_v42 }
 0x3eb   : > { %3254 = vpow2.f32 %v2997_v62 }
 0x3ec   : > { %v1374_v7 = vpop.f32.mrf.mxu2 }
 0x3ed   : > { %v1350_v11 = vpop.f32.mrf.mxu0  ;;  %v1363_v32 = vpop.f32.mrf.mxu1  ;;  %v1418_v43 = vadd.f32 %v3957_v56, %v1374_v7 }
 0x3f0   : > { %v3253_v23 = vpop.eup %3252 }
 0x3f1   : > { %v3255_v10 = vpop.eup %3254  ;;  %v1382_v19 = vadd.f32 1.0, %v3253_v23 }
 0x3f2   : > { %v1402_v44 = vadd.f32 1.0, %v3255_v10 }
 0x3f3   : > { %3256 = vrcp.f32 %v1382_v19  ;;  %v1394_v36 = vand.u32 2147483648, %v1382_v19  ;;  %v1392_v38 = vand.u32 2147483647, %v1382_v19  ;;  %vm1388_vm1 = vweird.f32 %v1382_v19 }
 0x3f4   : > { %3258 = vrcp.f32 %v1402_v44  ;;  %v1376_v60 = vpop.f32.mrf.mxu2  ;;  %v1414_v62 = vand.u32 2147483648, %v1402_v44  ;;  %vm1408_vm5 = vweird.f32 %v1402_v44  ;;  %v1412_v11 = vand.u32 2147483647, %v1402_v44 }
 0x3f5   : > { %v1395_v14 = vor.u32 1.1754944e-38, %v1394_v36  ;;  %vm1393_vm3 = vcmp.eq.f32.partialorder %v1392_v38, 8.507059e+37  ;;  %v1428_v60 = vpop.permute.xlu2 %1427 }
 0x3f6   : > { %v1415_v10 = vor.u32 1.1754944e-38, %v1414_v62  ;;  %vm1413_vm7 = vcmp.eq.f32.partialorder %v1412_v11, 8.507059e+37 }
 0x3f9   : > { %v3257_v39 = vpop.eup %3256 }
 0x3fa   : > { %v3259_v9 = vpop.eup %3258  ;;  %v1384_v30 = vmul.f32 %v3257_v39, %v1382_v19  ;;  %vm1389_vm0 = vweird.f32 %v3257_v39 }
 0x3fb   : > { %v1404_v51 = vmul.f32 %v3259_v9, %v1402_v44  ;;  %vm1390_vm2 = vmor %vm1388_vm1, %vm1389_vm0  ;;  %vm1409_vm4 = vweird.f32 %v3259_v9 }
 0x3fc   : > { %v1385_v31 = vsub.f32 1.0, %v1384_v30  ;;  %vm1410_vm6 = vmor %vm1408_vm5, %vm1409_vm4 }
 0x3fd   : > { %v1405_v5 = vsub.f32 1.0, %v1404_v51 }
 0x3fe   : > { %v1386_v13 = vmul.f32 %v3257_v39, %v1385_v31 }
 0x3ff   : > { %v1406_v59 = vmul.f32 %v3259_v9, %v1405_v5 }
 0x400   : > { %v1387_v20 = vadd.f32 %v3257_v39, %v1386_v13 }
 0x401   : > { %v1407_v42 = vadd.f32 %v3259_v9, %v1406_v59 }
 0x402   : > { %v1391_v52 = vsel %vm1390_vm2, %v3257_v39, %v1387_v20  ;;  %v631_v20 = vadd.f32 %v3997_v61, %v3943_v0 }
 0x403   : > { %v1396_v28 = vsel %vm1393_vm3, %v1395_v14, %v1391_v52  ;;  %v1411_v32 = vsel %vm1410_vm6, %v3259_v9, %v1407_v42 }
 0x404   : > { %v1419_v33 = vmul.f32 %v1418_v43, %v1396_v28  ;;  %v1416_v7 = vsel %vm1413_vm7, %v1415_v10, %v1411_v32 }
 0x406   : > { %v1420_v53 = vadd.f32 %v1419_v33, %v727_v21 }
 0x408   : > { %3260 = vtanh.f32 %v1420_v53 }
 0x40e   : > { %v3261_v23 = vpop.eup %3260 }
 0x40f   : > { %v1422_v56 = vsub.f32 %v4196_v50, %v3261_v23 }
 0x411   : > { %v1423_v19 = vmul.f32 %v1422_v56, %v1416_v7 }
 0x413   : > { %v1424_v27 = vadd.f32 %v3261_v23, %v1423_v19 }
 0x415   : > { %v1430_v39 = vmul.f32 %v1428_v60, %v1424_v27  ;;  %v1433_v30 = vsub.f32 %v1424_v27, %v4196_v50 }
 0x417   : > { %2998 = vst [vmem:[%s3756_s7 + $0x20] sm:$0xff] %v1430_v39  ;;  %v1434_v31 = vmul.f32 %v1433_v30, %v1428_v60  ;;  %v4271_v60 = vld [vmem:[%s4665_s5] ss:$0 sm:$0xff] }
 0x419   : > { %v4236_v51 = vadd.f32 %v1434_v31, %v4196_v50  ;;  %v680_v50 = vadd.f32 %v3999_v22, %v3948_v18 }
 0x41b   : > { %v1441_v44 = vpack.c.bf16 %v4236_v51, %v4236_v51 }
 0x41d   : > { %1450 = vmatmul.bf16.vlgmr.msra.gmra.mxu3 %v1441_v44  ;;  %1463 = vmatmul.bf16.vlgmr.msra.gmra.mxu0 %v1441_v44 }
 0x41e   : > { %1476 = vmatmul.bf16.vlgmr.msra.gmra.mxu1 %v1441_v44  ;;  %1674 = vmatpush.bf16.msra.mxu3 %v3803_v46  ;;  %v729_v44 = vadd.f32 %v4106_v47, %v3952_v54 }
 0x41f   : > { %1751 = vmatpush.bf16.msra.mxu0 %v3759_v4  ;;  %1764 = vmatpush.bf16.msra.mxu1 %v3784_v12 }
 0x422   : > { %1675 = vmatpush.bf16.msra.mxu3 %v3810_v55 }
 0x423   : > { %1752 = vmatpush.bf16.msra.mxu0 %v3762_v6  ;;  %1765 = vmatpush.bf16.msra.mxu1 %v3792_v26 }
 0x426   : > { %1676 = vmatpush.bf16.msra.mxu3 %v3818_v1 }
 0x427   : > { %1753 = vmatpush.bf16.msra.mxu0 %v3765_v15  ;;  %1766 = vmatpush.bf16.msra.mxu1 %v3800_v37 }
 0x42a   : > { %1677 = vmatpush.bf16.msra.mxu3 %v3825_v16 }
 0x42b   : > { %1754 = vmatpush.bf16.msra.mxu0 %v3768_v25  ;;  %1767 = vmatpush.bf16.msra.mxu1 %v3807_v48 }
 0x42e   : > { %1678 = vmatpush.bf16.msra.mxu3 %v3837_v24 }
 0x42f   : > { %1755 = vmatpush.bf16.msra.mxu0 %v3771_v35  ;;  %1768 = vmatpush.bf16.msra.mxu1 %v3814_v58 }
 0x432   : > { %1679 = vmatpush.bf16.msra.mxu3 %v3855_v34 }
 0x433   : > { %1756 = vmatpush.bf16.msra.mxu0 %v3774_v45  ;;  %1769 = vmatpush.bf16.msra.mxu1 %v3821_v3 }
 0x436   : > { %1680 = vmatpush.bf16.msra.mxu3 %v3865_v41 }
 0x437   : > { %1757 = vmatpush.bf16.msra.mxu0 %v3777_v57  ;;  %1770 = vmatpush.bf16.msra.mxu1 %v3828_v17 }
 0x43a   : > { %1681 = vmatpush.bf16.msra.mxu3 %v3873_v49 }
 0x43b   : > { %1758 = vmatpush.bf16.msra.mxu0 %v3780_v8  ;;  %1771 = vmatpush.bf16.msra.mxu1 %v3846_v29 }
 0x49a   : > { %v1464_v9 = vpop.f32.mrf.mxu0 }
 0x49b   : > { %v1501_v36 = vadd.f32 %v1464_v9, %v680_v50  ;;  %v1477_v13 = vpop.f32.mrf.mxu1 }
 0x49c   : > { %v1521_v39 = vadd.f32 %v4271_v60, %v1477_v13 }
 0x49d   : > { %v3001_v38 = vmul.f32 -1.442695, %v1501_v36 }
 0x49f   : > { %3262 = vpow2.f32 %v3001_v38 }
 0x4a0   : > { %v1451_v5 = vpop.f32.mrf.mxu3 }
 0x4a1   : > { %v1481_v14 = vadd.f32 %v1451_v5, %v631_v20 }
 0x4a2   : > { %v1466_v52 = vpop.f32.mrf.mxu0 }
 0x4a3   : > { %v3000_v43 = vmul.f32 -1.442695, %v1481_v14  ;;  %v1479_v28 = vpop.f32.mrf.mxu1 }
 0x4a5   : > { %3264 = vpow2.f32 %v3000_v43  ;;  %v3263_v21 = vpop.eup %3262 }
 0x4a6   : > { %v1505_v53 = vadd.f32 1.0, %v3263_v21 }
 0x4a8   : > { %v1453_v33 = vpop.f32.mrf.mxu3  ;;  %v1517_v20 = vand.u32 2147483648, %v1505_v53  ;;  %vm1511_vm13 = vweird.f32 %v1505_v53  ;;  %v1515_v5 = vand.u32 2147483647, %v1505_v53 }
 0x4a9   : > { %v1531_v33 = vpop.permute.xlu2 %1530 }
 0x4aa   : > { %v1518_v13 = vor.u32 1.1754944e-38, %v1517_v20  ;;  %vm1516_vm15 = vcmp.eq.f32.partialorder %v1515_v5, 8.507059e+37 }
 0x4ab   : > { %v3265_v59 = vpop.eup %3264 }
 0x4ac   : > { %v1485_v42 = vadd.f32 1.0, %v3265_v59 }
 0x4ae   : > { %3266 = vrcp.f32 %v1485_v42  ;;  %v1497_v61 = vand.u32 2147483648, %v1485_v42  ;;  %v1495_v56 = vand.u32 2147483647, %v1485_v42  ;;  %vm1491_vm9 = vweird.f32 %v1485_v42 }
 0x4af   : > { %3268 = vrcp.f32 %v1505_v53 }
 0x4b0   : > { %v1498_v27 = vor.u32 1.1754944e-38, %v1497_v61  ;;  %vm1496_vm11 = vcmp.eq.f32.partialorder %v1495_v56, 8.507059e+37 }
 0x4b4   : > { %v3267_v22 = vpop.eup %3266 }
 0x4b5   : > { %v3269_v62 = vpop.eup %3268  ;;  %v1487_v11 = vmul.f32 %v3267_v22, %v1485_v42  ;;  %vm1492_vm8 = vweird.f32 %v3267_v22 }
 0x4b6   : > { %v1507_v23 = vmul.f32 %v3269_v62, %v1505_v53  ;;  %vm1493_vm10 = vmor %vm1491_vm9, %vm1492_vm8  ;;  %vm1512_vm12 = vweird.f32 %v3269_v62 }
 0x4b7   : > { %v1488_v32 = vsub.f32 1.0, %v1487_v11  ;;  %vm1513_vm14 = vmor %vm1511_vm13, %vm1512_vm12 }
 0x4b8   : > { %v1508_v19 = vsub.f32 1.0, %v1507_v23 }
 0x4b9   : > { %v1489_v10 = vmul.f32 %v3267_v22, %v1488_v32  ;;  %v683_v32 = vadd.f32 %v4010_v2, %v3948_v18 }
 0x4ba   : > { %v1509_v9 = vmul.f32 %v3269_v62, %v1508_v19 }
 0x4bb   : > { %v1490_v7 = vadd.f32 %v3267_v22, %v1489_v10 }
 0x4bc   : > { %v1510_v38 = vadd.f32 %v3269_v62, %v1509_v9 }
 0x4bd   : > { %v1494_v30 = vsel %vm1493_vm10, %v3267_v22, %v1490_v7 }
 0x4be   : > { %v1499_v31 = vsel %vm1496_vm11, %v1498_v27, %v1494_v30  ;;  %v1514_v14 = vsel %vm1513_vm14, %v3269_v62, %v1510_v38  ;;  %v634_v62 = vadd.f32 %v4007_v63, %v3943_v0 }
 0x4bf   : > { %v1522_v50 = vmul.f32 %v1521_v39, %v1499_v31  ;;  %v1519_v28 = vsel %vm1516_vm15, %v1518_v13, %v1514_v14 }
 0x4c1   : > { %v1523_v36 = vadd.f32 %v1522_v50, %v729_v44 }
 0x4c3   : > { %3270 = vtanh.f32 %v1523_v36 }
 0x4c9   : > { %v3271_v52 = vpop.eup %3270 }
 0x4ca   : > { %v1525_v43 = vsub.f32 %v4236_v51, %v3271_v52 }
 0x4cc   : > { %v1526_v21 = vmul.f32 %v1525_v43, %v1519_v28 }
 0x4ce   : > { %v1527_v47 = vadd.f32 %v3271_v52, %v1526_v21 }
 0x4d0   : > { %v1533_v59 = vmul.f32 %v1531_v33, %v1527_v47  ;;  %v1536_v42 = vsub.f32 %v1527_v47, %v4236_v51 }
 0x4d2   : > { %3002 = vst [vmem:[%s3756_s7 + $0x28] sm:$0xff] %v1533_v59  ;;  %v1537_v22 = vmul.f32 %v1536_v42, %v1531_v33  ;;  %v732_v59 = vadd.f32 %v4114_v40, %v3952_v54 }
 0x4d4   : > { %v4280_v11 = vadd.f32 %v1537_v22, %v4236_v51 }
 0x4d6   : > { %v1544_v53 = vpack.c.bf16 %v4280_v11, %v4280_v11 }
 0x4d8   : > { %1553 = vmatmul.bf16.vlgmr.msra.gmra.mxu2 %v1544_v53  ;;  %1566 = vmatmul.bf16.vlgmr.msrb.gmra.mxu3 %v1544_v53 }
 0x4d9   : > { %1579 = vmatmul.bf16.vlgmr.msrb.gmra.mxu0 %v1544_v53  ;;  %1777 = vmatpush.bf16.msra.mxu2 %v3803_v46 }
 0x4da   : > { %1854 = vmatpush.bf16.msrb.mxu3 %v3759_v4  ;;  %1867 = vmatpush.bf16.msrb.mxu0 %v3784_v12 }
 0x4dd   : > { %1778 = vmatpush.bf16.msra.mxu2 %v3810_v55 }
 0x4de   : > { %1855 = vmatpush.bf16.msrb.mxu3 %v3762_v6  ;;  %1868 = vmatpush.bf16.msrb.mxu0 %v3792_v26 }
 0x4e1   : > { %1779 = vmatpush.bf16.msra.mxu2 %v3818_v1 }
 0x4e2   : > { %1856 = vmatpush.bf16.msrb.mxu3 %v3765_v15  ;;  %1869 = vmatpush.bf16.msrb.mxu0 %v3800_v37 }
 0x4e5   : > { %1780 = vmatpush.bf16.msra.mxu2 %v3825_v16 }
 0x4e6   : > { %1857 = vmatpush.bf16.msrb.mxu3 %v3768_v25  ;;  %1870 = vmatpush.bf16.msrb.mxu0 %v3807_v48 }
 0x4e9   : > { %1781 = vmatpush.bf16.msra.mxu2 %v3837_v24 }
 0x4ea   : > { %1858 = vmatpush.bf16.msrb.mxu3 %v3771_v35  ;;  %1871 = vmatpush.bf16.msrb.mxu0 %v3814_v58 }
 0x4ed   : > { %1782 = vmatpush.bf16.msra.mxu2 %v3855_v34 }
 0x4ee   : > { %1859 = vmatpush.bf16.msrb.mxu3 %v3774_v45  ;;  %1872 = vmatpush.bf16.msrb.mxu0 %v3821_v3 }
 0x4f1   : > { %1783 = vmatpush.bf16.msra.mxu2 %v3865_v41 }
 0x4f2   : > { %1860 = vmatpush.bf16.msrb.mxu3 %v3777_v57  ;;  %1873 = vmatpush.bf16.msrb.mxu0 %v3828_v17 }
 0x4f5   : > { %1784 = vmatpush.bf16.msra.mxu2 %v3873_v49 }
 0x4f6   : > { %1861 = vmatpush.bf16.msrb.mxu3 %v3780_v8  ;;  %1874 = vmatpush.bf16.msrb.mxu0 %v3846_v29 }
 0x556   : > { %v1580_v51 = vpop.f32.mrf.mxu0 }
 0x557   : > { %v1624_v21 = vadd.f32 %v4271_v60, %v1580_v51 }
 0x55b   : > { %v1554_v23 = vpop.f32.mrf.mxu2  ;;  %v1567_v61 = vpop.f32.mrf.mxu3 }
 0x55c   : > { %v1584_v10 = vadd.f32 %v1554_v23, %v634_v62  ;;  %v1604_v56 = vadd.f32 %v1567_v61, %v683_v32 }
 0x55e   : > { %v3004_v7 = vmul.f32 -1.442695, %v1584_v10  ;;  %v3005_v19 = vmul.f32 -1.442695, %v1604_v56  ;;  %v1582_v27 = vpop.f32.mrf.mxu0 }
 0x55f   : > { %v1634_v27 = vpop.permute.xlu0 %1633 }
 0x560   : > { %3272 = vpow2.f32 %v3004_v7 }
 0x561   : > { %3274 = vpow2.f32 %v3005_v19 }
 0x563   : > { %v1556_v39 = vpop.f32.mrf.mxu2  ;;  %v1569_v30 = vpop.f32.mrf.mxu3 }
 0x566   : > { %v3273_v31 = vpop.eup %3272 }
 0x567   : > { %v3275_v44 = vpop.eup %3274  ;;  %v1588_v50 = vadd.f32 1.0, %v3273_v31 }
 0x568   : > { %v1608_v9 = vadd.f32 1.0, %v3275_v44 }
 0x569   : > { %3276 = vrcp.f32 %v1588_v50  ;;  %v1600_v20 = vand.u32 2147483648, %v1588_v50  ;;  %v1598_v52 = vand.u32 2147483647, %v1588_v50  ;;  %vm1594_vm1 = vweird.f32 %v1588_v50 }
 0x56a   : > { %3278 = vrcp.f32 %v1608_v9  ;;  %v1620_v32 = vand.u32 2147483648, %v1608_v9  ;;  %vm1614_vm5 = vweird.f32 %v1608_v9  ;;  %v1618_v23 = vand.u32 2147483647, %v1608_v9 }
 0x56b   : > { %v1601_v43 = vor.u32 1.1754944e-38, %v1600_v20  ;;  %vm1599_vm3 = vcmp.eq.f32.partialorder %v1598_v52, 8.507059e+37 }
 0x56c   : > { %v1621_v51 = vor.u32 1.1754944e-38, %v1620_v32  ;;  %vm1619_vm7 = vcmp.eq.f32.partialorder %v1618_v23, 8.507059e+37 }
 0x56f   : > { %v3277_v63 = vpop.eup %3276 }
 0x570   : > { %v3279_v36 = vpop.eup %3278  ;;  %v1590_v2 = vmul.f32 %v3277_v63, %v1588_v50  ;;  %vm1595_vm0 = vweird.f32 %v3277_v63 }
 0x571   : > { %v1610_v5 = vmul.f32 %v3279_v36, %v1608_v9  ;;  %vm1596_vm2 = vmor %vm1594_vm1, %vm1595_vm0  ;;  %vm1615_vm4 = vweird.f32 %v3279_v36 }
 0x572   : > { %v1591_v38 = vsub.f32 1.0, %v1590_v2  ;;  %vm1616_vm6 = vmor %vm1614_vm5, %vm1615_vm4 }
 0x573   : > { %v1611_v28 = vsub.f32 1.0, %v1610_v5 }
 0x574   : > { %v1592_v14 = vmul.f32 %v3277_v63, %v1591_v38  ;;  %v4717_v38 = vld [vmem:[#allocation20_spill] sm:$0xff] }
 0x575   : > { %v1612_v22 = vmul.f32 %v3279_v36, %v1611_v28  ;;  %v685_v20 = vadd.f32 %v4717_v38, %v3948_v18 }
 0x576   : > { %v1593_v13 = vadd.f32 %v3277_v63, %v1592_v14 }
 0x577   : > { %v1613_v62 = vadd.f32 %v3279_v36, %v1612_v22 }
 0x578   : > { %v1597_v47 = vsel %vm1596_vm2, %v3277_v63, %v1593_v13 }
 0x579   : > { %v1602_v33 = vsel %vm1599_vm3, %v1601_v43, %v1597_v47  ;;  %v1617_v61 = vsel %vm1616_vm6, %v3279_v36, %v1613_v62 }
 0x57a   : > { %v1625_v42 = vmul.f32 %v1624_v21, %v1602_v33  ;;  %v1622_v7 = vsel %vm1619_vm7, %v1621_v51, %v1617_v61 }
 0x57c   : > { %v1626_v53 = vadd.f32 %v1625_v42, %v732_v59 }
 0x57e   : > { %3280 = vtanh.f32 %v1626_v53 }
 0x584   : > { %v3281_v10 = vpop.eup %3280 }
 0x585   : > { %v1628_v56 = vsub.f32 %v4280_v11, %v3281_v10 }
 0x587   : > { %v1629_v19 = vmul.f32 %v1628_v56, %v1622_v7 }
 0x589   : > { %v1630_v40 = vadd.f32 %v3281_v10, %v1629_v19 }
 0x58b   : > { %v1636_v39 = vmul.f32 %v1634_v27, %v1630_v40  ;;  %v1639_v30 = vsub.f32 %v1630_v40, %v4280_v11 }
 0x58d   : > { %3006 = vst [vmem:[%s3756_s7 + $0x30] sm:$0xff] %v1636_v39  ;;  %v1640_v31 = vmul.f32 %v1639_v30, %v1634_v27  ;;  %v4718_v30 = vld [vmem:[#allocation37_spill] sm:$0xff] }
 0x58f   : > { %v4319_v44 = vadd.f32 %v1640_v31, %v4280_v11  ;;  %v4716_v11 = vld [vmem:[#allocation19_spill] sm:$0xff]  ;;  %v734_v31 = vadd.f32 %v4718_v30, %v3952_v54 }
 0x590   : > { %v636_v9 = vadd.f32 %v4716_v11, %v3943_v0 }
 0x591   : > { %v1647_v50 = vpack.c.bf16 %v4319_v44, %v4319_v44 }
 0x593   : > { %1656 = vmatmul.bf16.vlgmr.msrb.gmra.mxu1 %v1647_v50  ;;  %1669 = vmatmul.bf16.vlgmr.msrb.gmra.mxu2 %v1647_v50 }
 0x594   : > { %1682 = vmatmul.bf16.vlgmr.msra.gmra.mxu3 %v1647_v50  ;;  %1880 = vmatpush.bf16.msrb.mxu1 %v3803_v46 }
 0x595   : > { %1957 = vmatpush.bf16.msrb.mxu2 %v3759_v4  ;;  %1970 = vmatpush.bf16.msra.mxu3 %v3784_v12 }
 0x598   : > { %1881 = vmatpush.bf16.msrb.mxu1 %v3810_v55 }
 0x599   : > { %1958 = vmatpush.bf16.msrb.mxu2 %v3762_v6  ;;  %1971 = vmatpush.bf16.msra.mxu3 %v3792_v26 }
 0x59c   : > { %1882 = vmatpush.bf16.msrb.mxu1 %v3818_v1 }
 0x59d   : > { %1959 = vmatpush.bf16.msrb.mxu2 %v3765_v15  ;;  %1972 = vmatpush.bf16.msra.mxu3 %v3800_v37 }
 0x5a0   : > { %1883 = vmatpush.bf16.msrb.mxu1 %v3825_v16 }
 0x5a1   : > { %1960 = vmatpush.bf16.msrb.mxu2 %v3768_v25  ;;  %1973 = vmatpush.bf16.msra.mxu3 %v3807_v48 }
 0x5a4   : > { %1884 = vmatpush.bf16.msrb.mxu1 %v3837_v24 }
 0x5a5   : > { %1961 = vmatpush.bf16.msrb.mxu2 %v3771_v35  ;;  %1974 = vmatpush.bf16.msra.mxu3 %v3814_v58 }
 0x5a8   : > { %1885 = vmatpush.bf16.msrb.mxu1 %v3855_v34 }
 0x5a9   : > { %1962 = vmatpush.bf16.msrb.mxu2 %v3774_v45  ;;  %1975 = vmatpush.bf16.msra.mxu3 %v3821_v3 }
 0x5ac   : > { %1886 = vmatpush.bf16.msrb.mxu1 %v3865_v41 }
 0x5ad   : > { %1963 = vmatpush.bf16.msrb.mxu2 %v3777_v57  ;;  %1976 = vmatpush.bf16.msra.mxu3 %v3828_v17 }
 0x5b0   : > { %1887 = vmatpush.bf16.msrb.mxu1 %v3873_v49 }
 0x5b1   : > { %1964 = vmatpush.bf16.msrb.mxu2 %v3780_v8  ;;  %1977 = vmatpush.bf16.msra.mxu3 %v3846_v29 }
 0x610   : > { %v1657_v63 = vpop.f32.mrf.mxu1 }
 0x611   : > { %v1687_v36 = vadd.f32 %v1657_v63, %v636_v9 }
 0x613   : > { %v3008_v2 = vmul.f32 -1.442695, %v1687_v36 }
 0x615   : > { %3282 = vpow2.f32 %v3008_v2 }
 0x616   : > { %v1670_v5 = vpop.f32.mrf.mxu2 }
 0x617   : > { %v1707_v14 = vadd.f32 %v1670_v5, %v685_v20  ;;  %v1683_v52 = vpop.f32.mrf.mxu3 }
 0x618   : > { %v1659_v13 = vpop.f32.mrf.mxu1  ;;  %v1727_v27 = vadd.f32 %v4271_v60, %v1683_v52 }
 0x619   : > { %v3009_v43 = vmul.f32 -1.442695, %v1707_v14 }
 0x61b   : > { %v3283_v28 = vpop.eup %3282  ;;  %3284 = vpow2.f32 %v3009_v43 }
 0x61c   : > { %v1691_v21 = vadd.f32 1.0, %v3283_v28  ;;  %v1737_v28 = vpop.permute.xlu1 %1736 }
 0x61e   : > { %3286 = vrcp.f32 %v1691_v21  ;;  %v1672_v47 = vpop.f32.mrf.mxu2  ;;  %v1703_v32 = vand.u32 2147483648, %v1691_v21  ;;  %v1701_v61 = vand.u32 2147483647, %v1691_v21  ;;  %vm1697_vm9 = vweird.f32 %v1691_v21 }
 0x61f   : > { %v1685_v33 = vpop.f32.mrf.mxu3 }
 0x620   : > { %v1704_v7 = vor.u32 1.1754944e-38, %v1703_v32  ;;  %vm1702_vm11 = vcmp.eq.f32.partialorder %v1701_v61, 8.507059e+37 }
 0x621   : > { %v3285_v59 = vpop.eup %3284 }
 0x622   : > { %v1711_v42 = vadd.f32 1.0, %v3285_v59 }
 0x624   : > { %v3287_v22 = vpop.eup %3286  ;;  %3288 = vrcp.f32 %v1711_v42  ;;  %v1723_v36 = vand.u32 2147483648, %v1711_v42  ;;  %vm1717_vm13 = vweird.f32 %v1711_v42  ;;  %v1721_v2 = vand.u32 2147483647, %v1711_v42 }
 0x625   : > { %v1693_v53 = vmul.f32 %v3287_v22, %v1691_v21  ;;  %vm1698_vm8 = vweird.f32 %v3287_v22 }
 0x626   : > { %vm1699_vm10 = vmor %vm1697_vm9, %vm1698_vm8  ;;  %v1724_v5 = vor.u32 1.1754944e-38, %v1723_v36  ;;  %vm1722_vm15 = vcmp.eq.f32.partialorder %v1721_v2, 8.507059e+37 }
 0x627   : > { %v1694_v62 = vsub.f32 1.0, %v1693_v53  ;;  %v4720_v53 = vld [vmem:[#allocation22_spill] sm:$0xff] }
 0x629   : > { %v1695_v23 = vmul.f32 %v3287_v22, %v1694_v62  ;;  %v688_v62 = vadd.f32 %v4720_v53, %v3948_v18 }
 0x62a   : > { %v3289_v10 = vpop.eup %3288 }
 0x62b   : > { %v1713_v51 = vmul.f32 %v3289_v10, %v1711_v42  ;;  %v1696_v56 = vadd.f32 %v3287_v22, %v1695_v23  ;;  %vm1718_vm12 = vweird.f32 %v3289_v10 }
 0x62c   : > { %vm1719_vm14 = vmor %vm1717_vm13, %vm1718_vm12 }
 0x62d   : > { %v1714_v19 = vsub.f32 1.0, %v1713_v51  ;;  %v1700_v40 = vsel %vm1699_vm10, %v3287_v22, %v1696_v56 }
 0x62e   : > { %v1705_v39 = vsel %vm1702_vm11, %v1704_v7, %v1700_v40 }
 0x62f   : > { %v1728_v50 = vmul.f32 %v1727_v27, %v1705_v39  ;;  %v1715_v11 = vmul.f32 %v3289_v10, %v1714_v19 }
 0x631   : > { %v1729_v9 = vadd.f32 %v1728_v50, %v734_v31  ;;  %v1716_v63 = vadd.f32 %v3289_v10, %v1715_v11 }
 0x633   : > { %3290 = vtanh.f32 %v1729_v9  ;;  %v1720_v38 = vsel %vm1719_vm14, %v3289_v10, %v1716_v63 }
 0x634   : > { %v1725_v52 = vsel %vm1722_vm15, %v1724_v5, %v1720_v38 }
 0x639   : > { %v3291_v20 = vpop.eup %3290 }
 0x63a   : > { %v1731_v14 = vsub.f32 %v4319_v44, %v3291_v20 }
 0x63c   : > { %v1732_v13 = vmul.f32 %v1731_v14, %v1725_v52 }
 0x63e   : > { %v1733_v43 = vadd.f32 %v3291_v20, %v1732_v13 }
 0x640   : > { %v1739_v21 = vmul.f32 %v1737_v28, %v1733_v43  ;;  %v1742_v47 = vsub.f32 %v1733_v43, %v4319_v44 }
 0x642   : > { %3010 = vst [vmem:[%s3756_s7 + $0x38] sm:$0xff] %v1739_v21  ;;  %v1743_v33 = vmul.f32 %v1742_v47, %v1737_v28  ;;  %v4721_v47 = vld [vmem:[#allocation38_spill] sm:$0xff] }
 0x644   : > { %v4358_v59 = vadd.f32 %v1743_v33, %v4319_v44  ;;  %v4719_v44 = vld [vmem:[#allocation21_spill] sm:$0xff]  ;;  %v737_v33 = vadd.f32 %v4721_v47, %v3952_v54 }
 0x645   : > { %v639_v22 = vadd.f32 %v4719_v44, %v3943_v0 }
 0x646   : > { %v1750_v42 = vpack.c.bf16 %v4358_v59, %v4358_v59 }
 0x648   : > { %1759 = vmatmul.bf16.vlgmr.msra.gmra.mxu0 %v1750_v42  ;;  %1772 = vmatmul.bf16.vlgmr.msra.gmra.mxu1 %v1750_v42 }
 0x649   : > { %1785 = vmatmul.bf16.vlgmr.msra.gmra.mxu2 %v1750_v42  ;;  %1983 = vmatpush.bf16.msra.mxu0 %v3803_v46 }
 0x64a   : > { %2060 = vmatpush.bf16.msra.mxu1 %v3759_v4  ;;  %2073 = vmatpush.bf16.msra.mxu2 %v3784_v12 }
 0x64d   : > { %1984 = vmatpush.bf16.msra.mxu0 %v3810_v55 }
 0x64e   : > { %2061 = vmatpush.bf16.msra.mxu1 %v3762_v6  ;;  %2074 = vmatpush.bf16.msra.mxu2 %v3792_v26 }
 0x651   : > { %1985 = vmatpush.bf16.msra.mxu0 %v3818_v1 }
 0x652   : > { %2062 = vmatpush.bf16.msra.mxu1 %v3765_v15  ;;  %2075 = vmatpush.bf16.msra.mxu2 %v3800_v37 }
 0x655   : > { %1986 = vmatpush.bf16.msra.mxu0 %v3825_v16 }
 0x656   : > { %2063 = vmatpush.bf16.msra.mxu1 %v3768_v25  ;;  %2076 = vmatpush.bf16.msra.mxu2 %v3807_v48 }
 0x659   : > { %1987 = vmatpush.bf16.msra.mxu0 %v3837_v24 }
 0x65a   : > { %2064 = vmatpush.bf16.msra.mxu1 %v3771_v35  ;;  %2077 = vmatpush.bf16.msra.mxu2 %v3814_v58 }
 0x65d   : > { %1988 = vmatpush.bf16.msra.mxu0 %v3855_v34 }
 0x65e   : > { %2065 = vmatpush.bf16.msra.mxu1 %v3774_v45  ;;  %2078 = vmatpush.bf16.msra.mxu2 %v3821_v3 }
 0x661   : > { %1989 = vmatpush.bf16.msra.mxu0 %v3865_v41 }
 0x662   : > { %2066 = vmatpush.bf16.msra.mxu1 %v3777_v57  ;;  %2079 = vmatpush.bf16.msra.mxu2 %v3828_v17 }
 0x665   : > { %1990 = vmatpush.bf16.msra.mxu0 %v3873_v49 }
 0x666   : > { %2067 = vmatpush.bf16.msra.mxu1 %v3780_v8  ;;  %2080 = vmatpush.bf16.msra.mxu2 %v3846_v29 }
 0x6c5   : > { %v1760_v32 = vpop.f32.mrf.mxu0  ;;  %v1773_v23 = vpop.f32.mrf.mxu1 }
 0x6c6   : > { %v1790_v61 = vadd.f32 %v1760_v32, %v639_v22  ;;  %v1810_v10 = vadd.f32 %v1773_v23, %v688_v62 }
 0x6c8   : > { %v3012_v51 = vmul.f32 -1.442695, %v1790_v61  ;;  %v3013_v56 = vmul.f32 -1.442695, %v1810_v10 }
 0x6ca   : > { %3292 = vpow2.f32 %v3012_v51 }
 0x6cb   : > { %3294 = vpow2.f32 %v3013_v56 }
 0x6cc   : > { %v1786_v7 = vpop.f32.mrf.mxu2 }
 0x6cd   : > { %v1762_v19 = vpop.f32.mrf.mxu0  ;;  %v1775_v40 = vpop.f32.mrf.mxu1  ;;  %v1830_v28 = vadd.f32 %v4271_v60, %v1786_v7 }
 0x6ce   : > { %v1840_v40 = vpop.permute.xlu2 %1839 }
 0x6d0   : > { %v3293_v27 = vpop.eup %3292 }
 0x6d1   : > { %v3295_v39 = vpop.eup %3294  ;;  %v1794_v30 = vadd.f32 1.0, %v3293_v27 }
 0x6d2   : > { %v1814_v31 = vadd.f32 1.0, %v3295_v39 }
 0x6d3   : > { %3296 = vrcp.f32 %v1794_v30  ;;  %v1806_v38 = vand.u32 2147483648, %v1794_v30  ;;  %v1804_v5 = vand.u32 2147483647, %v1794_v30  ;;  %vm1800_vm1 = vweird.f32 %v1794_v30 }
 0x6d4   : > { %3298 = vrcp.f32 %v1814_v31  ;;  %v1788_v50 = vpop.f32.mrf.mxu2  ;;  %v1826_v62 = vand.u32 2147483648, %v1814_v31  ;;  %vm1820_vm5 = vweird.f32 %v1814_v31  ;;  %v1824_v32 = vand.u32 2147483647, %v1814_v31 }
 0x6d5   : > { %v1807_v13 = vor.u32 1.1754944e-38, %v1806_v38  ;;  %vm1805_vm3 = vcmp.eq.f32.partialorder %v1804_v5, 8.507059e+37  ;;  %v4723_v38 = vld [vmem:[#allocation23_spill] sm:$0xff] }
 0x6d6   : > { %v1827_v10 = vor.u32 1.1754944e-38, %v1826_v62  ;;  %vm1825_vm7 = vcmp.eq.f32.partialorder %v1824_v32, 8.507059e+37 }
 0x6d9   : > { %v3297_v11 = vpop.eup %3296 }
 0x6da   : > { %v3299_v9 = vpop.eup %3298  ;;  %v1796_v63 = vmul.f32 %v3297_v11, %v1794_v30  ;;  %vm1801_vm0 = vweird.f32 %v3297_v11 }
 0x6db   : > { %v1816_v2 = vmul.f32 %v3299_v9, %v1814_v31  ;;  %vm1802_vm2 = vmor %vm1800_vm1, %vm1801_vm0  ;;  %vm1821_vm4 = vweird.f32 %v3299_v9 }
 0x6dc   : > { %v1797_v36 = vsub.f32 1.0, %v1796_v63  ;;  %vm1822_vm6 = vmor %vm1820_vm5, %vm1821_vm4 }
 0x6dd   : > { %v1817_v52 = vsub.f32 1.0, %v1816_v2 }
 0x6de   : > { %v1798_v20 = vmul.f32 %v3297_v11, %v1797_v36 }
 0x6df   : > { %v1818_v44 = vmul.f32 %v3299_v9, %v1817_v52 }
 0x6e0   : > { %v1799_v14 = vadd.f32 %v3297_v11, %v1798_v20  ;;  %v641_v20 = vadd.f32 %v4723_v38, %v3943_v0 }
 0x6e1   : > { %v1819_v53 = vadd.f32 %v3299_v9, %v1818_v44 }
 0x6e2   : > { %v1803_v43 = vsel %vm1802_vm2, %v3297_v11, %v1799_v14 }
 0x6e3   : > { %v1808_v21 = vsel %vm1805_vm3, %v1807_v13, %v1803_v43  ;;  %v1823_v23 = vsel %vm1822_vm6, %v3299_v9, %v1819_v53 }
 0x6e4   : > { %v1831_v42 = vmul.f32 %v1830_v28, %v1808_v21  ;;  %v1828_v56 = vsel %vm1825_vm7, %v1827_v10, %v1823_v23 }
 0x6e6   : > { %v1832_v22 = vadd.f32 %v1831_v42, %v737_v33 }
 0x6e8   : > { %3300 = vtanh.f32 %v1832_v22 }
 0x6ee   : > { %v3301_v61 = vpop.eup %3300 }
 0x6ef   : > { %v1834_v51 = vsub.f32 %v4358_v59, %v3301_v61 }
 0x6f1   : > { %v1835_v7 = vmul.f32 %v1834_v51, %v1828_v56 }
 0x6f3   : > { %v1836_v19 = vadd.f32 %v3301_v61, %v1835_v7 }
 0x6f5   : > { %v1842_v27 = vmul.f32 %v1840_v40, %v1836_v19  ;;  %v1845_v39 = vsub.f32 %v1836_v19, %v4358_v59 }
 0x6f7   : > { %3014 = vst [vmem:[%s3756_s7 + $0x40] sm:$0xff] %v1842_v27  ;;  %v1846_v30 = vmul.f32 %v1845_v39, %v1840_v40  ;;  %v4724_v39 = vld [vmem:[#allocation39_spill] sm:$0xff] }
 0x6f9   : > { %v4397_v50 = vadd.f32 %v1846_v30, %v4358_v59  ;;  %v4722_v59 = vld [vmem:[#allocation24_spill] sm:$0xff]  ;;  %v739_v30 = vadd.f32 %v4724_v39, %v3952_v54 }
 0x6fa   : > { %v690_v11 = vadd.f32 %v4722_v59, %v3948_v18 }
 0x6fb   : > { %v1853_v31 = vpack.c.bf16 %v4397_v50, %v4397_v50 }
 0x6fd   : > { %1862 = vmatmul.bf16.vlgmr.msrb.gmra.mxu3 %v1853_v31  ;;  %1875 = vmatmul.bf16.vlgmr.msrb.gmra.mxu0 %v1853_v31 }
 0x6fe   : > { %1888 = vmatmul.bf16.vlgmr.msrb.gmra.mxu1 %v1853_v31  ;;  %2086 = vmatpush.bf16.msrb.mxu3 %v3803_v46 }
 0x6ff   : > { %2163 = vmatpush.bf16.msrb.mxu0 %v3759_v4  ;;  %2176 = vmatpush.bf16.msrb.mxu1 %v3784_v12 }
 0x702   : > { %2087 = vmatpush.bf16.msrb.mxu3 %v3810_v55 }
 0x703   : > { %2164 = vmatpush.bf16.msrb.mxu0 %v3762_v6  ;;  %2177 = vmatpush.bf16.msrb.mxu1 %v3792_v26 }
 0x706   : > { %2088 = vmatpush.bf16.msrb.mxu3 %v3818_v1 }
 0x707   : > { %2165 = vmatpush.bf16.msrb.mxu0 %v3765_v15  ;;  %2178 = vmatpush.bf16.msrb.mxu1 %v3800_v37 }
 0x70a   : > { %2089 = vmatpush.bf16.msrb.mxu3 %v3825_v16 }
 0x70b   : > { %2166 = vmatpush.bf16.msrb.mxu0 %v3768_v25  ;;  %2179 = vmatpush.bf16.msrb.mxu1 %v3807_v48 }
 0x70e   : > { %2090 = vmatpush.bf16.msrb.mxu3 %v3837_v24 }
 0x70f   : > { %2167 = vmatpush.bf16.msrb.mxu0 %v3771_v35  ;;  %2180 = vmatpush.bf16.msrb.mxu1 %v3814_v58 }
 0x712   : > { %2091 = vmatpush.bf16.msrb.mxu3 %v3855_v34 }
 0x713   : > { %2168 = vmatpush.bf16.msrb.mxu0 %v3774_v45  ;;  %2181 = vmatpush.bf16.msrb.mxu1 %v3821_v3 }
 0x716   : > { %2092 = vmatpush.bf16.msrb.mxu3 %v3865_v41 }
 0x717   : > { %2169 = vmatpush.bf16.msrb.mxu0 %v3777_v57  ;;  %2182 = vmatpush.bf16.msrb.mxu1 %v3828_v17 }
 0x71a   : > { %2093 = vmatpush.bf16.msrb.mxu3 %v3873_v49 }
 0x71b   : > { %2170 = vmatpush.bf16.msrb.mxu0 %v3780_v8  ;;  %2183 = vmatpush.bf16.msrb.mxu1 %v3846_v29 }
 0x77a   : > { %v1876_v9 = vpop.f32.mrf.mxu0 }
 0x77b   : > { %v1913_v63 = vadd.f32 %v1876_v9, %v690_v11  ;;  %v1889_v36 = vpop.f32.mrf.mxu1 }
 0x77c   : > { %v1933_v19 = vadd.f32 %v4271_v60, %v1889_v36 }
 0x77d   : > { %v3017_v2 = vmul.f32 -1.442695, %v1913_v63 }
 0x77f   : > { %3302 = vpow2.f32 %v3017_v2 }
 0x780   : > { %v1863_v5 = vpop.f32.mrf.mxu3 }
 0x781   : > { %v1893_v14 = vadd.f32 %v1863_v5, %v641_v20 }
 0x782   : > { %v1878_v52 = vpop.f32.mrf.mxu0 }
 0x783   : > { %v3016_v13 = vmul.f32 -1.442695, %v1893_v14  ;;  %v1891_v43 = vpop.f32.mrf.mxu1 }
 0x784   : > { %v1943_v43 = vpop.permute.xlu0 %1942 }
 0x785   : > { %3304 = vpow2.f32 %v3016_v13  ;;  %v3303_v28 = vpop.eup %3302 }
 0x786   : > { %v1917_v33 = vadd.f32 1.0, %v3303_v28 }
 0x788   : > { %v1865_v21 = vpop.f32.mrf.mxu3  ;;  %v1929_v63 = vand.u32 2147483648, %v1917_v33  ;;  %vm1923_vm13 = vweird.f32 %v1917_v33  ;;  %v1927_v2 = vand.u32 2147483647, %v1917_v33 }
 0x78a   : > { %v1930_v36 = vor.u32 1.1754944e-38, %v1929_v63  ;;  %vm1928_vm15 = vcmp.eq.f32.partialorder %v1927_v2, 8.507059e+37 }
 0x78b   : > { %v3305_v47 = vpop.eup %3304 }
 0x78c   : > { %v1897_v42 = vadd.f32 1.0, %v3305_v47 }
 0x78e   : > { %3306 = vrcp.f32 %v1897_v42  ;;  %v1909_v23 = vand.u32 2147483648, %v1897_v42  ;;  %v1907_v10 = vand.u32 2147483647, %v1897_v42  ;;  %vm1903_vm9 = vweird.f32 %v1897_v42 }
 0x78f   : > { %3308 = vrcp.f32 %v1917_v33 }
 0x790   : > { %v1910_v7 = vor.u32 1.1754944e-38, %v1909_v23  ;;  %vm1908_vm11 = vcmp.eq.f32.partialorder %v1907_v10, 8.507059e+37 }
 0x794   : > { %v3307_v44 = vpop.eup %3306 }
 0x795   : > { %v3309_v22 = vpop.eup %3308  ;;  %v1899_v53 = vmul.f32 %v3307_v44, %v1897_v42  ;;  %vm1904_vm8 = vweird.f32 %v3307_v44 }
 0x796   : > { %v1919_v32 = vmul.f32 %v3309_v22, %v1917_v33  ;;  %vm1905_vm10 = vmor %vm1903_vm9, %vm1904_vm8  ;;  %vm1924_vm12 = vweird.f32 %v3309_v22 }
 0x797   : > { %v1900_v62 = vsub.f32 1.0, %v1899_v53  ;;  %vm1925_vm14 = vmor %vm1923_vm13, %vm1924_vm12  ;;  %v4726_v53 = vld [vmem:[#allocation26_spill] sm:$0xff] }
 0x798   : > { %v1920_v56 = vsub.f32 1.0, %v1919_v32 }
 0x799   : > { %v1901_v61 = vmul.f32 %v3307_v44, %v1900_v62  ;;  %v693_v62 = vadd.f32 %v4726_v53, %v3948_v18 }
 0x79a   : > { %v1921_v59 = vmul.f32 %v3309_v22, %v1920_v56 }
 0x79b   : > { %v1902_v51 = vadd.f32 %v3307_v44, %v1901_v61 }
 0x79c   : > { %v1922_v9 = vadd.f32 %v3309_v22, %v1921_v59 }
 0x79d   : > { %v1906_v40 = vsel %vm1905_vm10, %v3307_v44, %v1902_v51  ;;  %v4725_v44 = vld [vmem:[#allocation25_spill] sm:$0xff] }
 0x79e   : > { %v1911_v27 = vsel %vm1908_vm11, %v1910_v7, %v1906_v40  ;;  %v1926_v38 = vsel %vm1925_vm14, %v3309_v22, %v1922_v9  ;;  %v644_v22 = vadd.f32 %v4725_v44, %v3943_v0 }
 0x79f   : > { %v1934_v31 = vmul.f32 %v1933_v19, %v1911_v27  ;;  %v1931_v14 = vsel %vm1928_vm15, %v1930_v36, %v1926_v38 }
 0x7a1   : > { %v1935_v11 = vadd.f32 %v1934_v31, %v739_v30 }
 0x7a3   : > { %3310 = vtanh.f32 %v1935_v11 }
 0x7a9   : > { %v3311_v20 = vpop.eup %3310 }
 0x7aa   : > { %v1937_v5 = vsub.f32 %v4397_v50, %v3311_v20 }
 0x7ac   : > { %v1938_v52 = vmul.f32 %v1937_v5, %v1931_v14 }
 0x7ae   : > { %v1939_v13 = vadd.f32 %v3311_v20, %v1938_v52 }
 0x7b0   : > { %v1945_v28 = vmul.f32 %v1943_v43, %v1939_v13  ;;  %v1948_v21 = vsub.f32 %v1939_v13, %v4397_v50 }
 0x7b2   : > { %3018 = vst [vmem:[%s3756_s7 + $0x48] sm:$0xff] %v1945_v28  ;;  %v1949_v47 = vmul.f32 %v1948_v21, %v1943_v43  ;;  %v4727_v21 = vld [vmem:[#allocation40_spill] sm:$0xff] }
 0x7b4   : > { %v4436_v42 = vadd.f32 %v1949_v47, %v4397_v50  ;;  %v742_v47 = vadd.f32 %v4727_v21, %v3952_v54 }
 0x7b6   : > { %v1956_v33 = vpack.c.bf16 %v4436_v42, %v4436_v42 }
 0x7b8   : > { %1965 = vmatmul.bf16.vlgmr.msrb.gmra.mxu2 %v1956_v33  ;;  %1978 = vmatmul.bf16.vlgmr.msra.gmra.mxu3 %v1956_v33 }
 0x7b9   : > { %1991 = vmatmul.bf16.vlgmr.msra.gmra.mxu0 %v1956_v33  ;;  %2189 = vmatpush.bf16.msrb.mxu2 %v3803_v46 }
 0x7ba   : > { %2266 = vmatpush.bf16.msra.mxu3 %v3759_v4  ;;  %2279 = vmatpush.bf16.msra.mxu0 %v3784_v12 }
 0x7bd   : > { %2190 = vmatpush.bf16.msrb.mxu2 %v3810_v55 }
 0x7be   : > { %2267 = vmatpush.bf16.msra.mxu3 %v3762_v6  ;;  %2280 = vmatpush.bf16.msra.mxu0 %v3792_v26 }
 0x7c1   : > { %2191 = vmatpush.bf16.msrb.mxu2 %v3818_v1 }
 0x7c2   : > { %2268 = vmatpush.bf16.msra.mxu3 %v3765_v15  ;;  %2281 = vmatpush.bf16.msra.mxu0 %v3800_v37 }
 0x7c5   : > { %2192 = vmatpush.bf16.msrb.mxu2 %v3825_v16 }
 0x7c6   : > { %2269 = vmatpush.bf16.msra.mxu3 %v3768_v25  ;;  %2282 = vmatpush.bf16.msra.mxu0 %v3807_v48 }
 0x7c9   : > { %2193 = vmatpush.bf16.msrb.mxu2 %v3837_v24 }
 0x7ca   : > { %2270 = vmatpush.bf16.msra.mxu3 %v3771_v35  ;;  %2283 = vmatpush.bf16.msra.mxu0 %v3814_v58 }
 0x7cd   : > { %2194 = vmatpush.bf16.msrb.mxu2 %v3855_v34 }
 0x7ce   : > { %2271 = vmatpush.bf16.msra.mxu3 %v3774_v45  ;;  %2284 = vmatpush.bf16.msra.mxu0 %v3821_v3 }
 0x7d1   : > { %2195 = vmatpush.bf16.msrb.mxu2 %v3865_v41 }
 0x7d2   : > { %2272 = vmatpush.bf16.msra.mxu3 %v3777_v57  ;;  %2285 = vmatpush.bf16.msra.mxu0 %v3828_v17 }
 0x7d5   : > { %2196 = vmatpush.bf16.msrb.mxu2 %v3873_v49 }
 0x7d6   : > { %2273 = vmatpush.bf16.msra.mxu3 %v3780_v8  ;;  %2286 = vmatpush.bf16.msra.mxu0 %v3846_v29 }
 0x836   : > { %v1992_v50 = vpop.f32.mrf.mxu0 }
 0x837   : > { %v2036_v13 = vadd.f32 %v4271_v60, %v1992_v50 }
 0x83b   : > { %v1966_v32 = vpop.f32.mrf.mxu2  ;;  %v1979_v23 = vpop.f32.mrf.mxu3 }
 0x83c   : > { %v1996_v61 = vadd.f32 %v1966_v32, %v644_v22  ;;  %v2016_v10 = vadd.f32 %v1979_v23, %v693_v62 }
 0x83e   : > { %v3020_v51 = vmul.f32 -1.442695, %v1996_v61  ;;  %v3021_v56 = vmul.f32 -1.442695, %v2016_v10  ;;  %v1994_v7 = vpop.f32.mrf.mxu0 }
 0x83f   : > { %v2046_v7 = vpop.permute.xlu1 %2045 }
 0x840   : > { %3312 = vpow2.f32 %v3020_v51 }
 0x841   : > { %3314 = vpow2.f32 %v3021_v56 }
 0x843   : > { %v1968_v19 = vpop.f32.mrf.mxu2  ;;  %v1981_v40 = vpop.f32.mrf.mxu3 }
 0x846   : > { %v3313_v27 = vpop.eup %3312 }
 0x847   : > { %v3315_v39 = vpop.eup %3314  ;;  %v2000_v30 = vadd.f32 1.0, %v3313_v27 }
 0x848   : > { %v2020_v31 = vadd.f32 1.0, %v3315_v39 }
 0x849   : > { %3316 = vrcp.f32 %v2000_v30  ;;  %v2012_v2 = vand.u32 2147483648, %v2000_v30  ;;  %v2010_v36 = vand.u32 2147483647, %v2000_v30  ;;  %vm2006_vm1 = vweird.f32 %v2000_v30 }
 0x84a   : > { %3318 = vrcp.f32 %v2020_v31  ;;  %v2032_v62 = vand.u32 2147483648, %v2020_v31  ;;  %vm2026_vm5 = vweird.f32 %v2020_v31  ;;  %v2030_v32 = vand.u32 2147483647, %v2020_v31 }
 0x84b   : > { %v2013_v14 = vor.u32 1.1754944e-38, %v2012_v2  ;;  %vm2011_vm3 = vcmp.eq.f32.partialorder %v2010_v36, 8.507059e+37 }
 0x84c   : > { %v2033_v60 = vor.u32 1.1754944e-38, %v2032_v62  ;;  %vm2031_vm7 = vcmp.eq.f32.partialorder %v2030_v32, 8.507059e+37 }
 0x84f   : > { %v3317_v59 = vpop.eup %3316 }
 0x850   : > { %v3319_v11 = vpop.eup %3318  ;;  %v2002_v9 = vmul.f32 %v3317_v59, %v2000_v30  ;;  %vm2007_vm0 = vweird.f32 %v3317_v59 }
 0x851   : > { %v2022_v38 = vmul.f32 %v3319_v11, %v2020_v31  ;;  %vm2008_vm2 = vmor %vm2006_vm1, %vm2007_vm0  ;;  %vm2027_vm4 = vweird.f32 %v3319_v11 }
 0x852   : > { %v2003_v63 = vsub.f32 1.0, %v2002_v9  ;;  %vm2028_vm6 = vmor %vm2026_vm5, %vm2027_vm4 }
 0x853   : > { %v2023_v52 = vsub.f32 1.0, %v2022_v38 }
 0x854   : > { %v2004_v20 = vmul.f32 %v3317_v59, %v2003_v63  ;;  %v4729_v63 = vld [vmem:[#allocation28_spill] sm:$0xff] }
 0x855   : > { %v2024_v44 = vmul.f32 %v3319_v11, %v2023_v52  ;;  %v695_v2 = vadd.f32 %v4729_v63, %v3948_v18 }
 0x856   : > { %v2005_v5 = vadd.f32 %v3317_v59, %v2004_v20 }
 0x857   : > { %v2025_v53 = vadd.f32 %v3319_v11, %v2024_v44 }
 0x858   : > { %v2009_v43 = vsel %vm2008_vm2, %v3317_v59, %v2005_v5 }
 0x859   : > { %v2014_v28 = vsel %vm2011_vm3, %v2013_v14, %v2009_v43  ;;  %v2029_v23 = vsel %vm2028_vm6, %v3319_v11, %v2025_v53 }
 0x85a   : > { %v2037_v33 = vmul.f32 %v2036_v13, %v2014_v28  ;;  %v2034_v10 = vsel %vm2031_vm7, %v2033_v60, %v2029_v23 }
 0x85c   : > { %v2038_v22 = vadd.f32 %v2037_v33, %v742_v47 }
 0x85e   : > { %3320 = vtanh.f32 %v2038_v22 }
 0x864   : > { %v3321_v61 = vpop.eup %3320 }
 0x865   : > { %v2040_v50 = vsub.f32 %v4436_v42, %v3321_v61 }
 0x867   : > { %v2041_v51 = vmul.f32 %v2040_v50, %v2034_v10 }
 0x869   : > { %v2042_v56 = vadd.f32 %v3321_v61, %v2041_v51 }
 0x86b   : > { %v2048_v19 = vmul.f32 %v2046_v7, %v2042_v56  ;;  %v2051_v40 = vsub.f32 %v2042_v56, %v4436_v42  ;;  %v4510_v56 = vld [vmem:[%s4665_s5] ss:$0 sm:$0xff] }
 0x86d   : > { %3022 = vst [vmem:[%s3756_s7 + $0x50] sm:$0xff] %v2048_v19  ;;  %v2052_v27 = vmul.f32 %v2051_v40, %v2046_v7  ;;  %v4730_v40 = vld [vmem:[#allocation41_spill] sm:$0xff] }
 0x86f   : > { %v4475_v39 = vadd.f32 %v2052_v27, %v4436_v42  ;;  %v4728_v42 = vld [vmem:[#allocation27_spill] sm:$0xff]  ;;  %v744_v27 = vadd.f32 %v4730_v40, %v3952_v54 }
 0x870   : > { %v646_v31 = vadd.f32 %v4728_v42, %v3943_v0 }
 0x871   : > { %v2059_v30 = vpack.c.bf16 %v4475_v39, %v4475_v39 }
 0x873   : > { %2068 = vmatmul.bf16.vlgmr.msra.gmra.mxu1 %v2059_v30  ;;  %2081 = vmatmul.bf16.vlgmr.msra.gmra.mxu2 %v2059_v30 }
 0x874   : > { %2094 = vmatmul.bf16.vlgmr.msrb.gmra.mxu3 %v2059_v30  ;;  %2292 = vmatpush.bf16.msra.mxu1 %v3803_v46 }
 0x875   : > { %2369 = vmatpush.bf16.msra.mxu2 %v3759_v4  ;;  %2382 = vmatpush.bf16.msrb.mxu3 %v3784_v12 }
 0x878   : > { %2293 = vmatpush.bf16.msra.mxu1 %v3810_v55 }
 0x879   : > { %2370 = vmatpush.bf16.msra.mxu2 %v3762_v6  ;;  %2383 = vmatpush.bf16.msrb.mxu3 %v3792_v26 }
 0x87c   : > { %2294 = vmatpush.bf16.msra.mxu1 %v3818_v1 }
 0x87d   : > { %2371 = vmatpush.bf16.msra.mxu2 %v3765_v15  ;;  %2384 = vmatpush.bf16.msrb.mxu3 %v3800_v37 }
 0x880   : > { %2295 = vmatpush.bf16.msra.mxu1 %v3825_v16 }
 0x881   : > { %2372 = vmatpush.bf16.msra.mxu2 %v3768_v25  ;;  %2385 = vmatpush.bf16.msrb.mxu3 %v3807_v48 }
 0x884   : > { %2296 = vmatpush.bf16.msra.mxu1 %v3837_v24 }
 0x885   : > { %2373 = vmatpush.bf16.msra.mxu2 %v3771_v35  ;;  %2386 = vmatpush.bf16.msrb.mxu3 %v3814_v58 }
 0x888   : > { %2297 = vmatpush.bf16.msra.mxu1 %v3855_v34 }
 0x889   : > { %2374 = vmatpush.bf16.msra.mxu2 %v3774_v45  ;;  %2387 = vmatpush.bf16.msrb.mxu3 %v3821_v3 }
 0x88c   : > { %2298 = vmatpush.bf16.msra.mxu1 %v3865_v41 }
 0x88d   : > { %2375 = vmatpush.bf16.msra.mxu2 %v3777_v57  ;;  %2388 = vmatpush.bf16.msrb.mxu3 %v3828_v17 }
 0x890   : > { %2299 = vmatpush.bf16.msra.mxu1 %v3873_v49 }
 0x891   : > { %2376 = vmatpush.bf16.msra.mxu2 %v3780_v8  ;;  %2389 = vmatpush.bf16.msrb.mxu3 %v3846_v29 }
 0x8f0   : > { %v2069_v59 = vpop.f32.mrf.mxu1 }
 0x8f1   : > { %v2099_v11 = vadd.f32 %v2069_v59, %v646_v31 }
 0x8f3   : > { %v3024_v9 = vmul.f32 -1.442695, %v2099_v11 }
 0x8f5   : > { %3322 = vpow2.f32 %v3024_v9 }
 0x8f6   : > { %v2082_v38 = vpop.f32.mrf.mxu2 }
 0x8f7   : > { %v2119_v20 = vadd.f32 %v2082_v38, %v695_v2  ;;  %v2095_v36 = vpop.f32.mrf.mxu3 }
 0x8f8   : > { %v2071_v5 = vpop.f32.mrf.mxu1  ;;  %v2139_v7 = vadd.f32 %v4510_v56, %v2095_v36 }
 0x8f9   : > { %v3025_v14 = vmul.f32 -1.442695, %v2119_v20 }
 0x8fb   : > { %v3323_v52 = vpop.eup %3322  ;;  %3324 = vpow2.f32 %v3025_v14 }
 0x8fc   : > { %v2103_v13 = vadd.f32 1.0, %v3323_v52  ;;  %v2149_v52 = vpop.permute.xlu2 %2148 }
 0x8fe   : > { %3326 = vrcp.f32 %v2103_v13  ;;  %v2084_v43 = vpop.f32.mrf.mxu2  ;;  %v2115_v53 = vand.u32 2147483648, %v2103_v13  ;;  %v2113_v32 = vand.u32 2147483647, %v2103_v13  ;;  %vm2109_vm9 = vweird.f32 %v2103_v13 }
 0x8ff   : > { %v2097_v28 = vpop.f32.mrf.mxu3 }
 0x900   : > { %v2116_v50 = vor.u32 1.1754944e-38, %v2115_v53  ;;  %vm2114_vm11 = vcmp.eq.f32.partialorder %v2113_v32, 8.507059e+37 }
 0x901   : > { %v3325_v21 = vpop.eup %3324 }
 0x902   : > { %v2123_v47 = vadd.f32 1.0, %v3325_v21 }
 0x904   : > { %v3327_v33 = vpop.eup %3326  ;;  %3328 = vrcp.f32 %v2123_v47  ;;  %v2135_v11 = vand.u32 2147483648, %v2123_v47  ;;  %vm2129_vm13 = vweird.f32 %v2123_v47  ;;  %v2133_v9 = vand.u32 2147483647, %v2123_v47 }
 0x905   : > { %v2105_v44 = vmul.f32 %v3327_v33, %v2103_v13  ;;  %vm2110_vm8 = vweird.f32 %v3327_v33 }
 0x906   : > { %vm2111_vm10 = vmor %vm2109_vm9, %vm2110_vm8  ;;  %v2136_v38 = vor.u32 1.1754944e-38, %v2135_v11  ;;  %vm2134_vm15 = vcmp.eq.f32.partialorder %v2133_v9, 8.507059e+37 }
 0x907   : > { %v2106_v22 = vsub.f32 1.0, %v2105_v44 }
 0x909   : > { %v2107_v62 = vmul.f32 %v3327_v33, %v2106_v22 }
 0x90a   : > { %v3329_v23 = vpop.eup %3328 }
 0x90b   : > { %v2125_v61 = vmul.f32 %v3329_v23, %v2123_v47  ;;  %v2108_v60 = vadd.f32 %v3327_v33, %v2107_v62  ;;  %vm2130_vm12 = vweird.f32 %v3329_v23 }
 0x90c   : > { %vm2131_vm14 = vmor %vm2129_vm13, %vm2130_vm12 }
 0x90d   : > { %v2126_v10 = vsub.f32 1.0, %v2125_v61  ;;  %v2112_v51 = vsel %vm2111_vm10, %v3327_v33, %v2108_v60 }
 0x90e   : > { %v2117_v19 = vsel %vm2114_vm11, %v2116_v50, %v2112_v51 }
 0x90f   : > { %v2140_v30 = vmul.f32 %v2139_v7, %v2117_v19  ;;  %v2127_v42 = vmul.f32 %v3329_v23, %v2126_v10 }
 0x911   : > { %v2141_v31 = vadd.f32 %v2140_v30, %v744_v27  ;;  %v2128_v59 = vadd.f32 %v3329_v23, %v2127_v42  ;;  %v4733_v27 = vld [vmem:[#allocation42_spill] sm:$0xff] }
 0x912   : > { %v747_v30 = vadd.f32 %v4733_v27, %v3952_v54 }
 0x913   : > { %3330 = vtanh.f32 %v2141_v31  ;;  %v2132_v63 = vsel %vm2131_vm14, %v3329_v23, %v2128_v59 }
 0x914   : > { %v2137_v36 = vsel %vm2134_vm15, %v2136_v38, %v2132_v63 }
 0x919   : > { %v3331_v2 = vpop.eup %3330 }
 0x91a   : > { %v2143_v20 = vsub.f32 %v4475_v39, %v3331_v2 }
 0x91c   : > { %v2144_v5 = vmul.f32 %v2143_v20, %v2137_v36 }
 0x91e   : > { %v2145_v14 = vadd.f32 %v3331_v2, %v2144_v5 }
 0x920   : > { %v2151_v13 = vmul.f32 %v2149_v52, %v2145_v14  ;;  %v2154_v43 = vsub.f32 %v2145_v14, %v4475_v39 }
 0x922   : > { %3026 = vst [vmem:[%s3756_s7 + $0x58] sm:$0xff] %v2151_v13  ;;  %v2155_v28 = vmul.f32 %v2154_v43, %v2149_v52  ;;  %v2252_v13 = vpop.permute.xlu0 %2251 }
 0x924   : > { %v4519_v21 = vadd.f32 %v2155_v28, %v4475_v39 }
 0x926   : > { %v2162_v47 = vpack.c.bf16 %v4519_v21, %v4519_v21 }
 0x928   : > { %2171 = vmatmul.bf16.vlgmr.msrb.gmra.mxu0 %v2162_v47  ;;  %2184 = vmatmul.bf16.vlgmr.msrb.gmra.mxu1 %v2162_v47 }
 0x929   : > { %2197 = vmatmul.bf16.vlgmr.msrb.gmra.mxu2 %v2162_v47  ;;  %2395 = vmatpush.bf16.msrb.mxu0 %v3803_v46 }
 0x92a   : > { %2472 = vmatpush.bf16.msrb.mxu1 %v3759_v4  ;;  %2485 = vmatpush.bf16.msrb.mxu2 %v3784_v12  ;;  %v4731_v4 = vld [vmem:[#allocation29_spill] sm:$0xff] }
 0x92d   : > { %2396 = vmatpush.bf16.msrb.mxu0 %v3810_v55 }
 0x92e   : > { %2473 = vmatpush.bf16.msrb.mxu1 %v3762_v6  ;;  %2486 = vmatpush.bf16.msrb.mxu2 %v3792_v26  ;;  %v649_v6 = vadd.f32 %v4731_v4, %v3943_v0 }
 0x931   : > { %2397 = vmatpush.bf16.msrb.mxu0 %v3818_v1 }
 0x932   : > { %2474 = vmatpush.bf16.msrb.mxu1 %v3765_v15  ;;  %2487 = vmatpush.bf16.msrb.mxu2 %v3800_v37  ;;  %v4732_v15 = vld [vmem:[#allocation30_spill] sm:$0xff] }
 0x935   : > { %2398 = vmatpush.bf16.msrb.mxu0 %v3825_v16 }
 0x936   : > { %2475 = vmatpush.bf16.msrb.mxu1 %v3768_v25  ;;  %2488 = vmatpush.bf16.msrb.mxu2 %v3807_v48  ;;  %v698_v25 = vadd.f32 %v4732_v15, %v3948_v18 }
 0x939   : > { %2399 = vmatpush.bf16.msrb.mxu0 %v3837_v24 }
 0x93a   : > { %2476 = vmatpush.bf16.msrb.mxu1 %v3771_v35  ;;  %2489 = vmatpush.bf16.msrb.mxu2 %v3814_v58 }
 0x93d   : > { %2400 = vmatpush.bf16.msrb.mxu0 %v3855_v34 }
 0x93e   : > { %2477 = vmatpush.bf16.msrb.mxu1 %v3774_v45  ;;  %2490 = vmatpush.bf16.msrb.mxu2 %v3821_v3 }
 0x941   : > { %2401 = vmatpush.bf16.msrb.mxu0 %v3865_v41 }
 0x942   : > { %2478 = vmatpush.bf16.msrb.mxu1 %v3777_v57  ;;  %2491 = vmatpush.bf16.msrb.mxu2 %v3828_v17 }
 0x945   : > { %2402 = vmatpush.bf16.msrb.mxu0 %v3873_v49 }
 0x946   : > { %2479 = vmatpush.bf16.msrb.mxu1 %v3780_v8  ;;  %2492 = vmatpush.bf16.msrb.mxu2 %v3846_v29 }
 0x9a5   : > { %v2172_v35 = vpop.f32.mrf.mxu0  ;;  %v2185_v45 = vpop.f32.mrf.mxu1 }
 0x9a6   : > { %v2202_v12 = vadd.f32 %v2172_v35, %v649_v6  ;;  %v2222_v26 = vadd.f32 %v2185_v45, %v698_v25 }
 0x9a8   : > { %v3028_v37 = vmul.f32 -1.442695, %v2202_v12  ;;  %v3029_v57 = vmul.f32 -1.442695, %v2222_v26 }
 0x9aa   : > { %3332 = vpow2.f32 %v3028_v37 }
 0x9ab   : > { %3334 = vpow2.f32 %v3029_v57 }
 0x9ac   : > { %v2198_v48 = vpop.f32.mrf.mxu2 }
 0x9ad   : > { %v2174_v58 = vpop.f32.mrf.mxu0  ;;  %v2187_v3 = vpop.f32.mrf.mxu1  ;;  %v2242_v19 = vadd.f32 %v4510_v56, %v2198_v48 }
 0x9b0   : > { %v3333_v8 = vpop.eup %3332 }
 0x9b1   : > { %v3335_v17 = vpop.eup %3334  ;;  %v2206_v29 = vadd.f32 1.0, %v3333_v8 }
 0x9b2   : > { %v2226_v39 = vadd.f32 1.0, %v3335_v17 }
 0x9b3   : > { %3336 = vrcp.f32 %v2206_v29  ;;  %v2218_v23 = vand.u32 2147483648, %v2206_v29  ;;  %v2216_v60 = vand.u32 2147483647, %v2206_v29  ;;  %vm2212_vm1 = vweird.f32 %v2206_v29 }
 0x9b4   : > { %3338 = vrcp.f32 %v2226_v39  ;;  %v2200_v33 = vpop.f32.mrf.mxu2  ;;  %v2238_v9 = vand.u32 2147483648, %v2226_v39  ;;  %vm2232_vm5 = vweird.f32 %v2226_v39  ;;  %v2236_v63 = vand.u32 2147483647, %v2226_v39 }
 0x9b5   : > { %v2219_v51 = vor.u32 1.1754944e-38, %v2218_v23  ;;  %vm2217_vm3 = vcmp.eq.f32.partialorder %v2216_v60, 8.507059e+37  ;;  %v4736_v60 = vld [vmem:[#allocation43_spill] sm:$0xff] }
 0x9b6   : > { %v2239_v20 = vor.u32 1.1754944e-38, %v2238_v9  ;;  %vm2237_vm7 = vcmp.eq.f32.partialorder %v2236_v63, 8.507059e+37 }
 0x9b9   : > { %v3337_v44 = vpop.eup %3336 }
 0x9ba   : > { %v3339_v22 = vpop.eup %3338  ;;  %v2208_v53 = vmul.f32 %v3337_v44, %v2206_v29  ;;  %vm2213_vm0 = vweird.f32 %v3337_v44 }
 0x9bb   : > { %v2228_v32 = vmul.f32 %v3339_v22, %v2226_v39  ;;  %vm2214_vm2 = vmor %vm2212_vm1, %vm2213_vm0  ;;  %vm2233_vm4 = vweird.f32 %v3339_v22 }
 0x9bc   : > { %v2209_v62 = vsub.f32 1.0, %v2208_v53  ;;  %vm2234_vm6 = vmor %vm2232_vm5, %vm2233_vm4 }
 0x9bd   : > { %v2229_v10 = vsub.f32 1.0, %v2228_v32 }
 0x9be   : > { %v2210_v61 = vmul.f32 %v3337_v44, %v2209_v62 }
 0x9bf   : > { %v2230_v31 = vmul.f32 %v3339_v22, %v2229_v10 }
 0x9c0   : > { %v2211_v50 = vadd.f32 %v3337_v44, %v2210_v61 }
 0x9c1   : > { %v2231_v11 = vadd.f32 %v3339_v22, %v2230_v31 }
 0x9c2   : > { %v2215_v7 = vsel %vm2214_vm2, %v3337_v44, %v2211_v50  ;;  %v749_v50 = vadd.f32 %v4736_v60, %v3952_v54 }
 0x9c3   : > { %v2220_v40 = vsel %vm2217_vm3, %v2219_v51, %v2215_v7  ;;  %v2235_v2 = vsel %vm2234_vm6, %v3339_v22, %v2231_v11 }
 0x9c4   : > { %v2243_v42 = vmul.f32 %v2242_v19, %v2220_v40  ;;  %v2240_v5 = vsel %vm2237_vm7, %v2239_v20, %v2235_v2  ;;  %v2355_v2 = vpop.permute.xlu1 %2354 }
 0x9c6   : > { %v2244_v59 = vadd.f32 %v2243_v42, %v747_v30 }
 0x9c8   : > { %3340 = vtanh.f32 %v2244_v59 }
 0x9ce   : > { %v3341_v38 = vpop.eup %3340 }
 0x9cf   : > { %v2246_v36 = vsub.f32 %v4519_v21, %v3341_v38 }
 0x9d1   : > { %v2247_v14 = vmul.f32 %v2246_v36, %v2240_v5 }
 0x9d3   : > { %v2248_v52 = vadd.f32 %v3341_v38, %v2247_v14 }
 0x9d5   : > { %v2254_v43 = vmul.f32 %v2252_v13, %v2248_v52  ;;  %v2257_v28 = vsub.f32 %v2248_v52, %v4519_v21 }
 0x9d7   : > { %3030 = vst [vmem:[%s3756_s7 + $0x60] sm:$0xff] %v2254_v43  ;;  %v2258_v47 = vmul.f32 %v2257_v28, %v2252_v13  ;;  %v4737_v13 = vld [vmem:[#allocation33_spill] sm:$0xff]  ;;  %v4738_v28 = vld [vmem:[#allocation34_spill] sm:$0xff] }
 0x9d8   : > { %v654_v43 = vadd.f32 %v4737_v13, %v3943_v0 }
 0x9d9   : > { %v4558_v4 = vadd.f32 %v2258_v47, %v4519_v21  ;;  %v4734_v21 = vld [vmem:[#allocation32_spill] sm:$0xff]  ;;  %v703_v47 = vadd.f32 %v4738_v28, %v3948_v18 }
 0x9da   : > { %v700_v15 = vadd.f32 %v4734_v21, %v3948_v18 }
 0x9db   : > { %v2265_v6 = vpack.c.bf16 %v4558_v4, %v4558_v4 }
 0x9dd   : > { %2274 = vmatmul.bf16.vlgmr.msra.gmra.mxu3 %v2265_v6  ;;  %2287 = vmatmul.bf16.vlgmr.msra.gmra.mxu0 %v2265_v6 }
 0x9de   : > { %2300 = vmatmul.bf16.vlgmr.msra.gmra.mxu1 %v2265_v6  ;;  %2498 = vmatpush.bf16.msra.mxu3 %v3803_v46 }
 0x9e2   : > { %2499 = vmatpush.bf16.msra.mxu3 %v3810_v55  ;;  %v4735_v55 = vld [vmem:[#allocation31_spill] sm:$0xff] }
 0x9e6   : > { %2500 = vmatpush.bf16.msra.mxu3 %v3818_v1  ;;  %v651_v1 = vadd.f32 %v4735_v55, %v3943_v0 }
 0x9ea   : > { %2501 = vmatpush.bf16.msra.mxu3 %v3825_v16 }
 0x9ee   : > { %2502 = vmatpush.bf16.msra.mxu3 %v3837_v24 }
 0x9f2   : > { %2503 = vmatpush.bf16.msra.mxu3 %v3855_v34 }
 0x9f6   : > { %2504 = vmatpush.bf16.msra.mxu3 %v3865_v41 }
 0x9fa   : > { %2505 = vmatpush.bf16.msra.mxu3 %v3873_v49 }
 0xa5a   : > { %v2288_v25 = vpop.f32.mrf.mxu0 }
 0xa5b   : > { %v2325_v35 = vadd.f32 %v2288_v25, %v700_v15  ;;  %v2301_v46 = vpop.f32.mrf.mxu1 }
 0xa5c   : > { %v2345_v32 = vadd.f32 %v4510_v56, %v2301_v46 }
 0xa5d   : > { %v3033_v45 = vmul.f32 -1.442695, %v2325_v35 }
 0xa5f   : > { %3342 = vpow2.f32 %v3033_v45 }
 0xa60   : > { %v2275_v12 = vpop.f32.mrf.mxu3 }
 0xa61   : > { %v2305_v16 = vadd.f32 %v2275_v12, %v651_v1 }
 0xa62   : > { %v2290_v24 = vpop.f32.mrf.mxu0 }
 0xa63   : > { %v3032_v26 = vmul.f32 -1.442695, %v2305_v16  ;;  %v2303_v34 = vpop.f32.mrf.mxu1 }
 0xa65   : > { %3344 = vpow2.f32 %v3032_v26  ;;  %v3343_v41 = vpop.eup %3342 }
 0xa66   : > { %v2329_v57 = vadd.f32 1.0, %v3343_v41 }
 0xa68   : > { %v2277_v37 = vpop.f32.mrf.mxu3  ;;  %v2341_v40 = vand.u32 2147483648, %v2329_v57  ;;  %vm2335_vm13 = vweird.f32 %v2329_v57  ;;  %v2339_v27 = vand.u32 2147483647, %v2329_v57 }
 0xa6a   : > { %v2342_v31 = vor.u32 1.1754944e-38, %v2341_v40  ;;  %vm2340_vm15 = vcmp.eq.f32.partialorder %v2339_v27, 8.507059e+37 }
 0xa6b   : > { %v3345_v49 = vpop.eup %3344 }
 0xa6c   : > { %v2309_v48 = vadd.f32 1.0, %v3345_v49 }
 0xa6e   : > { %3346 = vrcp.f32 %v2309_v48  ;;  %v2321_v39 = vand.u32 2147483648, %v2309_v48  ;;  %v2319_v44 = vand.u32 2147483647, %v2309_v48  ;;  %vm2315_vm9 = vweird.f32 %v2309_v48 }
 0xa6f   : > { %3348 = vrcp.f32 %v2329_v57 }
 0xa70   : > { %v2322_v62 = vor.u32 1.1754944e-38, %v2321_v39  ;;  %vm2320_vm11 = vcmp.eq.f32.partialorder %v2319_v44, 8.507059e+37  ;;  %v4739_v44 = vld [vmem:[#allocation44_spill] sm:$0xff] }
 0xa74   : > { %v3347_v58 = vpop.eup %3346 }
 0xa75   : > { %v3349_v3 = vpop.eup %3348  ;;  %v2311_v8 = vmul.f32 %v3347_v58, %v2309_v48  ;;  %vm2316_vm8 = vweird.f32 %v3347_v58 }
 0xa76   : > { %v2331_v29 = vmul.f32 %v3349_v3, %v2329_v57  ;;  %vm2317_vm10 = vmor %vm2315_vm9, %vm2316_vm8  ;;  %vm2336_vm12 = vweird.f32 %v3349_v3 }
 0xa77   : > { %v2312_v17 = vsub.f32 1.0, %v2311_v8  ;;  %vm2337_vm14 = vmor %vm2335_vm13, %vm2336_vm12 }
 0xa78   : > { %v2332_v53 = vsub.f32 1.0, %v2331_v29 }
 0xa79   : > { %v2313_v33 = vmul.f32 %v3347_v58, %v2312_v17 }
 0xa7a   : > { %v2333_v51 = vmul.f32 %v3349_v3, %v2332_v53 }
 0xa7b   : > { %v2314_v22 = vadd.f32 %v3347_v58, %v2313_v33 }
 0xa7c   : > { %v2334_v19 = vadd.f32 %v3349_v3, %v2333_v51 }
 0xa7d   : > { %v2318_v23 = vsel %vm2317_vm10, %v3347_v58, %v2314_v22  ;;  %v752_v22 = vadd.f32 %v4739_v44, %v3952_v54 }
 0xa7e   : > { %v2323_v61 = vsel %vm2320_vm11, %v2322_v62, %v2318_v23  ;;  %v2338_v30 = vsel %vm2337_vm14, %v3349_v3, %v2334_v19 }
 0xa7f   : > { %v2346_v10 = vmul.f32 %v2345_v32, %v2323_v61  ;;  %v2343_v11 = vsel %vm2340_vm15, %v2342_v31, %v2338_v30  ;;  %v2458_v30 = vpop.permute.xlu2 %2457 }
 0xa81   : > { %v2347_v7 = vadd.f32 %v2346_v10, %v749_v50 }
 0xa83   : > { %3350 = vtanh.f32 %v2347_v7 }
 0xa89   : > { %v3351_v42 = vpop.eup %3350 }
 0xa8a   : > { %v2349_v59 = vsub.f32 %v4558_v4, %v3351_v42 }
 0xa8c   : > { %v2350_v9 = vmul.f32 %v2349_v59, %v2343_v11 }
 0xa8e   : > { %v2351_v63 = vadd.f32 %v3351_v42, %v2350_v9 }
 0xa90   : > { %v2357_v38 = vmul.f32 %v2355_v2, %v2351_v63  ;;  %v2360_v20 = vsub.f32 %v2351_v63, %v4558_v4  ;;  %v4740_v63 = vld [vmem:[#allocation35_spill] sm:$0xff] }
 0xa92   : > { %3034 = vst [vmem:[%s3756_s7 + $0x68] sm:$0xff] %v2357_v38  ;;  %v2361_v36 = vmul.f32 %v2360_v20, %v2355_v2  ;;  %v656_v2 = vadd.f32 %v4740_v63, %v3943_v0 }
 0xa94   : > { %v4581_v5 = vadd.f32 %v2361_v36, %v4558_v4 }
 0xa96   : > { %v2368_v14 = vpack.c.bf16 %v4581_v5, %v4581_v5 }
 0xa98   : > { %2377 = vmatmul.bf16.vlgmr.msra.gmra.mxu2 %v2368_v14  ;;  %2390 = vmatmul.bf16.vlgmr.msrb.gmra.mxu3 %v2368_v14 }
 0xa99   : > { %2403 = vmatmul.bf16.vlgmr.msrb.gmra.mxu0 %v2368_v14  ;;  %v4741_v14 = vld [vmem:[#allocation36_spill] sm:$0xff] }
 0xb16   : > { %v2404_v52 = vpop.f32.mrf.mxu0 }
 0xb17   : > { %v2448_v29 = vadd.f32 %v4510_v56, %v2404_v52  ;;  %v705_v52 = vadd.f32 %v4741_v14, %v3948_v18 }
 0xb1b   : > { %v2378_v6 = vpop.f32.mrf.mxu2  ;;  %v2391_v21 = vpop.f32.mrf.mxu3 }
 0xb1c   : > { %v2408_v15 = vadd.f32 %v2378_v6, %v654_v43  ;;  %v2428_v25 = vadd.f32 %v2391_v21, %v703_v47 }
 0xb1e   : > { %v3036_v35 = vmul.f32 -1.442695, %v2408_v15  ;;  %v3037_v4 = vmul.f32 -1.442695, %v2428_v25  ;;  %v2406_v46 = vpop.f32.mrf.mxu0 }
 0xb20   : > { %3352 = vpow2.f32 %v3036_v35 }
 0xb21   : > { %3354 = vpow2.f32 %v3037_v4 }
 0xb23   : > { %v2380_v45 = vpop.f32.mrf.mxu2  ;;  %v2393_v55 = vpop.f32.mrf.mxu3 }
 0xb26   : > { %v3353_v1 = vpop.eup %3352 }
 0xb27   : > { %v3355_v12 = vpop.eup %3354  ;;  %v2412_v16 = vadd.f32 1.0, %v3353_v1 }
 0xb28   : > { %v2432_v24 = vadd.f32 1.0, %v3355_v12 }
 0xb29   : > { %3356 = vrcp.f32 %v2412_v16  ;;  %v2424_v49 = vand.u32 2147483648, %v2412_v16  ;;  %v2422_v58 = vand.u32 2147483647, %v2412_v16  ;;  %vm2418_vm1 = vweird.f32 %v2412_v16 }
 0xb2a   : > { %3358 = vrcp.f32 %v2432_v24  ;;  %v2444_v61 = vand.u32 2147483648, %v2432_v24  ;;  %vm2438_vm5 = vweird.f32 %v2432_v24  ;;  %v2442_v60 = vand.u32 2147483647, %v2432_v24 }
 0xb2b   : > { %v2425_v8 = vor.u32 1.1754944e-38, %v2424_v49  ;;  %vm2423_vm3 = vcmp.eq.f32.partialorder %v2422_v58, 8.507059e+37 }
 0xb2c   : > { %v2445_v51 = vor.u32 1.1754944e-38, %v2444_v61  ;;  %vm2443_vm7 = vcmp.eq.f32.partialorder %v2442_v60, 8.507059e+37 }
 0xb2f   : > { %v3357_v26 = vpop.eup %3356 }
 0xb30   : > { %v3359_v34 = vpop.eup %3358  ;;  %v2414_v41 = vmul.f32 %v3357_v26, %v2412_v16  ;;  %vm2419_vm0 = vweird.f32 %v3357_v26 }
 0xb31   : > { %v2434_v57 = vmul.f32 %v3359_v34, %v2432_v24  ;;  %vm2420_vm2 = vmor %vm2418_vm1, %vm2419_vm0  ;;  %vm2439_vm4 = vweird.f32 %v3359_v34 }
 0xb32   : > { %v2415_v37 = vsub.f32 1.0, %v2414_v41  ;;  %vm2440_vm6 = vmor %vm2438_vm5, %vm2439_vm4 }
 0xb33   : > { %v2435_v17 = vsub.f32 1.0, %v2434_v57  ;;  %v4742_v57 = vld [vmem:[#allocation45_spill] sm:$0xff] }
 0xb34   : > { %v2416_v48 = vmul.f32 %v3357_v26, %v2415_v37 }
 0xb35   : > { %v2436_v62 = vmul.f32 %v3359_v34, %v2435_v17 }
 0xb36   : > { %v2417_v3 = vadd.f32 %v3357_v26, %v2416_v48  ;;  %v754_v48 = vadd.f32 %v4742_v57, %v3952_v54 }
 0xb37   : > { %v2437_v23 = vadd.f32 %v3359_v34, %v2436_v62 }
 0xb38   : > { %v2421_v39 = vsel %vm2420_vm2, %v3357_v26, %v2417_v3 }
 0xb39   : > { %v2426_v33 = vsel %vm2423_vm3, %v2425_v8, %v2421_v39  ;;  %v2441_v50 = vsel %vm2440_vm6, %v3359_v34, %v2437_v23 }
 0xb3a   : > { %v2449_v53 = vmul.f32 %v2448_v29, %v2426_v33  ;;  %v2446_v19 = vsel %vm2443_vm7, %v2445_v51, %v2441_v50 }
 0xb3c   : > { %v2450_v32 = vadd.f32 %v2449_v53, %v752_v22 }
 0xb3e   : > { %3360 = vtanh.f32 %v2450_v32  ;;  %v2561_v32 = vpop.permute.xlu0 %2560 }
 0xb44   : > { %v3361_v10 = vpop.eup %3360 }
 0xb45   : > { %v2452_v7 = vsub.f32 %v4581_v5, %v3361_v10 }
 0xb47   : > { %v2453_v40 = vmul.f32 %v2452_v7, %v2446_v19 }
 0xb49   : > { %v2454_v27 = vadd.f32 %v3361_v10, %v2453_v40 }
 0xb4b   : > { %v2460_v42 = vmul.f32 %v2458_v30, %v2454_v27  ;;  %v2463_v31 = vsub.f32 %v2454_v27, %v4581_v5 }
 0xb4d   : > { %3038 = vst [vmem:[%s3756_s7 + $0x70] sm:$0xff] %v2460_v42  ;;  %v2464_v59 = vmul.f32 %v2463_v31, %v2458_v30 }
 0xb4f   : > { %v4596_v11 = vadd.f32 %v2464_v59, %v4581_v5 }
 0xb51   : > { %v2471_v9 = vpack.c.bf16 %v4596_v11, %v4596_v11 }
 0xb53   : > { %2480 = vmatmul.bf16.vlgmr.msrb.gmra.mxu1 %v2471_v9  ;;  %2493 = vmatmul.bf16.vlgmr.msrb.gmra.mxu2 %v2471_v9 }
 0xb54   : > { %2506 = vmatmul.bf16.vlgmr.msra.gmra.mxu3 %v2471_v9 }
 0xbd0   : > { %v2481_v38 = vpop.f32.mrf.mxu1 }
 0xbd1   : > { %v2511_v20 = vadd.f32 %v2481_v38, %v656_v2 }
 0xbd3   : > { %v3040_v36 = vmul.f32 -1.442695, %v2511_v20 }
 0xbd5   : > { %3362 = vpow2.f32 %v3040_v36 }
 0xbd6   : > { %v2494_v13 = vpop.f32.mrf.mxu2 }
 0xbd7   : > { %v2531_v43 = vadd.f32 %v2494_v13, %v705_v52  ;;  %v2507_v5 = vpop.f32.mrf.mxu3 }
 0xbd8   : > { %v2483_v28 = vpop.f32.mrf.mxu1  ;;  %v2551_v37 = vadd.f32 %v4510_v56, %v2507_v5 }
 0xbd9   : > { %v3041_v47 = vmul.f32 -1.442695, %v2531_v43 }
 0xbdb   : > { %v3363_v6 = vpop.eup %3362  ;;  %3364 = vpow2.f32 %v3041_v47 }
 0xbdc   : > { %v2515_v21 = vadd.f32 1.0, %v3363_v6 }
 0xbde   : > { %3366 = vrcp.f32 %v2515_v21  ;;  %v2496_v15 = vpop.f32.mrf.mxu2  ;;  %v2527_v55 = vand.u32 2147483648, %v2515_v21  ;;  %v2525_v1 = vand.u32 2147483647, %v2515_v21  ;;  %vm2521_vm9 = vweird.f32 %v2515_v21 }
 0xbdf   : > { %v2509_v25 = vpop.f32.mrf.mxu3 }
 0xbe0   : > { %v2528_v26 = vor.u32 1.1754944e-38, %v2527_v55  ;;  %vm2526_vm11 = vcmp.eq.f32.partialorder %v2525_v1, 8.507059e+37 }
 0xbe1   : > { %v3365_v35 = vpop.eup %3364 }
 0xbe2   : > { %v2535_v0 = vadd.f32 1.0, %v3365_v35 }
 0xbe4   : > { %v3367_v4 = vpop.eup %3366  ;;  %3368 = vrcp.f32 %v2535_v0  ;;  %v2547_v29 = vand.u32 2147483648, %v2535_v0  ;;  %vm2541_vm13 = vweird.f32 %v2535_v0  ;;  %v2545_v39 = vand.u32 2147483647, %v2535_v0 }
 0xbe5   : > { %v2517_v46 = vmul.f32 %v3367_v4, %v2515_v21  ;;  %vm2522_vm8 = vweird.f32 %v3367_v4 }
 0xbe6   : > { %vm2523_vm10 = vmor %vm2521_vm9, %vm2522_vm8  ;;  %v2548_v22 = vor.u32 1.1754944e-38, %v2547_v29  ;;  %vm2546_vm15 = vcmp.eq.f32.partialorder %v2545_v39, 8.507059e+37 }
 0xbe7   : > { %v2518_v45 = vsub.f32 1.0, %v2517_v46 }
 0xbe9   : > { %v2519_v18 = vmul.f32 %v3367_v4, %v2518_v45 }
 0xbea   : > { %v3369_v12 = vpop.eup %3368 }
 0xbeb   : > { %v2537_v16 = vmul.f32 %v3369_v12, %v2535_v0  ;;  %v2520_v24 = vadd.f32 %v3367_v4, %v2519_v18  ;;  %vm2542_vm12 = vweird.f32 %v3369_v12 }
 0xbec   : > { %vm2543_vm14 = vmor %vm2541_vm13, %vm2542_vm12 }
 0xbed   : > { %v2538_v34 = vsub.f32 1.0, %v2537_v16  ;;  %v2524_v41 = vsel %vm2523_vm10, %v3367_v4, %v2520_v24 }
 0xbee   : > { %v2529_v49 = vsel %vm2526_vm11, %v2528_v26, %v2524_v41 }
 0xbef   : > { %v2552_v58 = vmul.f32 %v2551_v37, %v2529_v49  ;;  %v2539_v3 = vmul.f32 %v3369_v12, %v2538_v34 }
 0xbf1   : > { %v2553_v8 = vadd.f32 %v2552_v58, %v754_v48  ;;  %v2540_v17 = vadd.f32 %v3369_v12, %v2539_v3 }
 0xbf3   : > { %3370 = vtanh.f32 %v2553_v8  ;;  %v2544_v33 = vsel %vm2543_vm14, %v3369_v12, %v2540_v17 }
 0xbf4   : > { %v2549_v53 = vsel %vm2546_vm15, %v2548_v22, %v2544_v33 }
 0xbf9   : > { %v3371_v44 = vpop.eup %3370 }
 0xbfa   : > { %v2555_v56 = vsub.f32 %v4596_v11, %v3371_v44 }
 0xbfc   : > { %v2556_v62 = vmul.f32 %v2555_v56, %v2549_v53 }
 0xbfe   : > { %v2557_v54 = vadd.f32 %v3371_v44, %v2556_v62 }
 0xc00   : > { %v2563_v23 = vmul.f32 %v2561_v32, %v2557_v54  ;;  %v2566_v61 = vsub.f32 %v2557_v54, %v4596_v11 }
 0xc02   : > { %3042 = vst [vmem:[%s3756_s7 + $0x78] sm:$0xff] %v2563_v23  ;;  %v2567_v60 = vmul.f32 %v2566_v61, %v2561_v32  ;;  %2573 = sbr.rel (%p3043_p1) target bundleno = 3080 (0xc08), region = 64 }
 0xc04   : > { %v2568_v50 = vadd.f32 %v2567_v60, %v4596_v11 }
 0xc06   : > { %2569 = vst [vmem:[#allocation2] sm:$0xff] %v2568_v50 }
 0xc07   : > { %2574 = vst [vmem:[#allocation10] sm:$0xff] %v2568_v50 }
 0xc08 PF: > { %s3108_s18 = sshll.u32 %s3575_s27, 7  ;;  %s2589_s9 = sshll.u32 %s3756_s7, 4  ;;  %s2590_s9 = int_to_ptr.vmem [resolvable:$true] %s2589_s9 }
 0xc09   : > { %s2588_s2 = scalar_lea.hbm %s4666_s6, %s3108_s18  ;;  %s2576_s12 = scalar_lea.sflag [#allocation5], %s3741_s14 }
 0xc0a   : > { %s2591_s11 = sshll.u32 %s2588_s2, 4  ;;  %s3485_s27 = scalar_lea.hbm %s4666_s6, 256  ;;  %s2592_s11 = int_to_ptr.hbm [resolvable:$true] %s2591_s11 }
 0xc0b   : > { %s3479_s16 = sshra.s32 %s2592_s11, 4  ;;  %s3480_s16 = int_to_ptr.hbm [resolvable:$true] %s3479_s16 }
 0xc0c   : > { %s3481_s13 = scalar_lea.hbm %s3480_s16, 128  ;;  %p3486_p0 = scmp.lt.s32.totalorder %s3480_s16, %s4666_s6 }
 0xc0d   : > { %p3482_p4 = scmp.ne.s32.totalorder %s3480_s16, %s3481_s13  ;;  %p3487_p3 = scmp.lt.s32.totalorder %s3485_s27, %s3481_s13 }
 0xc0f   : > { %p3483_p12 = pnand %p3482_p4, %p3720_p7  ;;  %p3488_p5 = por %p3487_p3, %p3486_p0 }
 0xc11   : > { %p3484_p13 = pneg %p3483_p12 }
 0xc13   : > { %p3489_p9 = pnand %p3488_p5, %p3484_p13 }
 0xc15   : > { %3492 = shalt.err (!%p3489_p9)
}
 0xc16   : > { %s3594_s14 = smov 128   ;;  %s3595_s7 = smov 8  }
 0xc17   : > { %3119 = dma.vmem_to_hbm [thread:$0]  (%p3720_p7), %s2590_s9, 2048, %s2592_s11, %s2576_s12, %s3594_s14, %s3594_s14, %s3595_s7  }
 0xc18   : > { %s4743_s8 = sld [smem:[#allocation48_spill]]  ;;  %s3596_s3 = smov [#allocation10]  }
 0xc19   : > { %s2606_s20 = sshll.u32 %s3596_s3, 4  ;;  %s2607_s20 = int_to_ptr.vmem [resolvable:$true] %s2606_s20 }
 0xc1e   : > { %s2608_s18 = sshll.u32 %s4743_s8, 4  ;;  %s2609_s18 = int_to_ptr.hbm [resolvable:$true] %s2608_s18 }
 0xc1f   : > { %3121 = dma.vmem_to_hbm [thread:$0]  (%p3675_p2), %s2607_s20, 128, %s2609_s18, [#allocation11]  }
 0xc20   : > { %3554 = dma.done.wait (%p3675_p2), [#allocation11], 128  }
 0xc21   : > { %3556 = vsyncadd (%p3675_p2), [#allocation11], 4294967168 }
 0xc22 PF: > { %s4744_s2 = sld [smem:[#allocation16_spill]]  ;;  %p3137_p7 = pnand %p2745_p11, %p3686_p6 }
 0xc24   : > { %p3138_p10 = pneg %p3137_p7 }
 0xc28   : > { %s2625_s15 = sand.u32 1, %s4744_s2  }
 0xc29   : > { %s2626_s9 = scalar_lea.sflag [#allocation5], %s2625_s15 }
 0xc2a   : > { %3558 = dma.done.wait (%p3138_p10), %s2626_s9, 2048  }
 0xc2b   : > { %3560 = vsyncadd (%p3138_p10), %s2626_s9, 4294965248  ;;  %s26_s29 = sadd.s32 1, %s3583_s29   ;;  %s4746_s10 = sld [smem:[#allocation18_spill]] }
 0xc2c   : > { %p23_p8 = scmp.ge.s32.totalorder %s26_s29, 4   ;;  %s4747_s24 = smov %s3567_s25 }
 0xc2d   : > { %s4748_s25 = smov %s3571_s26  ;;  %s4749_s26 = smov %s3729_s22 }
 0xc2e   : > { %s4750_s27 = smov %s3579_s28  ;;  %25 = sbr.rel (!%p23_p8) target bundleno = 12 (0xc), region = 132 }
 0xc31   : > { %s4751_s28 = smov %s4746_s10 }
 0xc33   :  { %2632 = vsyncpa [#allocation4], 1 }
 0xc34   :  { %2634 = vsyncpa [#allocation4 + $0x1], 1 }
 0xc35   :  { %2635 = vsyncpa [#allocation7], 1 }
 0xc36   :  { %2636 = vsyncpa [#allocation5], 1 }
 0xc37   :  { %2638 = vsyncpa [#allocation5 + $0x1], 1 }
 0xc38   :  { %2639 = vsyncpa [#allocation11], 1 }

</bundles_post_ra>
